<compile_context>
chip_gen: v7x
topology: tpu7x:2x2x1
jax: 0.10.0
libtpu: 0.0.40
codegen_flags: <defaults>
</compile_context>

<pallas_src>
import functools
import math

import jax
import jax.numpy as jnp
from jax.experimental import pallas as pl
from jax.experimental.pallas import tpu as pltpu

EPS = 1e-6


# ------------------------------ In-kernel math ------------------------------ #

def _ln_f32(x, g, b):
    # x: (S, D) f32; g, b: (1, D).  torch.Tensor.std is unbiased (D-1).
    d = x.shape[-1]
    mean = jnp.mean(x, axis=-1, keepdims=True)
    diff = x - mean
    var = jnp.sum(diff * diff, axis=-1, keepdims=True) * (1.0 / (d - 1))
    inv = 1.0 / (jnp.sqrt(var) + EPS)          # narrow (S,1) column reciprocal
    return g * (diff * inv) + b


def _mha(q_in, kv_in, mask_zero, wqkv_ref, bqkv_ref, wo_ref, bo_ref, h,
         same_qkv, head_buf):
    """Multi-head attention + output projection.  Returns (Sq, D) f32.

    q_in: (Sq, D) f32; kv_in: (Sk, D) f32; mask_zero: bool (Sq|1, Sk)
    wqkv_ref: (D, 3D) pre-transposed [Wq^T | Wk^T | Wv^T]; bqkv_ref: (1, 3D)
    wo_ref: (D, D) pre-transposed; bo_ref: (1, D)
    head_buf: (Sq, D) f32 VMEM scratch collecting per-head outputs.
    """
    D = wo_ref.shape[0]
    d_k = D // h
    scale = 1.0 / math.sqrt(d_k)
    cdt = wqkv_ref.dtype                       # matmul operand dtype (f32/bf16)

    if same_qkv:
        qkv = jnp.dot(q_in.astype(cdt), wqkv_ref[...],
                      preferred_element_type=jnp.float32) + bqkv_ref[...]
        q = qkv[:, :D]
        k = qkv[:, D:2 * D]
        v = qkv[:, 2 * D:]
    else:
        q = jnp.dot(q_in.astype(cdt), wqkv_ref[:, :D],
                    preferred_element_type=jnp.float32) + bqkv_ref[:, :D]
        kv = jnp.dot(kv_in.astype(cdt), wqkv_ref[:, D:],
                     preferred_element_type=jnp.float32) + bqkv_ref[:, D:]
        k = kv[:, :D]
        v = kv[:, D:]

    for hi in range(h):
        lo = hi * d_k
        q_h = q[:, lo:lo + d_k]
        k_h = k[:, lo:lo + d_k]
        v_h = v[:, lo:lo + d_k]
        # (Sq, d_k) x (Sk, d_k) contracted on last dims -> (Sq, Sk); no .T
        s = jax.lax.dot_general(q_h.astype(cdt), k_h.astype(cdt),
                                (((1,), (1,)), ((), ())),
                                preferred_element_type=jnp.float32) * scale
        s = jnp.where(mask_zero, -1e9, s)      # compare hoisted; select only
        s = s - jnp.max(s, axis=-1, keepdims=True)
        p = jnp.exp(s)
        p = p * (1.0 / jnp.sum(p, axis=-1, keepdims=True))   # exact, narrow col
        head_buf[:, lo:lo + d_k] = jnp.dot(p.astype(cdt), v_h.astype(cdt),
                                           preferred_element_type=jnp.float32)

    # Single consolidated output projection, contraction K = D (fills the MXU).
    return jnp.dot(head_buf[...].astype(cdt), wo_ref[...],
                   preferred_element_type=jnp.float32) + bo_ref[...]


# ------------------------------ Fused kernel -------------------------------- #

def _decoder_kernel(h,
                    x_ref, mem_ref, tmask_ref, smask_ref,
                    ln0g, ln0b, sa_wqkv, sa_bqkv, sa_wo, sa_bo,
                    ln1g, ln1b, ca_wqkv, ca_bqkv, ca_wo, ca_bo,
                    ln2g, ln2b, w1, b1, w2, b2,
                    fng, fnb,
                    o_ref,
                    x_state, head_buf):
    layer = pl.program_id(1)
    n_layers = pl.num_programs(1)

    # Load x into the VMEM carry buffer once per batch element.
    @pl.when(layer == 0)
    def _():
        x_state[...] = x_ref[...].astype(jnp.float32)

    x = x_state[...]
    tmask_zero = tmask_ref[...] == 0.0         # (Sq|1, Sq)  hoisted compare
    smask_zero = smask_ref[...] == 0.0         # (Sq|1, Sk)

    # --- 1) self-attention sublayer: x = x + MHA(LN(x), LN(x), LN(x)) ---
    nx = _ln_f32(x, ln0g[...], ln0b[...])      # LN once, reused for Q, K and V
    x = x + _mha(nx, nx, tmask_zero, sa_wqkv, sa_bqkv, sa_wo, sa_bo, h,
                 True, head_buf)

    # --- 2) source-attention sublayer: x = x + MHA(LN(x), memory, memory) ---
    nx = _ln_f32(x, ln1g[...], ln1b[...])
    mem = mem_ref[...].astype(jnp.float32)
    x = x + _mha(nx, mem, smask_zero, ca_wqkv, ca_bqkv, ca_wo, ca_bo, h,
                 False, head_buf)

    # --- 3) feed-forward sublayer: x = x + W2 relu(W1 LN(x) + b1) + b2 ---
    nx = _ln_f32(x, ln2g[...], ln2b[...])
    cdt = w1.dtype
    hdn = jnp.dot(nx.astype(cdt), w1[...],
                  preferred_element_type=jnp.float32) + b1[...]
    hdn = jnp.maximum(hdn, 0.0)                # d_ff intermediate never hits HBM
    x = x + jnp.dot(hdn.astype(cdt), w2[...],
                    preferred_element_type=jnp.float32) + b2[...]

    x_state[...] = x                           # carry to next layer (VMEM only)

    # Final LayerNorm + single HBM writeback after the last layer.
    @pl.when(layer == n_layers - 1)
    def _():
        o_ref[...] = _ln_f32(x, fng[...], fnb[...]).astype(o_ref.dtype)


# ------------------------------ Kernel wrapper ------------------------------- #

_LAYER_KEYS = ("ln0_g", "ln0_b", "sa_wqkv", "sa_bqkv", "sa_wo", "sa_bo",
               "ln1_g", "ln1_b", "ca_wqkv", "ca_bqkv", "ca_wo", "ca_bo",
               "ln2_g", "ln2_b", "w1", "b1", "w2", "b2")
_MATMUL_KEYS = frozenset({"sa_wqkv", "sa_wo", "ca_wqkv", "ca_wo", "w1", "w2"})


def _prep_mask(mask):
    # (Bm, 1, Sq|1, Sk) -> (Bm, Sq|1, Sk) f32, no broadcast over heads or batch.
    m = jnp.asarray(mask)
    return m.reshape(m.shape[0], m.shape[-2], m.shape[-1]).astype(jnp.float32)


def decoder_forward(params, x, memory, src_mask, tgt_mask, h,
                    matmul_dtype=jnp.float32):
    """Whole decoder in one pallas_call; grid = (batch, layer)."""
    B, Sq, D = x.shape
    Sk = memory.shape[1]
    L = params["layers"]
    n_layers = L["sa_wqkv"].shape[0]

    tm = _prep_mask(tgt_mask)
    sm = _prep_mask(src_mask)

    def mask_spec(m):
        if m.shape[0] == 1:                    # batch-invariant: VMEM-resident
            return pl.BlockSpec((None,) + m.shape[1:], lambda b, l: (0, 0, 0))
        return pl.BlockSpec((None,) + m.shape[1:], lambda b, l: (b, 0, 0))

    def layer_spec(k):                         # stream one layer per grid step
        return pl.BlockSpec((None,) + L[k].shape[1:], lambda b, l: (l, 0, 0))

    def layer_arg(k):                          # only matmul operands recast
        a = L[k]
        return a.astype(matmul_dtype) if k in _MATMUL_KEYS else a

    in_specs = ([pl.BlockSpec((None, Sq, D), lambda b, l: (b, 0, 0)),   # x
                 pl.BlockSpec((None, Sk, D), lambda b, l: (b, 0, 0)),   # memory
                 mask_spec(tm), mask_spec(sm)]
                + [layer_spec(k) for k in _LAYER_KEYS]
                + [pl.BlockSpec((1, D), lambda b, l: (0, 0)),           # final g
                   pl.BlockSpec((1, D), lambda b, l: (0, 0))])          # final b

    args = ([x, memory, tm, sm]
            + [layer_arg(k) for k in _LAYER_KEYS]
            + [params["norm_g"], params["norm_b"]])

    return pl.pallas_call(
        functools.partial(_decoder_kernel, h),
        out_shape=jax.ShapeDtypeStruct((B, Sq, D), x.dtype),
        grid=(B, n_layers),
        in_specs=in_specs,
        out_specs=pl.BlockSpec((None, Sq, D), lambda b, l: (b, 0, 0)),
        scratch_shapes=[pltpu.VMEM((Sq, D), jnp.float32),   # x carried across layers
                        pltpu.VMEM((Sq, D), jnp.float32)],  # per-head output gather
        compiler_params=pltpu.CompilerParams(
            dimension_semantics=("parallel", "arbitrary")),
    )(*args)


# --------------------------- Parameter creation ------------------------------ #

def init_params(key, d_model, d_ff, h, n_layers):
    """Init in PyTorch nn.Linear layout, then pre-fuse/pre-transpose once
    (host side) and stack along a leading layer axis so the kernel can stream
    one layer's weights per grid step."""

    def lin(k, fan_out, fan_in, scale=0.02):
        w = scale * jax.random.normal(k, (fan_out, fan_in), jnp.float32)
        b = jnp.zeros((fan_out,), jnp.float32)
        return w, b

    keys = jax.random.split(key, 10)

    def mha_params(ks):
        (wq, bq), (wk, bk), (wv, bv), (wo, bo) = [
            lin(k, d_model, d_model) for k in ks
        ]
        wqkv_t = jnp.concatenate([wq, wk, wv], axis=0).T        # (D, 3D), in->out
        bqkv = jnp.concatenate([bq, bk, bv]).reshape(1, 3 * d_model)
        return wqkv_t, bqkv, wo.T, bo.reshape(1, d_model)

    sa_wqkv, sa_bqkv, sa_wo, sa_bo = mha_params(keys[0:4])
    ca_wqkv, ca_bqkv, ca_wo, ca_bo = mha_params(keys[4:8])
    w1, b1 = lin(keys[8], d_ff, d_model)
    w2, b2 = lin(keys[9], d_model, d_ff)

    ones = jnp.ones((1, d_model), jnp.float32)
    zeros = jnp.zeros((1, d_model), jnp.float32)

    one_layer = dict(
        ln0_g=ones, ln0_b=zeros,
        sa_wqkv=sa_wqkv, sa_bqkv=sa_bqkv, sa_wo=sa_wo, sa_bo=sa_bo,
        ln1_g=ones, ln1_b=zeros,
        ca_wqkv=ca_wqkv, ca_bqkv=ca_bqkv, ca_wo=ca_wo, ca_bo=ca_bo,
        ln2_g=ones, ln2_b=zeros,
        w1=w1.T, b1=b1.reshape(1, d_ff),
        w2=w2.T, b2=b2.reshape(1, d_model),
    )
    # clones() deep-copies an initialized layer -> identical params per layer.
    layers = jax.tree_util.tree_map(lambda a: jnp.stack([a] * n_layers),
                                    one_layer)
    return dict(layers=layers,
                norm_g=jnp.ones((1, d_model), jnp.float32),
                norm_b=jnp.zeros((1, d_model), jnp.float32))


# ------------------------- Pure-JAX reference (check) ------------------------ #

def _ref_decoder(params, x, memory, src_mask, tgt_mask, h):
    L = params["layers"]
    n_layers = L["sa_wqkv"].shape[0]
    tm = _prep_mask(tgt_mask)
    sm = _prep_mask(src_mask)

    def ln(x, g, b):
        mean = jnp.mean(x, axis=-1, keepdims=True)
        var = jnp.sum((x - mean) ** 2, axis=-1, keepdims=True) / (x.shape[-1] - 1)
        return g * (x - mean) / (jnp.sqrt(var) + EPS) + b

    def mha(q_in, kv_in, mask, wqkv, bqkv, wo, bo):
        B, Sq, D = q_in.shape
        Sk = kv_in.shape[1]
        d_k = D // h
        q = q_in @ wqkv[:, :D] + bqkv[:, :D]
        k = kv_in @ wqkv[:, D:2 * D] + bqkv[:, D:2 * D]
        v = kv_in @ wqkv[:, 2 * D:] + bqkv[:, 2 * D:]
        q = q.reshape(B, Sq, h, d_k).transpose(0, 2, 1, 3)
        k = k.reshape(B, Sk, h, d_k).transpose(0, 2, 1, 3)
        v = v.reshape(B, Sk, h, d_k).transpose(0, 2, 1, 3)
        s = jnp.einsum("bhqd,bhkd->bhqk", q, k) / math.sqrt(d_k)
        s = jnp.where(mask[:, None, :, :] == 0.0, -1e9, s)
        p = jax.nn.softmax(s, axis=-1)
        o = jnp.einsum("bhqk,bhkd->bhqd", p, v)
        o = o.transpose(0, 2, 1, 3).reshape(B, Sq, D)
        return o @ wo + bo

    for i in range(n_layers):
        nx = ln(x, L["ln0_g"][i], L["ln0_b"][i])
        x = x + mha(nx, nx, tm, L["sa_wqkv"][i], L["sa_bqkv"][i],
                    L["sa_wo"][i], L["sa_bo"][i])
        nx = ln(x, L["ln1_g"][i], L["ln1_b"][i])
        x = x + mha(nx, memory, sm, L["ca_wqkv"][i], L["ca_bqkv"][i],
                    L["ca_wo"][i], L["ca_bo"][i])
        nx = ln(x, L["ln2_g"][i], L["ln2_b"][i])
        hdn = jnp.maximum(nx @ L["w1"][i] + L["b1"][i], 0.0)
        x = x + hdn @ L["w2"][i] + L["b2"][i]
    return ln(x, params["norm_g"], params["norm_b"])


# ----------------------------------- Main ------------------------------------ #

if __name__ == "__main__":
    B, S_tgt, S_src = 2, 8, 16
    d_model, d_ff, h, n_layers = 32, 64, 4, 2

    root = jax.random.PRNGKey(0)
    k_p, k_x, k_m = jax.random.split(root, 3)

    params = init_params(k_p, d_model, d_ff, h, n_layers)
    x = jax.random.normal(k_x, (B, S_tgt, d_model), jnp.float32)
    memory = jax.random.normal(k_m, (B, S_src, d_model), jnp.float32)

    # tgt_mask: causal, batch-invariant (1, 1, S_tgt, S_tgt) -> stays VMEM-resident.
    # src_mask: per-batch all-ones (B, 1, 1, S_src) -> exercises per-batch path.
    tgt_mask = jnp.tril(jnp.ones((S_tgt, S_tgt), jnp.float32))[None, None]
    src_mask = jnp.ones((B, 1, 1, S_src), jnp.float32)

    fwd = jax.jit(functools.partial(decoder_forward, h=h))
    out = jax.block_until_ready(fwd(params, x, memory, src_mask, tgt_mask))

    assert out.shape == (B, S_tgt, d_model)
    assert bool(jnp.all(jnp.isfinite(out)))

    # Smoke-check against a pure-JAX reference (generous tolerance: MXU vs XLA
    # f32 matmul paths may differ slightly).
    ref = _ref_decoder(params, x, memory, src_mask, tgt_mask, h)
    assert bool(jnp.allclose(out, ref, atol=5e-2, rtol=5e-2)), float(
        jnp.max(jnp.abs(out - ref)))

    print("KERNEL_OK")
</pallas_src>

<mosaic_0001>
module attributes {stable_mosaic.version = 11 : i64} {
  func.func @_decoder_kernel(%arg0: i32, %arg1: i32, %arg2: memref<1x8x32xf32, #tpu.memory_space<vmem>>, %arg3: memref<1x16x32xf32, #tpu.memory_space<vmem>>, %arg4: memref<1x8x8xf32, #tpu.memory_space<vmem>>, %arg5: memref<1x1x16xf32, #tpu.memory_space<vmem>>, %arg6: memref<1x1x32xf32, #tpu.memory_space<vmem>>, %arg7: memref<1x1x32xf32, #tpu.memory_space<vmem>>, %arg8: memref<1x32x96xf32, #tpu.memory_space<vmem>>, %arg9: memref<1x1x96xf32, #tpu.memory_space<vmem>>, %arg10: memref<1x32x32xf32, #tpu.memory_space<vmem>>, %arg11: memref<1x1x32xf32, #tpu.memory_space<vmem>>, %arg12: memref<1x1x32xf32, #tpu.memory_space<vmem>>, %arg13: memref<1x1x32xf32, #tpu.memory_space<vmem>>, %arg14: memref<1x32x96xf32, #tpu.memory_space<vmem>>, %arg15: memref<1x1x96xf32, #tpu.memory_space<vmem>>, %arg16: memref<1x32x32xf32, #tpu.memory_space<vmem>>, %arg17: memref<1x1x32xf32, #tpu.memory_space<vmem>>, %arg18: memref<1x1x32xf32, #tpu.memory_space<vmem>>, %arg19: memref<1x1x32xf32, #tpu.memory_space<vmem>>, %arg20: memref<1x32x64xf32, #tpu.memory_space<vmem>>, %arg21: memref<1x1x64xf32, #tpu.memory_space<vmem>>, %arg22: memref<1x64x32xf32, #tpu.memory_space<vmem>>, %arg23: memref<1x1x32xf32, #tpu.memory_space<vmem>>, %arg24: memref<1x32xf32, #tpu.memory_space<vmem>>, %arg25: memref<1x32xf32, #tpu.memory_space<vmem>>, %arg26: memref<1x8x32xf32, #tpu.memory_space<vmem>>, %arg27: memref<8x32xf32, #tpu.memory_space<vmem>>, %arg28: memref<8x32xf32, #tpu.memory_space<vmem>>) attributes {dimension_semantics = [#tpu.dimension_semantics<parallel>, #tpu.dimension_semantics<arbitrary>], iteration_bounds = array<i64: 2, 2>, scalar_prefetch = 0 : i64, scratch_operands = 2 : i64, tpu.core_type = #tpu.core_type<tc>, window_params = [{transform_indices = @transform_0, window_bounds = array<i64: 1, 8, 32>}, {transform_indices = @transform_1, window_bounds = array<i64: 1, 16, 32>}, {pipeline_mode = #tpu.pipeline_mode<synchronous>, transform_indices = @transform_2, window_bounds = array<i64: 1, 8, 8>}, {transform_indices = @transform_3, window_bounds = array<i64: 1, 1, 16>}, {transform_indices = @transform_4, window_bounds = array<i64: 1, 1, 32>}, {transform_indices = @transform_5, window_bounds = array<i64: 1, 1, 32>}, {transform_indices = @transform_6, window_bounds = array<i64: 1, 32, 96>}, {transform_indices = @transform_7, window_bounds = array<i64: 1, 1, 96>}, {transform_indices = @transform_8, window_bounds = array<i64: 1, 32, 32>}, {transform_indices = @transform_9, window_bounds = array<i64: 1, 1, 32>}, {transform_indices = @transform_10, window_bounds = array<i64: 1, 1, 32>}, {transform_indices = @transform_11, window_bounds = array<i64: 1, 1, 32>}, {transform_indices = @transform_12, window_bounds = array<i64: 1, 32, 96>}, {transform_indices = @transform_13, window_bounds = array<i64: 1, 1, 96>}, {transform_indices = @transform_14, window_bounds = array<i64: 1, 32, 32>}, {transform_indices = @transform_15, window_bounds = array<i64: 1, 1, 32>}, {transform_indices = @transform_16, window_bounds = array<i64: 1, 1, 32>}, {transform_indices = @transform_17, window_bounds = array<i64: 1, 1, 32>}, {transform_indices = @transform_18, window_bounds = array<i64: 1, 32, 64>}, {transform_indices = @transform_19, window_bounds = array<i64: 1, 1, 64>}, {transform_indices = @transform_20, window_bounds = array<i64: 1, 64, 32>}, {transform_indices = @transform_21, window_bounds = array<i64: 1, 1, 32>}, {pipeline_mode = #tpu.pipeline_mode<synchronous>, transform_indices = @transform_22, window_bounds = array<i64: 1, 32>}, {pipeline_mode = #tpu.pipeline_mode<synchronous>, transform_indices = @transform_23, window_bounds = array<i64: 1, 32>}, {transform_indices = @transform_24, window_bounds = array<i64: 1, 8, 32>}]} {
    %c0_i32 = arith.constant 0 : i32
    %0 = arith.cmpi eq, %arg1, %c0_i32 : i32
    %1 = arith.extui %0 : i1 to i32
    %c0_i32_0 = arith.constant 0 : i32
    %2 = arith.cmpi ne, %1, %c0_i32_0 : i32
    scf.if %2 {
      %c0_173 = arith.constant 0 : index
      %c0_174 = arith.constant 0 : index
      %c0_175 = arith.constant 0 : index
      %333 = vector.load %arg2[%c0_173, %c0_174, %c0_175] : memref<1x8x32xf32, #tpu.memory_space<vmem>>, vector<1x8x32xf32>
      %334 = vector.shape_cast %333 : vector<1x8x32xf32> to vector<8x32xf32>
      %c0_176 = arith.constant 0 : index
      %c0_177 = arith.constant 0 : index
      %335 = vector.load %arg27[%c0_176, %c0_177] : memref<8x32xf32, #tpu.memory_space<vmem>>, vector<8x32xf32>
      tpu.vector_store %arg27[%c0_176, %c0_177], %334 {strides = array<i32>} : memref<8x32xf32, #tpu.memory_space<vmem>>, vector<8x32xf32>,
    } else {
    }
    %c0 = arith.constant 0 : index
    %c0_1 = arith.constant 0 : index
    %3 = vector.load %arg27[%c0, %c0_1] : memref<8x32xf32, #tpu.memory_space<vmem>>, vector<8x32xf32>
    %c0_2 = arith.constant 0 : index
    %c0_3 = arith.constant 0 : index
    %c0_4 = arith.constant 0 : index
    %4 = vector.load %arg4[%c0_2, %c0_3, %c0_4] : memref<1x8x8xf32, #tpu.memory_space<vmem>>, vector<1x8x8xf32>
    %5 = vector.shape_cast %4 : vector<1x8x8xf32> to vector<8x8xf32>
    %cst = arith.constant 0.000000e+00 : f32
    %6 = vector.broadcast %cst : f32 to vector<8x8xf32>
    %7 = arith.cmpf oeq, %5, %6 : vector<8x8xf32>
    %c0_5 = arith.constant 0 : index
    %c0_6 = arith.constant 0 : index
    %c0_7 = arith.constant 0 : index
    %8 = vector.load %arg5[%c0_5, %c0_6, %c0_7] : memref<1x1x16xf32, #tpu.memory_space<vmem>>, vector<1x1x16xf32>
    %9 = vector.shape_cast %8 : vector<1x1x16xf32> to vector<1x16xf32>
    %cst_8 = arith.constant 0.000000e+00 : f32
    %10 = vector.broadcast %cst_8 : f32 to vector<1x16xf32>
    %11 = arith.cmpf oeq, %9, %10 : vector<1x16xf32>
    %c0_9 = arith.constant 0 : index
    %c0_10 = arith.constant 0 : index
    %c0_11 = arith.constant 0 : index
    %12 = vector.load %arg6[%c0_9, %c0_10, %c0_11] : memref<1x1x32xf32, #tpu.memory_space<vmem>>, vector<1x1x32xf32>
    %13 = vector.shape_cast %12 : vector<1x1x32xf32> to vector<1x32xf32>
    %c0_12 = arith.constant 0 : index
    %c0_13 = arith.constant 0 : index
    %c0_14 = arith.constant 0 : index
    %14 = vector.load %arg7[%c0_12, %c0_13, %c0_14] : memref<1x1x32xf32, #tpu.memory_space<vmem>>, vector<1x1x32xf32>
    %15 = vector.shape_cast %14 : vector<1x1x32xf32> to vector<1x32xf32>
    %cst_15 = arith.constant dense<0.000000e+00> : vector<8xf32>
    %16 = vector.multi_reduction <add>, %3, %cst_15 [1] : vector<8x32xf32> to vector<8xf32>
    %17 = vector.shape_cast %16 : vector<8xf32> to vector<8x1xf32>
    %cst_16 = arith.constant 3.200000e+01 : f32
    %18 = vector.broadcast %cst_16 : f32 to vector<8x1xf32>
    %19 = arith.divf %17, %18 : vector<8x1xf32>
    %20 = vector.broadcast %19 : vector<8x1xf32> to vector<8x32xf32>
    %21 = arith.subf %3, %20 : vector<8x32xf32>
    %22 = arith.mulf %21, %21 : vector<8x32xf32>
    %cst_17 = arith.constant dense<0.000000e+00> : vector<8xf32>
    %23 = vector.multi_reduction <add>, %22, %cst_17 [1] : vector<8x32xf32> to vector<8xf32>
    %24 = vector.shape_cast %23 : vector<8xf32> to vector<8x1xf32>
    %cst_18 = arith.constant 0.0322580636 : f32
    %25 = vector.broadcast %cst_18 : f32 to vector<8x1xf32>
    %26 = arith.mulf %24, %25 : vector<8x1xf32>
    %27 = math.sqrt %26 : vector<8x1xf32>
    %cst_19 = arith.constant 9.99999997E-7 : f32
    %28 = vector.broadcast %cst_19 : f32 to vector<8x1xf32>
    %29 = arith.addf %27, %28 : vector<8x1xf32>
    %cst_20 = arith.constant 1.000000e+00 : f32
    %30 = vector.broadcast %cst_20 : f32 to vector<8x1xf32>
    %31 = arith.divf %30, %29 : vector<8x1xf32>
    %32 = vector.broadcast %31 : vector<8x1xf32> to vector<8x32xf32>
    %33 = arith.mulf %21, %32 : vector<8x32xf32>
    %34 = vector.broadcast %13 : vector<1x32xf32> to vector<8x32xf32>
    %35 = arith.mulf %34, %33 : vector<8x32xf32>
    %36 = vector.broadcast %15 : vector<1x32xf32> to vector<8x32xf32>
    %37 = arith.addf %35, %36 : vector<8x32xf32>
    %c0_21 = arith.constant 0 : index
    %c0_22 = arith.constant 0 : index
    %c0_23 = arith.constant 0 : index
    %38 = vector.load %arg8[%c0_21, %c0_22, %c0_23] : memref<1x32x96xf32, #tpu.memory_space<vmem>>, vector<1x32x96xf32>
    %39 = vector.shape_cast %38 : vector<1x32x96xf32> to vector<32x96xf32>
    %cst_24 = arith.constant dense<0.000000e+00> : vector<8x96xf32>
    %40 = tpu.matmul %37, %39, %cst_24 {dimension_numbers = #tpu.dot_dimension_numbers<[1], [0], [0], [1], [0, 0, 1, 1], [], []>} : vector<8x32xf32>, vector<32x96xf32>, vector<8x96xf32> -> vector<8x96xf32>
    %c0_25 = arith.constant 0 : index
    %c0_26 = arith.constant 0 : index
    %c0_27 = arith.constant 0 : index
    %41 = vector.load %arg9[%c0_25, %c0_26, %c0_27] : memref<1x1x96xf32, #tpu.memory_space<vmem>>, vector<1x1x96xf32>
    %42 = vector.shape_cast %41 : vector<1x1x96xf32> to vector<1x96xf32>
    %43 = vector.broadcast %42 : vector<1x96xf32> to vector<8x96xf32>
    %44 = arith.addf %40, %43 : vector<8x96xf32>
    %45 = vector.extract_strided_slice %44 {offsets = [0, 0], sizes = [8, 32], strides = [1, 1]} : vector<8x96xf32> to vector<8x32xf32>
    %46 = vector.extract_strided_slice %44 {offsets = [0, 32], sizes = [8, 32], strides = [1, 1]} : vector<8x96xf32> to vector<8x32xf32>
    %47 = vector.extract_strided_slice %44 {offsets = [0, 64], sizes = [8, 32], strides = [1, 1]} : vector<8x96xf32> to vector<8x32xf32>
    %48 = vector.extract_strided_slice %45 {offsets = [0, 0], sizes = [8, 8], strides = [1, 1]} : vector<8x32xf32> to vector<8x8xf32>
    %49 = vector.extract_strided_slice %46 {offsets = [0, 0], sizes = [8, 8], strides = [1, 1]} : vector<8x32xf32> to vector<8x8xf32>
    %50 = vector.extract_strided_slice %47 {offsets = [0, 0], sizes = [8, 8], strides = [1, 1]} : vector<8x32xf32> to vector<8x8xf32>
    %cst_28 = arith.constant dense<0.000000e+00> : vector<8x8xf32>
    %51 = tpu.matmul %48, %49, %cst_28 {dimension_numbers = #tpu.dot_dimension_numbers<[1], [1], [0], [0], [0, 0, 1, 0], [], []>} : vector<8x8xf32>, vector<8x8xf32>, vector<8x8xf32> -> vector<8x8xf32>
    %cst_29 = arith.constant 0.353553385 : f32
    %52 = vector.broadcast %cst_29 : f32 to vector<8x8xf32>
    %53 = arith.mulf %51, %52 : vector<8x8xf32>
    %cst_30 = arith.constant -1.000000e+09 : f32
    %54 = vector.broadcast %cst_30 : f32 to vector<8x8xf32>
    %55 = arith.select %7, %54, %53 : vector<8x8xi1>, vector<8x8xf32>
    %cst_31 = arith.constant dense<0xFF800000> : vector<8xf32>
    %56 = vector.multi_reduction <maximumf>, %55, %cst_31 [1] : vector<8x8xf32> to vector<8xf32>
    %57 = vector.shape_cast %56 : vector<8xf32> to vector<8x1xf32>
    %58 = vector.broadcast %57 : vector<8x1xf32> to vector<8x8xf32>
    %59 = arith.subf %55, %58 : vector<8x8xf32>
    %60 = math.exp %59 : vector<8x8xf32>
    %cst_32 = arith.constant dense<0.000000e+00> : vector<8xf32>
    %61 = vector.multi_reduction <add>, %60, %cst_32 [1] : vector<8x8xf32> to vector<8xf32>
    %62 = vector.shape_cast %61 : vector<8xf32> to vector<8x1xf32>
    %cst_33 = arith.constant 1.000000e+00 : f32
    %63 = vector.broadcast %cst_33 : f32 to vector<8x1xf32>
    %64 = arith.divf %63, %62 : vector<8x1xf32>
    %65 = vector.broadcast %64 : vector<8x1xf32> to vector<8x8xf32>
    %66 = arith.mulf %60, %65 : vector<8x8xf32>
    %cst_34 = arith.constant dense<0.000000e+00> : vector<8x8xf32>
    %67 = tpu.matmul %66, %50, %cst_34 {dimension_numbers = #tpu.dot_dimension_numbers<[1], [0], [0], [1], [0, 0, 1, 1], [], []>} : vector<8x8xf32>, vector<8x8xf32>, vector<8x8xf32> -> vector<8x8xf32>
    %c0_35 = arith.constant 0 : index
    %c0_36 = arith.constant 0 : index
    %68 = vector.load %arg28[%c0_35, %c0_36] : memref<8x32xf32, #tpu.memory_space<vmem>>, vector<8x8xf32>
    tpu.vector_store %arg28[%c0_35, %c0_36], %67 {strides = array<i32>} : memref<8x32xf32, #tpu.memory_space<vmem>>, vector<8x8xf32>,
    %69 = vector.extract_strided_slice %45 {offsets = [0, 8], sizes = [8, 8], strides = [1, 1]} : vector<8x32xf32> to vector<8x8xf32>
    %70 = vector.extract_strided_slice %46 {offsets = [0, 8], sizes = [8, 8], strides = [1, 1]} : vector<8x32xf32> to vector<8x8xf32>
    %71 = vector.extract_strided_slice %47 {offsets = [0, 8], sizes = [8, 8], strides = [1, 1]} : vector<8x32xf32> to vector<8x8xf32>
    %cst_37 = arith.constant dense<0.000000e+00> : vector<8x8xf32>
    %72 = tpu.matmul %69, %70, %cst_37 {dimension_numbers = #tpu.dot_dimension_numbers<[1], [1], [0], [0], [0, 0, 1, 0], [], []>} : vector<8x8xf32>, vector<8x8xf32>, vector<8x8xf32> -> vector<8x8xf32>
    %cst_38 = arith.constant 0.353553385 : f32
    %73 = vector.broadcast %cst_38 : f32 to vector<8x8xf32>
    %74 = arith.mulf %72, %73 : vector<8x8xf32>
    %cst_39 = arith.constant -1.000000e+09 : f32
    %75 = vector.broadcast %cst_39 : f32 to vector<8x8xf32>
    %76 = arith.select %7, %75, %74 : vector<8x8xi1>, vector<8x8xf32>
    %cst_40 = arith.constant dense<0xFF800000> : vector<8xf32>
    %77 = vector.multi_reduction <maximumf>, %76, %cst_40 [1] : vector<8x8xf32> to vector<8xf32>
    %78 = vector.shape_cast %77 : vector<8xf32> to vector<8x1xf32>
    %79 = vector.broadcast %78 : vector<8x1xf32> to vector<8x8xf32>
    %80 = arith.subf %76, %79 : vector<8x8xf32>
    %81 = math.exp %80 : vector<8x8xf32>
    %cst_41 = arith.constant dense<0.000000e+00> : vector<8xf32>
    %82 = vector.multi_reduction <add>, %81, %cst_41 [1] : vector<8x8xf32> to vector<8xf32>
    %83 = vector.shape_cast %82 : vector<8xf32> to vector<8x1xf32>
    %cst_42 = arith.constant 1.000000e+00 : f32
    %84 = vector.broadcast %cst_42 : f32 to vector<8x1xf32>
    %85 = arith.divf %84, %83 : vector<8x1xf32>
    %86 = vector.broadcast %85 : vector<8x1xf32> to vector<8x8xf32>
    %87 = arith.mulf %81, %86 : vector<8x8xf32>
    %cst_43 = arith.constant dense<0.000000e+00> : vector<8x8xf32>
    %88 = tpu.matmul %87, %71, %cst_43 {dimension_numbers = #tpu.dot_dimension_numbers<[1], [0], [0], [1], [0, 0, 1, 1], [], []>} : vector<8x8xf32>, vector<8x8xf32>, vector<8x8xf32> -> vector<8x8xf32>
    %c0_44 = arith.constant 0 : index
    %c8 = arith.constant 8 : index
    %89 = vector.load %arg28[%c0_44, %c8] : memref<8x32xf32, #tpu.memory_space<vmem>>, vector<8x8xf32>
    tpu.vector_store %arg28[%c0_44, %c8], %88 {strides = array<i32>} : memref<8x32xf32, #tpu.memory_space<vmem>>, vector<8x8xf32>,
    %90 = vector.extract_strided_slice %45 {offsets = [0, 16], sizes = [8, 8], strides = [1, 1]} : vector<8x32xf32> to vector<8x8xf32>
    %91 = vector.extract_strided_slice %46 {offsets = [0, 16], sizes = [8, 8], strides = [1, 1]} : vector<8x32xf32> to vector<8x8xf32>
    %92 = vector.extract_strided_slice %47 {offsets = [0, 16], sizes = [8, 8], strides = [1, 1]} : vector<8x32xf32> to vector<8x8xf32>
    %cst_45 = arith.constant dense<0.000000e+00> : vector<8x8xf32>
    %93 = tpu.matmul %90, %91, %cst_45 {dimension_numbers = #tpu.dot_dimension_numbers<[1], [1], [0], [0], [0, 0, 1, 0], [], []>} : vector<8x8xf32>, vector<8x8xf32>, vector<8x8xf32> -> vector<8x8xf32>
    %cst_46 = arith.constant 0.353553385 : f32
    %94 = vector.broadcast %cst_46 : f32 to vector<8x8xf32>
    %95 = arith.mulf %93, %94 : vector<8x8xf32>
    %cst_47 = arith.constant -1.000000e+09 : f32
    %96 = vector.broadcast %cst_47 : f32 to vector<8x8xf32>
    %97 = arith.select %7, %96, %95 : vector<8x8xi1>, vector<8x8xf32>
    %cst_48 = arith.constant dense<0xFF800000> : vector<8xf32>
    %98 = vector.multi_reduction <maximumf>, %97, %cst_48 [1] : vector<8x8xf32> to vector<8xf32>
    %99 = vector.shape_cast %98 : vector<8xf32> to vector<8x1xf32>
    %100 = vector.broadcast %99 : vector<8x1xf32> to vector<8x8xf32>
    %101 = arith.subf %97, %100 : vector<8x8xf32>
    %102 = math.exp %101 : vector<8x8xf32>
    %cst_49 = arith.constant dense<0.000000e+00> : vector<8xf32>
    %103 = vector.multi_reduction <add>, %102, %cst_49 [1] : vector<8x8xf32> to vector<8xf32>
    %104 = vector.shape_cast %103 : vector<8xf32> to vector<8x1xf32>
    %cst_50 = arith.constant 1.000000e+00 : f32
    %105 = vector.broadcast %cst_50 : f32 to vector<8x1xf32>
    %106 = arith.divf %105, %104 : vector<8x1xf32>
    %107 = vector.broadcast %106 : vector<8x1xf32> to vector<8x8xf32>
    %108 = arith.mulf %102, %107 : vector<8x8xf32>
    %cst_51 = arith.constant dense<0.000000e+00> : vector<8x8xf32>
    %109 = tpu.matmul %108, %92, %cst_51 {dimension_numbers = #tpu.dot_dimension_numbers<[1], [0], [0], [1], [0, 0, 1, 1], [], []>} : vector<8x8xf32>, vector<8x8xf32>, vector<8x8xf32> -> vector<8x8xf32>
    %c0_52 = arith.constant 0 : index
    %c16 = arith.constant 16 : index
    %110 = vector.load %arg28[%c0_52, %c16] : memref<8x32xf32, #tpu.memory_space<vmem>>, vector<8x8xf32>
    tpu.vector_store %arg28[%c0_52, %c16], %109 {strides = array<i32>} : memref<8x32xf32, #tpu.memory_space<vmem>>, vector<8x8xf32>,
    %111 = vector.extract_strided_slice %45 {offsets = [0, 24], sizes = [8, 8], strides = [1, 1]} : vector<8x32xf32> to vector<8x8xf32>
    %112 = vector.extract_strided_slice %46 {offsets = [0, 24], sizes = [8, 8], strides = [1, 1]} : vector<8x32xf32> to vector<8x8xf32>
    %113 = vector.extract_strided_slice %47 {offsets = [0, 24], sizes = [8, 8], strides = [1, 1]} : vector<8x32xf32> to vector<8x8xf32>
    %cst_53 = arith.constant dense<0.000000e+00> : vector<8x8xf32>
    %114 = tpu.matmul %111, %112, %cst_53 {dimension_numbers = #tpu.dot_dimension_numbers<[1], [1], [0], [0], [0, 0, 1, 0], [], []>} : vector<8x8xf32>, vector<8x8xf32>, vector<8x8xf32> -> vector<8x8xf32>
    %cst_54 = arith.constant 0.353553385 : f32
    %115 = vector.broadcast %cst_54 : f32 to vector<8x8xf32>
    %116 = arith.mulf %114, %115 : vector<8x8xf32>
    %cst_55 = arith.constant -1.000000e+09 : f32
    %117 = vector.broadcast %cst_55 : f32 to vector<8x8xf32>
    %118 = arith.select %7, %117, %116 : vector<8x8xi1>, vector<8x8xf32>
    %cst_56 = arith.constant dense<0xFF800000> : vector<8xf32>
    %119 = vector.multi_reduction <maximumf>, %118, %cst_56 [1] : vector<8x8xf32> to vector<8xf32>
    %120 = vector.shape_cast %119 : vector<8xf32> to vector<8x1xf32>
    %121 = vector.broadcast %120 : vector<8x1xf32> to vector<8x8xf32>
    %122 = arith.subf %118, %121 : vector<8x8xf32>
    %123 = math.exp %122 : vector<8x8xf32>
    %cst_57 = arith.constant dense<0.000000e+00> : vector<8xf32>
    %124 = vector.multi_reduction <add>, %123, %cst_57 [1] : vector<8x8xf32> to vector<8xf32>
    %125 = vector.shape_cast %124 : vector<8xf32> to vector<8x1xf32>
    %cst_58 = arith.constant 1.000000e+00 : f32
    %126 = vector.broadcast %cst_58 : f32 to vector<8x1xf32>
    %127 = arith.divf %126, %125 : vector<8x1xf32>
    %128 = vector.broadcast %127 : vector<8x1xf32> to vector<8x8xf32>
    %129 = arith.mulf %123, %128 : vector<8x8xf32>
    %cst_59 = arith.constant dense<0.000000e+00> : vector<8x8xf32>
    %130 = tpu.matmul %129, %113, %cst_59 {dimension_numbers = #tpu.dot_dimension_numbers<[1], [0], [0], [1], [0, 0, 1, 1], [], []>} : vector<8x8xf32>, vector<8x8xf32>, vector<8x8xf32> -> vector<8x8xf32>
    %c0_60 = arith.constant 0 : index
    %c24 = arith.constant 24 : index
    %131 = vector.load %arg28[%c0_60, %c24] : memref<8x32xf32, #tpu.memory_space<vmem>>, vector<8x8xf32>
    tpu.vector_store %arg28[%c0_60, %c24], %130 {strides = array<i32>} : memref<8x32xf32, #tpu.memory_space<vmem>>, vector<8x8xf32>,
    %c0_61 = arith.constant 0 : index
    %c0_62 = arith.constant 0 : index
    %132 = vector.load %arg28[%c0_61, %c0_62] : memref<8x32xf32, #tpu.memory_space<vmem>>, vector<8x32xf32>
    %c0_63 = arith.constant 0 : index
    %c0_64 = arith.constant 0 : index
    %c0_65 = arith.constant 0 : index
    %133 = vector.load %arg10[%c0_63, %c0_64, %c0_65] : memref<1x32x32xf32, #tpu.memory_space<vmem>>, vector<1x32x32xf32>
    %134 = vector.shape_cast %133 : vector<1x32x32xf32> to vector<32x32xf32>
    %cst_66 = arith.constant dense<0.000000e+00> : vector<8x32xf32>
    %135 = tpu.matmul %132, %134, %cst_66 {dimension_numbers = #tpu.dot_dimension_numbers<[1], [0], [0], [1], [0, 0, 1, 1], [], []>} : vector<8x32xf32>, vector<32x32xf32>, vector<8x32xf32> -> vector<8x32xf32>
    %c0_67 = arith.constant 0 : index
    %c0_68 = arith.constant 0 : index
    %c0_69 = arith.constant 0 : index
    %136 = vector.load %arg11[%c0_67, %c0_68, %c0_69] : memref<1x1x32xf32, #tpu.memory_space<vmem>>, vector<1x1x32xf32>
    %137 = vector.shape_cast %136 : vector<1x1x32xf32> to vector<1x32xf32>
    %138 = vector.broadcast %137 : vector<1x32xf32> to vector<8x32xf32>
    %139 = arith.addf %135, %138 : vector<8x32xf32>
    %140 = arith.addf %3, %139 : vector<8x32xf32>
    %c0_70 = arith.constant 0 : index
    %c0_71 = arith.constant 0 : index
    %c0_72 = arith.constant 0 : index
    %141 = vector.load %arg12[%c0_70, %c0_71, %c0_72] : memref<1x1x32xf32, #tpu.memory_space<vmem>>, vector<1x1x32xf32>
    %142 = vector.shape_cast %141 : vector<1x1x32xf32> to vector<1x32xf32>
    %c0_73 = arith.constant 0 : index
    %c0_74 = arith.constant 0 : index
    %c0_75 = arith.constant 0 : index
    %143 = vector.load %arg13[%c0_73, %c0_74, %c0_75] : memref<1x1x32xf32, #tpu.memory_space<vmem>>, vector<1x1x32xf32>
    %144 = vector.shape_cast %143 : vector<1x1x32xf32> to vector<1x32xf32>
    %cst_76 = arith.constant dense<0.000000e+00> : vector<8xf32>
    %145 = vector.multi_reduction <add>, %140, %cst_76 [1] : vector<8x32xf32> to vector<8xf32>
    %146 = vector.shape_cast %145 : vector<8xf32> to vector<8x1xf32>
    %cst_77 = arith.constant 3.200000e+01 : f32
    %147 = vector.broadcast %cst_77 : f32 to vector<8x1xf32>
    %148 = arith.divf %146, %147 : vector<8x1xf32>
    %149 = vector.broadcast %148 : vector<8x1xf32> to vector<8x32xf32>
    %150 = arith.subf %140, %149 : vector<8x32xf32>
    %151 = arith.mulf %150, %150 : vector<8x32xf32>
    %cst_78 = arith.constant dense<0.000000e+00> : vector<8xf32>
    %152 = vector.multi_reduction <add>, %151, %cst_78 [1] : vector<8x32xf32> to vector<8xf32>
    %153 = vector.shape_cast %152 : vector<8xf32> to vector<8x1xf32>
    %cst_79 = arith.constant 0.0322580636 : f32
    %154 = vector.broadcast %cst_79 : f32 to vector<8x1xf32>
    %155 = arith.mulf %153, %154 : vector<8x1xf32>
    %156 = math.sqrt %155 : vector<8x1xf32>
    %cst_80 = arith.constant 9.99999997E-7 : f32
    %157 = vector.broadcast %cst_80 : f32 to vector<8x1xf32>
    %158 = arith.addf %156, %157 : vector<8x1xf32>
    %cst_81 = arith.constant 1.000000e+00 : f32
    %159 = vector.broadcast %cst_81 : f32 to vector<8x1xf32>
    %160 = arith.divf %159, %158 : vector<8x1xf32>
    %161 = vector.broadcast %160 : vector<8x1xf32> to vector<8x32xf32>
    %162 = arith.mulf %150, %161 : vector<8x32xf32>
    %163 = vector.broadcast %142 : vector<1x32xf32> to vector<8x32xf32>
    %164 = arith.mulf %163, %162 : vector<8x32xf32>
    %165 = vector.broadcast %144 : vector<1x32xf32> to vector<8x32xf32>
    %166 = arith.addf %164, %165 : vector<8x32xf32>
    %c0_82 = arith.constant 0 : index
    %c0_83 = arith.constant 0 : index
    %c0_84 = arith.constant 0 : index
    %167 = vector.load %arg3[%c0_82, %c0_83, %c0_84] : memref<1x16x32xf32, #tpu.memory_space<vmem>>, vector<1x16x32xf32>
    %168 = vector.shape_cast %167 : vector<1x16x32xf32> to vector<16x32xf32>
    %c0_85 = arith.constant 0 : index
    %c0_86 = arith.constant 0 : index
    %c0_87 = arith.constant 0 : index
    %169 = vector.load %arg14[%c0_85, %c0_86, %c0_87] : memref<1x32x96xf32, #tpu.memory_space<vmem>>, vector<1x32x32xf32>
    %170 = vector.shape_cast %169 : vector<1x32x32xf32> to vector<32x32xf32>
    %cst_88 = arith.constant dense<0.000000e+00> : vector<8x32xf32>
    %171 = tpu.matmul %166, %170, %cst_88 {dimension_numbers = #tpu.dot_dimension_numbers<[1], [0], [0], [1], [0, 0, 1, 1], [], []>} : vector<8x32xf32>, vector<32x32xf32>, vector<8x32xf32> -> vector<8x32xf32>
    %c0_89 = arith.constant 0 : index
    %c0_90 = arith.constant 0 : index
    %c0_91 = arith.constant 0 : index
    %172 = vector.load %arg15[%c0_89, %c0_90, %c0_91] : memref<1x1x96xf32, #tpu.memory_space<vmem>>, vector<1x1x32xf32>
    %173 = vector.shape_cast %172 : vector<1x1x32xf32> to vector<1x32xf32>
    %174 = vector.broadcast %173 : vector<1x32xf32> to vector<8x32xf32>
    %175 = arith.addf %171, %174 : vector<8x32xf32>
    %c0_92 = arith.constant 0 : index
    %c0_93 = arith.constant 0 : index
    %c32 = arith.constant 32 : index
    %176 = vector.load %arg14[%c0_92, %c0_93, %c32] : memref<1x32x96xf32, #tpu.memory_space<vmem>>, vector<1x32x64xf32>
    %177 = vector.shape_cast %176 : vector<1x32x64xf32> to vector<32x64xf32>
    %cst_94 = arith.constant dense<0.000000e+00> : vector<16x64xf32>
    %178 = tpu.matmul %168, %177, %cst_94 {dimension_numbers = #tpu.dot_dimension_numbers<[1], [0], [0], [1], [0, 0, 1, 1], [], []>} : vector<16x32xf32>, vector<32x64xf32>, vector<16x64xf32> -> vector<16x64xf32>
    %c0_95 = arith.constant 0 : index
    %c0_96 = arith.constant 0 : index
    %c32_97 = arith.constant 32 : index
    %179 = vector.load %arg15[%c0_95, %c0_96, %c32_97] : memref<1x1x96xf32, #tpu.memory_space<vmem>>, vector<1x1x64xf32>
    %180 = vector.shape_cast %179 : vector<1x1x64xf32> to vector<1x64xf32>
    %181 = vector.broadcast %180 : vector<1x64xf32> to vector<16x64xf32>
    %182 = arith.addf %178, %181 : vector<16x64xf32>
    %183 = vector.extract_strided_slice %182 {offsets = [0, 0], sizes = [16, 32], strides = [1, 1]} : vector<16x64xf32> to vector<16x32xf32>
    %184 = vector.extract_strided_slice %182 {offsets = [0, 32], sizes = [16, 32], strides = [1, 1]} : vector<16x64xf32> to vector<16x32xf32>
    %185 = vector.extract_strided_slice %175 {offsets = [0, 0], sizes = [8, 8], strides = [1, 1]} : vector<8x32xf32> to vector<8x8xf32>
    %186 = vector.extract_strided_slice %183 {offsets = [0, 0], sizes = [16, 8], strides = [1, 1]} : vector<16x32xf32> to vector<16x8xf32>
    %187 = vector.extract_strided_slice %184 {offsets = [0, 0], sizes = [16, 8], strides = [1, 1]} : vector<16x32xf32> to vector<16x8xf32>
    %cst_98 = arith.constant dense<0.000000e+00> : vector<8x16xf32>
    %188 = tpu.matmul %185, %186, %cst_98 {dimension_numbers = #tpu.dot_dimension_numbers<[1], [1], [0], [0], [0, 0, 1, 0], [], []>} : vector<8x8xf32>, vector<16x8xf32>, vector<8x16xf32> -> vector<8x16xf32>
    %cst_99 = arith.constant 0.353553385 : f32
    %189 = vector.broadcast %cst_99 : f32 to vector<8x16xf32>
    %190 = arith.mulf %188, %189 : vector<8x16xf32>
    %cst_100 = arith.constant -1.000000e+09 : f32
    %191 = vector.shape_cast %11 : vector<1x16xi1> to vector<1x16xi1>
    %192 = vector.broadcast %191 : vector<1x16xi1> to vector<8x16xi1>
    %193 = vector.broadcast %cst_100 : f32 to vector<8x16xf32>
    %194 = arith.select %192, %193, %190 : vector<8x16xi1>, vector<8x16xf32>
    %cst_101 = arith.constant dense<0xFF800000> : vector<8xf32>
    %195 = vector.multi_reduction <maximumf>, %194, %cst_101 [1] : vector<8x16xf32> to vector<8xf32>
    %196 = vector.shape_cast %195 : vector<8xf32> to vector<8x1xf32>
    %197 = vector.broadcast %196 : vector<8x1xf32> to vector<8x16xf32>
    %198 = arith.subf %194, %197 : vector<8x16xf32>
    %199 = math.exp %198 : vector<8x16xf32>
    %cst_102 = arith.constant dense<0.000000e+00> : vector<8xf32>
    %200 = vector.multi_reduction <add>, %199, %cst_102 [1] : vector<8x16xf32> to vector<8xf32>
    %201 = vector.shape_cast %200 : vector<8xf32> to vector<8x1xf32>
    %cst_103 = arith.constant 1.000000e+00 : f32
    %202 = vector.broadcast %cst_103 : f32 to vector<8x1xf32>
    %203 = arith.divf %202, %201 : vector<8x1xf32>
    %204 = vector.broadcast %203 : vector<8x1xf32> to vector<8x16xf32>
    %205 = arith.mulf %199, %204 : vector<8x16xf32>
    %cst_104 = arith.constant dense<0.000000e+00> : vector<8x8xf32>
    %206 = tpu.matmul %205, %187, %cst_104 {dimension_numbers = #tpu.dot_dimension_numbers<[1], [0], [0], [1], [0, 0, 1, 1], [], []>} : vector<8x16xf32>, vector<16x8xf32>, vector<8x8xf32> -> vector<8x8xf32>
    %c0_105 = arith.constant 0 : index
    %c0_106 = arith.constant 0 : index
    %207 = vector.load %arg28[%c0_105, %c0_106] : memref<8x32xf32, #tpu.memory_space<vmem>>, vector<8x8xf32>
    tpu.vector_store %arg28[%c0_105, %c0_106], %206 {strides = array<i32>} : memref<8x32xf32, #tpu.memory_space<vmem>>, vector<8x8xf32>,
    %208 = vector.extract_strided_slice %175 {offsets = [0, 8], sizes = [8, 8], strides = [1, 1]} : vector<8x32xf32> to vector<8x8xf32>
    %209 = vector.extract_strided_slice %183 {offsets = [0, 8], sizes = [16, 8], strides = [1, 1]} : vector<16x32xf32> to vector<16x8xf32>
    %210 = vector.extract_strided_slice %184 {offsets = [0, 8], sizes = [16, 8], strides = [1, 1]} : vector<16x32xf32> to vector<16x8xf32>
    %cst_107 = arith.constant dense<0.000000e+00> : vector<8x16xf32>
    %211 = tpu.matmul %208, %209, %cst_107 {dimension_numbers = #tpu.dot_dimension_numbers<[1], [1], [0], [0], [0, 0, 1, 0], [], []>} : vector<8x8xf32>, vector<16x8xf32>, vector<8x16xf32> -> vector<8x16xf32>
    %cst_108 = arith.constant 0.353553385 : f32
    %212 = vector.broadcast %cst_108 : f32 to vector<8x16xf32>
    %213 = arith.mulf %211, %212 : vector<8x16xf32>
    %cst_109 = arith.constant -1.000000e+09 : f32
    %214 = vector.shape_cast %11 : vector<1x16xi1> to vector<1x16xi1>
    %215 = vector.broadcast %214 : vector<1x16xi1> to vector<8x16xi1>
    %216 = vector.broadcast %cst_109 : f32 to vector<8x16xf32>
    %217 = arith.select %215, %216, %213 : vector<8x16xi1>, vector<8x16xf32>
    %cst_110 = arith.constant dense<0xFF800000> : vector<8xf32>
    %218 = vector.multi_reduction <maximumf>, %217, %cst_110 [1] : vector<8x16xf32> to vector<8xf32>
    %219 = vector.shape_cast %218 : vector<8xf32> to vector<8x1xf32>
    %220 = vector.broadcast %219 : vector<8x1xf32> to vector<8x16xf32>
    %221 = arith.subf %217, %220 : vector<8x16xf32>
    %222 = math.exp %221 : vector<8x16xf32>
    %cst_111 = arith.constant dense<0.000000e+00> : vector<8xf32>
    %223 = vector.multi_reduction <add>, %222, %cst_111 [1] : vector<8x16xf32> to vector<8xf32>
    %224 = vector.shape_cast %223 : vector<8xf32> to vector<8x1xf32>
    %cst_112 = arith.constant 1.000000e+00 : f32
    %225 = vector.broadcast %cst_112 : f32 to vector<8x1xf32>
    %226 = arith.divf %225, %224 : vector<8x1xf32>
    %227 = vector.broadcast %226 : vector<8x1xf32> to vector<8x16xf32>
    %228 = arith.mulf %222, %227 : vector<8x16xf32>
    %cst_113 = arith.constant dense<0.000000e+00> : vector<8x8xf32>
    %229 = tpu.matmul %228, %210, %cst_113 {dimension_numbers = #tpu.dot_dimension_numbers<[1], [0], [0], [1], [0, 0, 1, 1], [], []>} : vector<8x16xf32>, vector<16x8xf32>, vector<8x8xf32> -> vector<8x8xf32>
    %c0_114 = arith.constant 0 : index
    %c8_115 = arith.constant 8 : index
    %230 = vector.load %arg28[%c0_114, %c8_115] : memref<8x32xf32, #tpu.memory_space<vmem>>, vector<8x8xf32>
    tpu.vector_store %arg28[%c0_114, %c8_115], %229 {strides = array<i32>} : memref<8x32xf32, #tpu.memory_space<vmem>>, vector<8x8xf32>,
    %231 = vector.extract_strided_slice %175 {offsets = [0, 16], sizes = [8, 8], strides = [1, 1]} : vector<8x32xf32> to vector<8x8xf32>
    %232 = vector.extract_strided_slice %183 {offsets = [0, 16], sizes = [16, 8], strides = [1, 1]} : vector<16x32xf32> to vector<16x8xf32>
    %233 = vector.extract_strided_slice %184 {offsets = [0, 16], sizes = [16, 8], strides = [1, 1]} : vector<16x32xf32> to vector<16x8xf32>
    %cst_116 = arith.constant dense<0.000000e+00> : vector<8x16xf32>
    %234 = tpu.matmul %231, %232, %cst_116 {dimension_numbers = #tpu.dot_dimension_numbers<[1], [1], [0], [0], [0, 0, 1, 0], [], []>} : vector<8x8xf32>, vector<16x8xf32>, vector<8x16xf32> -> vector<8x16xf32>
    %cst_117 = arith.constant 0.353553385 : f32
    %235 = vector.broadcast %cst_117 : f32 to vector<8x16xf32>
    %236 = arith.mulf %234, %235 : vector<8x16xf32>
    %cst_118 = arith.constant -1.000000e+09 : f32
    %237 = vector.shape_cast %11 : vector<1x16xi1> to vector<1x16xi1>
    %238 = vector.broadcast %237 : vector<1x16xi1> to vector<8x16xi1>
    %239 = vector.broadcast %cst_118 : f32 to vector<8x16xf32>
    %240 = arith.select %238, %239, %236 : vector<8x16xi1>, vector<8x16xf32>
    %cst_119 = arith.constant dense<0xFF800000> : vector<8xf32>
    %241 = vector.multi_reduction <maximumf>, %240, %cst_119 [1] : vector<8x16xf32> to vector<8xf32>
    %242 = vector.shape_cast %241 : vector<8xf32> to vector<8x1xf32>
    %243 = vector.broadcast %242 : vector<8x1xf32> to vector<8x16xf32>
    %244 = arith.subf %240, %243 : vector<8x16xf32>
    %245 = math.exp %244 : vector<8x16xf32>
    %cst_120 = arith.constant dense<0.000000e+00> : vector<8xf32>
    %246 = vector.multi_reduction <add>, %245, %cst_120 [1] : vector<8x16xf32> to vector<8xf32>
    %247 = vector.shape_cast %246 : vector<8xf32> to vector<8x1xf32>
    %cst_121 = arith.constant 1.000000e+00 : f32
    %248 = vector.broadcast %cst_121 : f32 to vector<8x1xf32>
    %249 = arith.divf %248, %247 : vector<8x1xf32>
    %250 = vector.broadcast %249 : vector<8x1xf32> to vector<8x16xf32>
    %251 = arith.mulf %245, %250 : vector<8x16xf32>
    %cst_122 = arith.constant dense<0.000000e+00> : vector<8x8xf32>
    %252 = tpu.matmul %251, %233, %cst_122 {dimension_numbers = #tpu.dot_dimension_numbers<[1], [0], [0], [1], [0, 0, 1, 1], [], []>} : vector<8x16xf32>, vector<16x8xf32>, vector<8x8xf32> -> vector<8x8xf32>
    %c0_123 = arith.constant 0 : index
    %c16_124 = arith.constant 16 : index
    %253 = vector.load %arg28[%c0_123, %c16_124] : memref<8x32xf32, #tpu.memory_space<vmem>>, vector<8x8xf32>
    tpu.vector_store %arg28[%c0_123, %c16_124], %252 {strides = array<i32>} : memref<8x32xf32, #tpu.memory_space<vmem>>, vector<8x8xf32>,
    %254 = vector.extract_strided_slice %175 {offsets = [0, 24], sizes = [8, 8], strides = [1, 1]} : vector<8x32xf32> to vector<8x8xf32>
    %255 = vector.extract_strided_slice %183 {offsets = [0, 24], sizes = [16, 8], strides = [1, 1]} : vector<16x32xf32> to vector<16x8xf32>
    %256 = vector.extract_strided_slice %184 {offsets = [0, 24], sizes = [16, 8], strides = [1, 1]} : vector<16x32xf32> to vector<16x8xf32>
    %cst_125 = arith.constant dense<0.000000e+00> : vector<8x16xf32>
    %257 = tpu.matmul %254, %255, %cst_125 {dimension_numbers = #tpu.dot_dimension_numbers<[1], [1], [0], [0], [0, 0, 1, 0], [], []>} : vector<8x8xf32>, vector<16x8xf32>, vector<8x16xf32> -> vector<8x16xf32>
    %cst_126 = arith.constant 0.353553385 : f32
    %258 = vector.broadcast %cst_126 : f32 to vector<8x16xf32>
    %259 = arith.mulf %257, %258 : vector<8x16xf32>
    %cst_127 = arith.constant -1.000000e+09 : f32
    %260 = vector.shape_cast %11 : vector<1x16xi1> to vector<1x16xi1>
    %261 = vector.broadcast %260 : vector<1x16xi1> to vector<8x16xi1>
    %262 = vector.broadcast %cst_127 : f32 to vector<8x16xf32>
    %263 = arith.select %261, %262, %259 : vector<8x16xi1>, vector<8x16xf32>
    %cst_128 = arith.constant dense<0xFF800000> : vector<8xf32>
    %264 = vector.multi_reduction <maximumf>, %263, %cst_128 [1] : vector<8x16xf32> to vector<8xf32>
    %265 = vector.shape_cast %264 : vector<8xf32> to vector<8x1xf32>
    %266 = vector.broadcast %265 : vector<8x1xf32> to vector<8x16xf32>
    %267 = arith.subf %263, %266 : vector<8x16xf32>
    %268 = math.exp %267 : vector<8x16xf32>
    %cst_129 = arith.constant dense<0.000000e+00> : vector<8xf32>
    %269 = vector.multi_reduction <add>, %268, %cst_129 [1] : vector<8x16xf32> to vector<8xf32>
    %270 = vector.shape_cast %269 : vector<8xf32> to vector<8x1xf32>
    %cst_130 = arith.constant 1.000000e+00 : f32
    %271 = vector.broadcast %cst_130 : f32 to vector<8x1xf32>
    %272 = arith.divf %271, %270 : vector<8x1xf32>
    %273 = vector.broadcast %272 : vector<8x1xf32> to vector<8x16xf32>
    %274 = arith.mulf %268, %273 : vector<8x16xf32>
    %cst_131 = arith.constant dense<0.000000e+00> : vector<8x8xf32>
    %275 = tpu.matmul %274, %256, %cst_131 {dimension_numbers = #tpu.dot_dimension_numbers<[1], [0], [0], [1], [0, 0, 1, 1], [], []>} : vector<8x16xf32>, vector<16x8xf32>, vector<8x8xf32> -> vector<8x8xf32>
    %c0_132 = arith.constant 0 : index
    %c24_133 = arith.constant 24 : index
    %276 = vector.load %arg28[%c0_132, %c24_133] : memref<8x32xf32, #tpu.memory_space<vmem>>, vector<8x8xf32>
    tpu.vector_store %arg28[%c0_132, %c24_133], %275 {strides = array<i32>} : memref<8x32xf32, #tpu.memory_space<vmem>>, vector<8x8xf32>,
    %c0_134 = arith.constant 0 : index
    %c0_135 = arith.constant 0 : index
    %277 = vector.load %arg28[%c0_134, %c0_135] : memref<8x32xf32, #tpu.memory_space<vmem>>, vector<8x32xf32>
    %c0_136 = arith.constant 0 : index
    %c0_137 = arith.constant 0 : index
    %c0_138 = arith.constant 0 : index
    %278 = vector.load %arg16[%c0_136, %c0_137, %c0_138] : memref<1x32x32xf32, #tpu.memory_space<vmem>>, vector<1x32x32xf32>
    %279 = vector.shape_cast %278 : vector<1x32x32xf32> to vector<32x32xf32>
    %cst_139 = arith.constant dense<0.000000e+00> : vector<8x32xf32>
    %280 = tpu.matmul %277, %279, %cst_139 {dimension_numbers = #tpu.dot_dimension_numbers<[1], [0], [0], [1], [0, 0, 1, 1], [], []>} : vector<8x32xf32>, vector<32x32xf32>, vector<8x32xf32> -> vector<8x32xf32>
    %c0_140 = arith.constant 0 : index
    %c0_141 = arith.constant 0 : index
    %c0_142 = arith.constant 0 : index
    %281 = vector.load %arg17[%c0_140, %c0_141, %c0_142] : memref<1x1x32xf32, #tpu.memory_space<vmem>>, vector<1x1x32xf32>
    %282 = vector.shape_cast %281 : vector<1x1x32xf32> to vector<1x32xf32>
    %283 = vector.broadcast %282 : vector<1x32xf32> to vector<8x32xf32>
    %284 = arith.addf %280, %283 : vector<8x32xf32>
    %285 = arith.addf %140, %284 : vector<8x32xf32>
    %c0_143 = arith.constant 0 : index
    %c0_144 = arith.constant 0 : index
    %c0_145 = arith.constant 0 : index
    %286 = vector.load %arg18[%c0_143, %c0_144, %c0_145] : memref<1x1x32xf32, #tpu.memory_space<vmem>>, vector<1x1x32xf32>
    %287 = vector.shape_cast %286 : vector<1x1x32xf32> to vector<1x32xf32>
    %c0_146 = arith.constant 0 : index
    %c0_147 = arith.constant 0 : index
    %c0_148 = arith.constant 0 : index
    %288 = vector.load %arg19[%c0_146, %c0_147, %c0_148] : memref<1x1x32xf32, #tpu.memory_space<vmem>>, vector<1x1x32xf32>
    %289 = vector.shape_cast %288 : vector<1x1x32xf32> to vector<1x32xf32>
    %cst_149 = arith.constant dense<0.000000e+00> : vector<8xf32>
    %290 = vector.multi_reduction <add>, %285, %cst_149 [1] : vector<8x32xf32> to vector<8xf32>
    %291 = vector.shape_cast %290 : vector<8xf32> to vector<8x1xf32>
    %cst_150 = arith.constant 3.200000e+01 : f32
    %292 = vector.broadcast %cst_150 : f32 to vector<8x1xf32>
    %293 = arith.divf %291, %292 : vector<8x1xf32>
    %294 = vector.broadcast %293 : vector<8x1xf32> to vector<8x32xf32>
    %295 = arith.subf %285, %294 : vector<8x32xf32>
    %296 = arith.mulf %295, %295 : vector<8x32xf32>
    %cst_151 = arith.constant dense<0.000000e+00> : vector<8xf32>
    %297 = vector.multi_reduction <add>, %296, %cst_151 [1] : vector<8x32xf32> to vector<8xf32>
    %298 = vector.shape_cast %297 : vector<8xf32> to vector<8x1xf32>
    %cst_152 = arith.constant 0.0322580636 : f32
    %299 = vector.broadcast %cst_152 : f32 to vector<8x1xf32>
    %300 = arith.mulf %298, %299 : vector<8x1xf32>
    %301 = math.sqrt %300 : vector<8x1xf32>
    %cst_153 = arith.constant 9.99999997E-7 : f32
    %302 = vector.broadcast %cst_153 : f32 to vector<8x1xf32>
    %303 = arith.addf %301, %302 : vector<8x1xf32>
    %cst_154 = arith.constant 1.000000e+00 : f32
    %304 = vector.broadcast %cst_154 : f32 to vector<8x1xf32>
    %305 = arith.divf %304, %303 : vector<8x1xf32>
    %306 = vector.broadcast %305 : vector<8x1xf32> to vector<8x32xf32>
    %307 = arith.mulf %295, %306 : vector<8x32xf32>
    %308 = vector.broadcast %287 : vector<1x32xf32> to vector<8x32xf32>
    %309 = arith.mulf %308, %307 : vector<8x32xf32>
    %310 = vector.broadcast %289 : vector<1x32xf32> to vector<8x32xf32>
    %311 = arith.addf %309, %310 : vector<8x32xf32>
    %c0_155 = arith.constant 0 : index
    %c0_156 = arith.constant 0 : index
    %c0_157 = arith.constant 0 : index
    %312 = vector.load %arg20[%c0_155, %c0_156, %c0_157] : memref<1x32x64xf32, #tpu.memory_space<vmem>>, vector<1x32x64xf32>
    %313 = vector.shape_cast %312 : vector<1x32x64xf32> to vector<32x64xf32>
    %cst_158 = arith.constant dense<0.000000e+00> : vector<8x64xf32>
    %314 = tpu.matmul %311, %313, %cst_158 {dimension_numbers = #tpu.dot_dimension_numbers<[1], [0], [0], [1], [0, 0, 1, 1], [], []>} : vector<8x32xf32>, vector<32x64xf32>, vector<8x64xf32> -> vector<8x64xf32>
    %c0_159 = arith.constant 0 : index
    %c0_160 = arith.constant 0 : index
    %c0_161 = arith.constant 0 : index
    %315 = vector.load %arg21[%c0_159, %c0_160, %c0_161] : memref<1x1x64xf32, #tpu.memory_space<vmem>>, vector<1x1x64xf32>
    %316 = vector.shape_cast %315 : vector<1x1x64xf32> to vector<1x64xf32>
    %317 = vector.broadcast %316 : vector<1x64xf32> to vector<8x64xf32>
    %318 = arith.addf %314, %317 : vector<8x64xf32>
    %cst_162 = arith.constant 0.000000e+00 : f32
    %319 = vector.broadcast %cst_162 : f32 to vector<8x64xf32>
    %320 = arith.maximumf %318, %319 : vector<8x64xf32>
    %c0_163 = arith.constant 0 : index
    %c0_164 = arith.constant 0 : index
    %c0_165 = arith.constant 0 : index
    %321 = vector.load %arg22[%c0_163, %c0_164, %c0_165] : memref<1x64x32xf32, #tpu.memory_space<vmem>>, vector<1x64x32xf32>
    %322 = vector.shape_cast %321 : vector<1x64x32xf32> to vector<64x32xf32>
    %cst_166 = arith.constant dense<0.000000e+00> : vector<8x32xf32>
    %323 = tpu.matmul %320, %322, %cst_166 {dimension_numbers = #tpu.dot_dimension_numbers<[1], [0], [0], [1], [0, 0, 1, 1], [], []>} : vector<8x64xf32>, vector<64x32xf32>, vector<8x32xf32> -> vector<8x32xf32>
    %324 = arith.addf %285, %323 : vector<8x32xf32>
    %c0_167 = arith.constant 0 : index
    %c0_168 = arith.constant 0 : index
    %c0_169 = arith.constant 0 : index
    %325 = vector.load %arg23[%c0_167, %c0_168, %c0_169] : memref<1x1x32xf32, #tpu.memory_space<vmem>>, vector<1x1x32xf32>
    %326 = vector.shape_cast %325 : vector<1x1x32xf32> to vector<1x32xf32>
    %327 = vector.broadcast %326 : vector<1x32xf32> to vector<8x32xf32>
    %328 = arith.addf %324, %327 : vector<8x32xf32>
    %c0_170 = arith.constant 0 : index
    %c0_171 = arith.constant 0 : index
    %329 = vector.load %arg27[%c0_170, %c0_171] : memref<8x32xf32, #tpu.memory_space<vmem>>, vector<8x32xf32>
    tpu.vector_store %arg27[%c0_170, %c0_171], %328 {strides = array<i32>} : memref<8x32xf32, #tpu.memory_space<vmem>>, vector<8x32xf32>,
    %c1_i32 = arith.constant 1 : i32
    %330 = arith.cmpi eq, %arg1, %c1_i32 : i32
    %331 = arith.extui %330 : i1 to i32
    %c0_i32_172 = arith.constant 0 : i32
    %332 = arith.cmpi ne, %331, %c0_i32_172 : i32
    scf.if %332 {
      %c0_173 = arith.constant 0 : index
      %c0_174 = arith.constant 0 : index
      %333 = vector.load %arg24[%c0_173, %c0_174] : memref<1x32xf32, #tpu.memory_space<vmem>>, vector<1x32xf32>
      %c0_175 = arith.constant 0 : index
      %c0_176 = arith.constant 0 : index
      %334 = vector.load %arg25[%c0_175, %c0_176] : memref<1x32xf32, #tpu.memory_space<vmem>>, vector<1x32xf32>
      %cst_177 = arith.constant dense<0.000000e+00> : vector<8xf32>
      %335 = vector.multi_reduction <add>, %328, %cst_177 [1] : vector<8x32xf32> to vector<8xf32>
      %336 = vector.shape_cast %335 : vector<8xf32> to vector<8x1xf32>
      %cst_178 = arith.constant 3.200000e+01 : f32
      %337 = vector.broadcast %cst_178 : f32 to vector<8x1xf32>
      %338 = arith.divf %336, %337 : vector<8x1xf32>
      %339 = vector.broadcast %338 : vector<8x1xf32> to vector<8x32xf32>
      %340 = arith.subf %328, %339 : vector<8x32xf32>
      %341 = arith.mulf %340, %340 : vector<8x32xf32>
      %cst_179 = arith.constant dense<0.000000e+00> : vector<8xf32>
      %342 = vector.multi_reduction <add>, %341, %cst_179 [1] : vector<8x32xf32> to vector<8xf32>
      %343 = vector.shape_cast %342 : vector<8xf32> to vector<8x1xf32>
      %cst_180 = arith.constant 0.0322580636 : f32
      %344 = vector.broadcast %cst_180 : f32 to vector<8x1xf32>
      %345 = arith.mulf %343, %344 : vector<8x1xf32>
      %346 = math.sqrt %345 : vector<8x1xf32>
      %cst_181 = arith.constant 9.99999997E-7 : f32
      %347 = vector.broadcast %cst_181 : f32 to vector<8x1xf32>
      %348 = arith.addf %346, %347 : vector<8x1xf32>
      %cst_182 = arith.constant 1.000000e+00 : f32
      %349 = vector.broadcast %cst_182 : f32 to vector<8x1xf32>
      %350 = arith.divf %349, %348 : vector<8x1xf32>
      %351 = vector.broadcast %350 : vector<8x1xf32> to vector<8x32xf32>
      %352 = arith.mulf %340, %351 : vector<8x32xf32>
      %353 = vector.broadcast %333 : vector<1x32xf32> to vector<8x32xf32>
      %354 = arith.mulf %353, %352 : vector<8x32xf32>
      %355 = vector.broadcast %334 : vector<1x32xf32> to vector<8x32xf32>
      %356 = arith.addf %354, %355 : vector<8x32xf32>
      %c0_183 = arith.constant 0 : index
      %c0_184 = arith.constant 0 : index
      %c0_185 = arith.constant 0 : index
      %357 = vector.load %arg26[%c0_183, %c0_184, %c0_185] : memref<1x8x32xf32, #tpu.memory_space<vmem>>, vector<1x8x32xf32>
      %358 = vector.shape_cast %357 : vector<1x8x32xf32> to vector<8x32xf32>
      %359 = vector.shape_cast %356 : vector<8x32xf32> to vector<1x8x32xf32>
      tpu.vector_store %arg26[%c0_183, %c0_184, %c0_185], %359 {strides = array<i32>} : memref<1x8x32xf32, #tpu.memory_space<vmem>>, vector<1x8x32xf32>,
    } else {
    }
    return
  }
  func.func @transform_0(%arg0: i32, %arg1: i32) -> (i32, i32, i32) {
    %c0_i32 = arith.constant 0 : i32
    %c0_i32_0 = arith.constant 0 : i32
    %c0_i32_1 = arith.constant 0 : i32
    return %arg0, %c0_i32, %c0_i32_0 : i32, i32, i32
  }
  func.func @transform_1(%arg0: i32, %arg1: i32) -> (i32, i32, i32) {
    %c0_i32 = arith.constant 0 : i32
    %c0_i32_0 = arith.constant 0 : i32
    %c0_i32_1 = arith.constant 0 : i32
    return %arg0, %c0_i32, %c0_i32_0 : i32, i32, i32
  }
  func.func @transform_2(%arg0: i32, %arg1: i32) -> (i32, i32, i32) {
    %c0_i32 = arith.constant 0 : i32
    %c0_i32_0 = arith.constant 0 : i32
    %c0_i32_1 = arith.constant 0 : i32
    %c0_i32_2 = arith.constant 0 : i32
    return %c0_i32, %c0_i32_0, %c0_i32_1 : i32, i32, i32
  }
  func.func @transform_3(%arg0: i32, %arg1: i32) -> (i32, i32, i32) {
    %c0_i32 = arith.constant 0 : i32
    %c0_i32_0 = arith.constant 0 : i32
    %c0_i32_1 = arith.constant 0 : i32
    return %arg0, %c0_i32, %c0_i32_0 : i32, i32, i32
  }
  func.func @transform_4(%arg0: i32, %arg1: i32) -> (i32, i32, i32) {
    %c0_i32 = arith.constant 0 : i32
    %c0_i32_0 = arith.constant 0 : i32
    %c0_i32_1 = arith.constant 0 : i32
    return %arg1, %c0_i32, %c0_i32_0 : i32, i32, i32
  }
  func.func @transform_5(%arg0: i32, %arg1: i32) -> (i32, i32, i32) {
    %c0_i32 = arith.constant 0 : i32
    %c0_i32_0 = arith.constant 0 : i32
    %c0_i32_1 = arith.constant 0 : i32
    return %arg1, %c0_i32, %c0_i32_0 : i32, i32, i32
  }
  func.func @transform_6(%arg0: i32, %arg1: i32) -> (i32, i32, i32) {
    %c0_i32 = arith.constant 0 : i32
    %c0_i32_0 = arith.constant 0 : i32
    %c0_i32_1 = arith.constant 0 : i32
    return %arg1, %c0_i32, %c0_i32_0 : i32, i32, i32
  }
  func.func @transform_7(%arg0: i32, %arg1: i32) -> (i32, i32, i32) {
    %c0_i32 = arith.constant 0 : i32
    %c0_i32_0 = arith.constant 0 : i32
    %c0_i32_1 = arith.constant 0 : i32
    return %arg1, %c0_i32, %c0_i32_0 : i32, i32, i32
  }
  func.func @transform_8(%arg0: i32, %arg1: i32) -> (i32, i32, i32) {
    %c0_i32 = arith.constant 0 : i32
    %c0_i32_0 = arith.constant 0 : i32
    %c0_i32_1 = arith.constant 0 : i32
    return %arg1, %c0_i32, %c0_i32_0 : i32, i32, i32
  }
  func.func @transform_9(%arg0: i32, %arg1: i32) -> (i32, i32, i32) {
    %c0_i32 = arith.constant 0 : i32
    %c0_i32_0 = arith.constant 0 : i32
    %c0_i32_1 = arith.constant 0 : i32
    return %arg1, %c0_i32, %c0_i32_0 : i32, i32, i32
  }
  func.func @transform_10(%arg0: i32, %arg1: i32) -> (i32, i32, i32) {
    %c0_i32 = arith.constant 0 : i32
    %c0_i32_0 = arith.constant 0 : i32
    %c0_i32_1 = arith.constant 0 : i32
    return %arg1, %c0_i32, %c0_i32_0 : i32, i32, i32
  }
  func.func @transform_11(%arg0: i32, %arg1: i32) -> (i32, i32, i32) {
    %c0_i32 = arith.constant 0 : i32
    %c0_i32_0 = arith.constant 0 : i32
    %c0_i32_1 = arith.constant 0 : i32
    return %arg1, %c0_i32, %c0_i32_0 : i32, i32, i32
  }
  func.func @transform_12(%arg0: i32, %arg1: i32) -> (i32, i32, i32) {
    %c0_i32 = arith.constant 0 : i32
    %c0_i32_0 = arith.constant 0 : i32
    %c0_i32_1 = arith.constant 0 : i32
    return %arg1, %c0_i32, %c0_i32_0 : i32, i32, i32
  }
  func.func @transform_13(%arg0: i32, %arg1: i32) -> (i32, i32, i32) {
    %c0_i32 = arith.constant 0 : i32
    %c0_i32_0 = arith.constant 0 : i32
    %c0_i32_1 = arith.constant 0 : i32
    return %arg1, %c0_i32, %c0_i32_0 : i32, i32, i32
  }
  func.func @transform_14(%arg0: i32, %arg1: i32) -> (i32, i32, i32) {
    %c0_i32 = arith.constant 0 : i32
    %c0_i32_0 = arith.constant 0 : i32
    %c0_i32_1 = arith.constant 0 : i32
    return %arg1, %c0_i32, %c0_i32_0 : i32, i32, i32
  }
  func.func @transform_15(%arg0: i32, %arg1: i32) -> (i32, i32, i32) {
    %c0_i32 = arith.constant 0 : i32
    %c0_i32_0 = arith.constant 0 : i32
    %c0_i32_1 = arith.constant 0 : i32
    return %arg1, %c0_i32, %c0_i32_0 : i32, i32, i32
  }
  func.func @transform_16(%arg0: i32, %arg1: i32) -> (i32, i32, i32) {
    %c0_i32 = arith.constant 0 : i32
    %c0_i32_0 = arith.constant 0 : i32
    %c0_i32_1 = arith.constant 0 : i32
    return %arg1, %c0_i32, %c0_i32_0 : i32, i32, i32
  }
  func.func @transform_17(%arg0: i32, %arg1: i32) -> (i32, i32, i32) {
    %c0_i32 = arith.constant 0 : i32
    %c0_i32_0 = arith.constant 0 : i32
    %c0_i32_1 = arith.constant 0 : i32
    return %arg1, %c0_i32, %c0_i32_0 : i32, i32, i32
  }
  func.func @transform_18(%arg0: i32, %arg1: i32) -> (i32, i32, i32) {
    %c0_i32 = arith.constant 0 : i32
    %c0_i32_0 = arith.constant 0 : i32
    %c0_i32_1 = arith.constant 0 : i32
    return %arg1, %c0_i32, %c0_i32_0 : i32, i32, i32
  }
  func.func @transform_19(%arg0: i32, %arg1: i32) -> (i32, i32, i32) {
    %c0_i32 = arith.constant 0 : i32
    %c0_i32_0 = arith.constant 0 : i32
    %c0_i32_1 = arith.constant 0 : i32
    return %arg1, %c0_i32, %c0_i32_0 : i32, i32, i32
  }
  func.func @transform_20(%arg0: i32, %arg1: i32) -> (i32, i32, i32) {
    %c0_i32 = arith.constant 0 : i32
    %c0_i32_0 = arith.constant 0 : i32
    %c0_i32_1 = arith.constant 0 : i32
    return %arg1, %c0_i32, %c0_i32_0 : i32, i32, i32
  }
  func.func @transform_21(%arg0: i32, %arg1: i32) -> (i32, i32, i32) {
    %c0_i32 = arith.constant 0 : i32
    %c0_i32_0 = arith.constant 0 : i32
    %c0_i32_1 = arith.constant 0 : i32
    return %arg1, %c0_i32, %c0_i32_0 : i32, i32, i32
  }
  func.func @transform_22(%arg0: i32, %arg1: i32) -> (i32, i32) {
    %c0_i32 = arith.constant 0 : i32
    %c0_i32_0 = arith.constant 0 : i32
    %c0_i32_1 = arith.constant 0 : i32
    return %c0_i32, %c0_i32_0 : i32, i32
  }
  func.func @transform_23(%arg0: i32, %arg1: i32) -> (i32, i32) {
    %c0_i32 = arith.constant 0 : i32
    %c0_i32_0 = arith.constant 0 : i32
    %c0_i32_1 = arith.constant 0 : i32
    return %c0_i32, %c0_i32_0 : i32, i32
  }
  func.func @transform_24(%arg0: i32, %arg1: i32) -> (i32, i32, i32) {
    %c0_i32 = arith.constant 0 : i32
    %c0_i32_0 = arith.constant 0 : i32
    %c0_i32_1 = arith.constant 0 : i32
    return %arg0, %c0_i32, %c0_i32_0 : i32, i32, i32
  }
}

</mosaic_0001>

<bundles_post_ra>
// kernel: decoder_forward.1
= control target key start
LH: loop header
LB: loop body
LE: loop exit
PB: predicated region body
PF: predicated region fallthrough
CT: control target
= control target key end

     0   :  { %s6624_s0 = inlined_call_operand.vmem [shape: f32[2,8,32], index: 0, kind: input, shape index: {}]   ;;  %s6625_s1 = inlined_call_operand.hbm [shape: f32[2,16,32], index: 1, kind: input, shape index: {}]   ;;  %s6626_s2 = inlined_call_operand.vmem [shape: f32[1,8,8], index: 2, kind: input, shape index: {}]   ;;  %s6627_s3 = inlined_call_operand.vmem [shape: f32[2,1,16], index: 3, kind: input, shape index: {}]   ;;  %s6628_s4 = inlined_call_operand.hbm [shape: f32[2,1,32], index: 4, kind: input, shape index: {}]   ;;  %s6629_s5 = inlined_call_operand.hbm [shape: f32[2,1,32], index: 5, kind: input, shape index: {}]   ;;  %s6630_s6 = inlined_call_operand.vmem [shape: f32[2,32,96], index: 6, kind: input, shape index: {}]   ;;  %s6631_s7 = inlined_call_operand.hbm [shape: f32[2,1,96], index: 7, kind: input, shape index: {}]   ;;  %s6632_s8 = inlined_call_operand.vmem [shape: f32[2,32,32], index: 8, kind: input, shape index: {}]   ;;  %s6633_s9 = inlined_call_operand.hbm [shape: f32[2,1,32], index: 9, kind: input, shape index: {}]   ;;  %s6634_s10 = inlined_call_operand.hbm [shape: f32[2,1,32], index: 10, kind: input, shape index: {}]   ;;  %s6635_s11 = inlined_call_operand.hbm [shape: f32[2,1,32], index: 11, kind: input, shape index: {}]   ;;  %s6636_s12 = inlined_call_operand.vmem [shape: f32[2,32,96], index: 12, kind: input, shape index: {}]   ;;  %s6637_s13 = inlined_call_operand.hbm [shape: f32[2,1,96], index: 13, kind: input, shape index: {}]   ;;  %s6638_s14 = inlined_call_operand.hbm [shape: f32[2,32,32], index: 14, kind: input, shape index: {}]   ;;  %s6639_s15 = inlined_call_operand.hbm [shape: f32[2,1,32], index: 15, kind: input, shape index: {}]   ;;  %s6640_s16 = inlined_call_operand.hbm [shape: f32[2,1,32], index: 16, kind: input, shape index: {}]   ;;  %s6641_s17 = inlined_call_operand.hbm [shape: f32[2,1,32], index: 17, kind: input, shape index: {}]   ;;  %s6642_s18 = inlined_call_operand.hbm [shape: f32[2,32,64], index: 18, kind: input, shape index: {}]   ;;  %s6643_s19 = inlined_call_operand.hbm [shape: f32[2,1,64], index: 19, kind: input, shape index: {}]   ;;  %s6644_s20 = inlined_call_operand.vmem [shape: f32[2,64,32], index: 20, kind: input, shape index: {}]   ;;  %s6645_s21 = inlined_call_operand.hbm [shape: f32[2,1,32], index: 21, kind: input, shape index: {}]   ;;  %s6646_s22 = inlined_call_operand.hbm [shape: f32[1,32], index: 22, kind: input, shape index: {}]   ;;  %s6647_s23 = inlined_call_operand.hbm [shape: f32[1,32], index: 23, kind: input, shape index: {}]   ;;  %s6648_s24 = inlined_call_operand.hbm [shape: f32[2,8,32], index: 24, kind: output, shape index: {}]  }
   0x1   :  { %6700 = sst [smem:[#allocation60_spill]] %s6624_s0 }
   0x2   :  { %6701 = sst [smem:[#allocation61_spill]] %s6625_s1 }
   0x3   :  { %6702 = sst [smem:[#allocation62_spill]] %s6626_s2 }
   0x4   :  { %6703 = sst [smem:[#allocation63_spill]] %s6627_s3 }
   0x5   :  { %6704 = sst [smem:[#allocation64_spill]] %s6628_s4 }
   0x6   :  { %6705 = sst [smem:[#allocation65_spill]] %s6629_s5 }
   0x7   :  { %6706 = sst [smem:[#allocation66_spill]] %s6630_s6 }
   0x8   :  { %6707 = sst [smem:[#allocation67_spill]] %s6631_s7 }
   0x9   :  { %6708 = sst [smem:[#allocation68_spill]] %s6632_s8 }
   0xa   :  { %6709 = sst [smem:[#allocation69_spill]] %s6633_s9 }
   0xb   :  { %6710 = sst [smem:[#allocation70_spill]] %s6634_s10 }
   0xc   :  { %6711 = sst [smem:[#allocation71_spill]] %s6635_s11 }
   0xd   :  { %6712 = sst [smem:[#allocation72_spill]] %s6636_s12 }
   0xe   :  { %6713 = sst [smem:[#allocation73_spill]] %s6637_s13 }
   0xf   :  { %6714 = sst [smem:[#allocation74_spill]] %s6638_s14 }
  0x10   :  { %6715 = sst [smem:[#allocation75_spill]] %s6639_s15 }
  0x11   :  { %6716 = sst [smem:[#allocation76_spill]] %s6640_s16 }
  0x12   :  { %6717 = sst [smem:[#allocation77_spill]] %s6641_s17 }
  0x13   :  { %6718 = sst [smem:[#allocation78_spill]] %s6642_s18 }
  0x14   :  { %6719 = sst [smem:[#allocation79_spill]] %s6643_s19 }
  0x15   :  { %6720 = sst [smem:[#allocation80_spill]] %s6644_s20 }
  0x16   :  { %6721 = sst [smem:[#allocation81_spill]] %s6645_s21 }
  0x17   :  { %6722 = sst [smem:[#allocation82_spill]] %s6646_s22 }
  0x18   :  { %6723 = sst [smem:[#allocation83_spill]] %s6647_s23 }
  0x19   :  { %6724 = sst [smem:[#allocation84_spill]] %s6648_s24 }
  0x1a   :  { %29 = vsyncpa [#allocation5], 0 }
  0x1b   :  { %31 = vsyncpa [#allocation5 + $0x1], 0 }
  0x1c   :  { %32 = vsyncpa [#allocation8], 0 }
  0x1d   :  { %34 = vsyncpa [#allocation8 + $0x1], 0 }
  0x1e   :  { %35 = vsyncpa [#allocation11], 0 }
  0x1f   :  { %37 = vsyncpa [#allocation11 + $0x1], 0 }
  0x20   :  { %38 = vsyncpa [#allocation14], 0 }
  0x21   :  { %40 = vsyncpa [#allocation14 + $0x1], 0 }
  0x22   :  { %41 = vsyncpa [#allocation17], 0 }
  0x23   :  { %43 = vsyncpa [#allocation17 + $0x1], 0 }
  0x24   :  { %44 = vsyncpa [#allocation20], 0 }
  0x25   :  { %46 = vsyncpa [#allocation20 + $0x1], 0 }
  0x26   :  { %47 = vsyncpa [#allocation23], 0 }
  0x27   :  { %49 = vsyncpa [#allocation23 + $0x1], 0 }
  0x28   :  { %50 = vsyncpa [#allocation26], 0 }
  0x29   :  { %52 = vsyncpa [#allocation26 + $0x1], 0 }
  0x2a   :  { %53 = vsyncpa [#allocation29], 0 }
  0x2b   :  { %54 = vsyncpa [#allocation6], 0 }
  0x2c   :  { %56 = vsyncpa [#allocation6 + $0x1], 0  ;;  %s5515_s5 = smov 0   ;;  %s5517_s26 = smov 0  }
  0x2d   :  { %s5519_s27 = smov 0   ;;  %s5521_s28 = smov 0  }
  0x2e   :  { %s5523_s6 = smov 0   ;;  %s5525_s2 = smov 0  }
  0x2f   :  { %s5527_s29 = smov 0   ;;  %s5529_s0 = smov 0  }
  0x30   :  { %s5531_s7 = smov 0   ;;  %s5533_s30 = smov 0  }
  0x31   :  { %s5535_s3 = smov 0  }
  0x32 LB: > { %6725 = sst [smem:[#allocation42_spill]] %s5314_s26  ;;  %s5571_s25 = sadd.s32 4294967295, %s5350_s3   ;;  %s5350_s3 = sphi %s5535_s3, %s62_s3   ;;  %s5346_s30 = sphi %s5533_s30, %s6842_s30   ;;  %s5342_s7 = sphi %s5531_s7, %s6841_s7   ;;  %s5338_s0 = sphi %s5529_s0, %s6840_s0   ;;  %s5334_s29 = sphi %s5527_s29, %s6839_s29   ;;  %s5330_s2 = sphi %s5525_s2, %s6838_s2   ;;  %s5326_s6 = sphi %s5523_s6, %s6837_s6   ;;  %s5322_s28 = sphi %s5521_s28, %s6836_s28   ;;  %s5318_s27 = sphi %s5519_s27, %s6835_s27   ;;  %s5314_s26 = sphi %s5517_s26, %s6834_s26   ;;  %s5310_s5 = sphi %s5515_s5, %s6833_s5  }
  0x33   : > { %6726 = sst [smem:[#allocation43_spill]] %s5318_s27  ;;  %s4017_s8 = sadd.s32 4294967294, %s5350_s3  }
  0x34   : > { %6727 = sst [smem:[#allocation44_spill]] %s5322_s28  ;;  %s71_s4 = sadd.s32 1, %s5342_s7 }
  0x35   : > { %6728 = sst [smem:[#allocation45_spill]] %s5326_s6  ;;  %s74_s1 = sadd.s32 1, %s5346_s30 }
  0x36   : > { %6729 = sst [smem:[#allocation46_spill]] %s5330_s2  ;;  %p72_p0 = scmp.ge.s32.totalorder %s71_s4, 2 }
  0x37   : > { %6730 = sst [smem:[#allocation47_spill]] %s5334_s29  ;;  %s107_s24 = sadd.s32 1, %s5330_s2 }
  0x38   : > { %6731 = sst [smem:[#allocation48_spill]] %s5338_s0  ;;  %p6662_p1 = scmp.ne.s32.totalorder %s5330_s2, %s5326_s6 }
  0x39   : > { %6732 = sst [smem:[#allocation49_spill]] %s5342_s7  ;;  %p115_p2 = scmp.eq.s32.totalorder %s5350_s3, 0 }
  0x3a   : > { %6733 = sst [smem:[#allocation50_spill]] %s5346_s30  ;;  %s6844_s4 = smov (%p72_p0, %s71_s4), 0 }
  0x3b   : > { %6734 = sst [smem:[#allocation51_spill]] %s5350_s3  ;;  %s6846_s1 = smov (!%p72_p0, %s74_s1), %s5346_s30 }
  0x3c   : > { %6735 = sst [smem:[#allocation52_spill]] %s5571_s25  ;;  %p5588_p3 = por %p115_p2, %p6662_p1 }
  0x3d   : > { %6736 = sst [smem:[#allocation53_spill]] %s6844_s4  ;;  %p6661_p4 = scmp.ne.s32.totalorder %s5326_s6, %s5322_s28 }
  0x3e   : > { %s6737_s20 = scalar_select %p5588_p3, 1, 0 }
  0x3f   : > { %p76_p5 = scmp.ge.s32.totalorder %s6846_s1, 2  ;;  %p6673_p6 = scmp.eq.s32.totalorder %s5571_s25, 0 }
  0x40   : > { %s177_s12 = ssub.s32 %s5342_s7, %s6844_s4  ;;  %s180_s29 = sadd.s32 1, %s5318_s27 }
  0x41   : > { %s6848_s1 = smov (%p76_p5, %s6846_s1), 0  ;;  %p5605_p7 = por %p6673_p6, %p6661_p4 }
  0x42   : > { %6738 = sst [smem:[#allocation54_spill]] %s6848_s1  ;;  %p178_p8 = scmp.eq.s32.totalorder %s177_s12, 0 }
  0x43   : > { %s6739_s0 = scalar_select %p5605_p7, 1, 0 }
  0x44   : > { %s104_s21 = ssub.s32 %s5346_s30, %s6848_s1  ;;  %p187_p9 = scmp.ne.s32.totalorder %s5318_s27, %s5314_s26 }
  0x45   : > { %p105_p10 = scmp.eq.s32.totalorder %s104_s21, 0  ;;  %p193_p11 = scmp.ne.s32.totalorder %s5314_s26, %s5310_s5 }
  0x46   : > { %s5616_s4 = scalar_select %p178_p8, %s5318_s27, %s180_s29  }
  0x47   : > { %s5619_s18 = scalar_select %p105_p10, %s5330_s2, %s107_s24  }
  0x48   : > { %6740 = sst [smem:[#allocation55_spill]] %s5616_s4  ;;  %p5623_p12 = por %p187_p9, %p115_p2 }
  0x49   : > { %6741 = sst [smem:[#allocation56_spill]] %s5619_s18  ;;  %p5629_p13 = por %p193_p11, %p6673_p6 }
  0x4a   : > { %s6742_s16 = scalar_select %p5623_p12, 1, 0 }
  0x4b   : > { %s6743_s14 = scalar_select %p5629_p13, 1, 0 }
  0x4c   : > { %p701_p0 = scmp.eq.s32.totalorder %s5571_s25, 3  ;;  %p707_p5 = scmp.eq.s32.totalorder %s4017_s8, 3 }
  0x4d   : > { %6744 = sst [smem:[#allocation57_spill]] %s6743_s14  ;;  %p4018_p4 = scmp.ge.s32.totalorder %s5350_s3, 1 }
  0x4e   : > { %p714_p1 = scmp.lt.s32.totalorder %s5350_s3, 5  ;;  %p6745_p7 = scmp.ne.s32.totalorder %s5330_s2, %s5326_s6 }
  0x4f   : > { %p6748_p10 = scmp.ne.s32.totalorder %s5326_s6, %s5322_s28  ;;  %s5352_s5 = smov [#allocation28]  }
  0x50   : > { %p5639_p8 = por %p701_p0, %p6745_p7  ;;  %p5650_p2 = pnand %p4018_p4, %p714_p1 }
  0x51   : > { %p5646_p3 = por %p707_p5, %p6748_p10  ;;  %s730_s29 = sshll.u32 %s5352_s5, 4  ;;  %s731_s29 = int_to_ptr.vmem [resolvable:$true] %s730_s29 }
  0x52   : > { %s6746_s12 = scalar_select %p5639_p8, 1, 0 }
  0x53   : > { %s6749_s21 = scalar_select %p5646_p3, 1, 0 }
  0x54   : > { %6747 = sst [smem:[#allocation58_spill]] %s6746_s12  ;;  %p4501_p9 = pneg %p5650_p2 }
  0x55   : > { %6750 = sst [smem:[#allocation59_spill]] %s6749_s21  ;;  %s5353_s8 = smov [#allocation30]  }
  0x56   : > { %s6751_s24 = scalar_select %p5650_p2, 1, 0 }
  0x57   : > { %s741_s1 = sshll.u32 %s5353_s8, 4  ;;  %p5658_p7 = pnand %p4501_p9, %p6673_p6  ;;  %s5662_s1 = int_to_ptr.vmem [resolvable:$true] %s741_s1 }
  0x58   : > { %s6753_s22 = sld [smem:[#allocation82_spill]] }
  0x59   : > { %p4722_p4 = pneg %p5658_p7 }
  0x5e   : > { %s4720_s28 = scalar_lea.hbm %s6753_s22, 16 }
  0x5f   : > { %p4721_p1 = scmp.ne.s32.totalorder %s6753_s22, %s4720_s28  ;;  %p4727_p5 = scmp.lt.u32.totalorder %s4720_s28, %s6753_s22 }
  0x61   : > { %p4723_p11 = pnand %p4722_p4, %p4721_p1 }
  0x63   : > { %p4724_p0 = pneg %p4723_p11 }
  0x65   : > { %p4729_p10 = pnand %p4727_p5, %p4724_p0 }
  0x67   : > { %4732 = shalt.err (!%p4729_p10)
}
  0x68   : > { %s4733_s26 = scalar_lea.vmem %s731_s29, 16  ;;  %s4740_s14 = scalar_lea.vmem %s731_s29, 32 }
  0x69   : > { %p4734_p9 = scmp.ne.s32.totalorder %s731_s29, %s4733_s26  ;;  %p4741_p8 = scmp.lt.s32.totalorder %s731_s29, %s731_s29 }
  0x6a   : > { %p4742_p13 = scmp.lt.s32.totalorder %s4740_s14, %s4733_s26 }
  0x6b   : > { %p4736_p6 = pnand %p4734_p9, %p4722_p4 }
  0x6c   : > { %p4743_p2 = por %p4742_p13, %p4741_p8 }
  0x6d   : > { %p4737_p3 = pneg %p4736_p6 }
  0x6f   : > { %p4744_p12 = pnand %p4743_p2, %p4737_p3 }
  0x71   : > { %4747 = shalt.err (!%p4744_p12)
}
  0x72   : > { %4504 = dma.hbm_to_vmem [thread:$0]  (!%p5658_p7), %s6753_s22, 16, %s731_s29, [#allocation29]  }
  0x73   : > { %s6754_s23 = sld [smem:[#allocation83_spill]] }
  0x79   : > { %s4748_s5 = scalar_lea.hbm %s6754_s23, 16 }
  0x7a   : > { %p4749_p6 = scmp.ne.s32.totalorder %s6754_s23, %s4748_s5  ;;  %p4755_p12 = scmp.lt.u32.totalorder %s4748_s5, %s6754_s23 }
  0x7c   : > { %p4751_p13 = pnand %p4749_p6, %p4722_p4 }
  0x7e   : > { %p4752_p3 = pneg %p4751_p13 }
  0x80   : > { %p4757_p8 = pnand %p4755_p12, %p4752_p3 }
  0x82   : > { %4760 = shalt.err (!%p4757_p8)
}
  0x83   : > { %s4761_s29 = scalar_lea.vmem %s5662_s1, 16  ;;  %s4768_s25 = scalar_lea.vmem %s5662_s1, 32 }
  0x84   : > { %p4762_p2 = scmp.ne.s32.totalorder %s5662_s1, %s4761_s29  ;;  %p4769_p0 = scmp.lt.s32.totalorder %s5662_s1, %s5662_s1 }
  0x85   : > { %p4770_p5 = scmp.lt.s32.totalorder %s4768_s25, %s4761_s29 }
  0x86   : > { %p4764_p1 = pnand %p4762_p2, %p4722_p4 }
  0x87   : > { %p4771_p10 = por %p4770_p5, %p4769_p0 }
  0x88   : > { %p4765_p11 = pneg %p4764_p1 }
  0x8a   : > { %p4772_p9 = pnand %p4771_p10, %p4765_p11 }
  0x8c   : > { %4775 = shalt.err (!%p4772_p9)
}
  0x8d   : > { %4507 = dma.hbm_to_vmem [thread:$0]  (!%p5658_p7), %s6754_s23, 16, %s5662_s1, [#allocation29]  }
  0x8e   : > { %p4021_p6 = scmp.ge.s32.totalorder %s5350_s3, 4 }
  0x8f   : > { %s5714_s28 = sand.u32 (!%p4021_p6), 1, %s5350_s3   ;;  %s5717_s21 = sand.u32 (!%p4021_p6), 1, %s5318_s27  }
  0x90   : > { %748 = sbr.rel (%p4021_p6) target bundleno = 550 (0x226), region = 28  ;;  %s5720_s5 = sshll.u32 (!%p4021_p6), %s5342_s7, 4 }
  0x91   : > { %s789_s18 = scalar_lea.vmem (!%p4021_p6), [#allocation7], %s5717_s21  ;;  %s6755_s14 = sld [smem:[#allocation64_spill]] (!%p4021_p6) }
  0x92   : > { %s796_s8 = sshll.u32 (!%p4021_p6), %s789_s18, 4  ;;  %p6756_p4 = scmp.ne.s32.totalorder (!%p4021_p6), %s6742_s16, 0  ;;  %s797_s8 = int_to_ptr.vmem [resolvable:$true] %s796_s8 }
  0x97   : > { %s5727_s29 = scalar_lea.hbm %s6755_s14, %s5720_s5  ;;  %s4780_s18 = scalar_lea.hbm %s6755_s14, 32 }
  0x98   : > { %s4776_s4 = scalar_lea.hbm %s5727_s29, 16  ;;  %p4781_p12 = scmp.lt.u32.totalorder %s5727_s29, %s6755_s14 }
  0x99   : > { %p4777_p7 = scmp.ne.s32.totalorder %s5727_s29, %s4776_s4  ;;  %p4782_p8 = scmp.lt.u32.totalorder %s4780_s18, %s4776_s4 }
  0x9a   : > { %p4784_p1 = scmp.lt.u32.totalorder %s4776_s4, %s5727_s29 }
  0x9b   : > { %p4778_p13 = pnand %p4777_p7, %p6756_p4  ;;  %p4783_p2 = por %p4782_p8, %p4781_p12 }
  0x9d   : > { %p4779_p3 = pneg %p4778_p13  ;;  %p4785_p11 = por %p4784_p1, %p4783_p2 }
  0x9f   : > { %p4786_p0 = pnand %p4785_p11, %p4779_p3 }
  0xa1   : > { %4789 = shalt.err (!%p4786_p0)
}
  0xa2   : > { %s4790_s26 = scalar_lea.vmem %s797_s8, 16  ;;  %s5354_s1 = smov [#allocation7]  }
  0xa3   : > { %p4791_p5 = scmp.ne.s32.totalorder %s797_s8, %s4790_s26  ;;  %s4794_s25 = sshll.u32 %s5354_s1, 4  ;;  %s4795_s25 = int_to_ptr.vmem [resolvable:$false] %s4794_s25 }
  0xa4   : > { %s4796_s22 = scalar_lea.vmem %s4795_s25, 32  ;;  %p4797_p6 = scmp.lt.s32.totalorder %s797_s8, %s4795_s25 }
  0xa5   : > { %p4792_p10 = pnand %p4791_p5, %p6756_p4  ;;  %p4798_p7 = scmp.lt.s32.totalorder %s4796_s22, %s4790_s26 }
  0xa7   : > { %p4793_p9 = pneg %p4792_p10  ;;  %p4799_p13 = por %p4798_p7, %p4797_p6 }
  0xa9   : > { %p4800_p8 = pnand %p4799_p13, %p4793_p9 }
  0xab   : > { %4803 = shalt.err (!%p4800_p8)
}
  0xac   : > { %s6757_s23 = scalar_lea.sflag [#allocation8], %s5714_s28  ;;  %s6758_s12 = sld [smem:[#allocation67_spill]] }
  0xad   : > { %4466 = dma.hbm_to_vmem [thread:$0]  (%p6756_p4), %s5727_s29, 16, %s797_s8, %s6757_s23  }
  0xae   : > { %s831_s25 = scalar_lea.vmem [#allocation10], %s5717_s21 }
  0xaf   : > { %s838_s26 = sshll.u32 %s831_s25, 4  ;;  %s839_s26 = int_to_ptr.vmem [resolvable:$true] %s838_s26 }
  0xb2   : > { %s5753_s18 = scalar_lea.hbm %s6758_s12, %s5720_s5  ;;  %s4808_s29 = scalar_lea.hbm %s6758_s12, 32 }
  0xb3   : > { %s4804_s22 = scalar_lea.hbm %s5753_s18, 16  ;;  %p4809_p1 = scmp.lt.u32.totalorder %s5753_s18, %s6758_s12 }
  0xb4   : > { %p4805_p3 = scmp.ne.s32.totalorder %s5753_s18, %s4804_s22  ;;  %p4810_p11 = scmp.lt.u32.totalorder %s4808_s29, %s4804_s22 }
  0xb5   : > { %p4812_p5 = scmp.lt.u32.totalorder %s4804_s22, %s5753_s18 }
  0xb6   : > { %p4806_p12 = pnand %p4805_p3, %p6756_p4  ;;  %p4811_p0 = por %p4810_p11, %p4809_p1 }
  0xb8   : > { %p4807_p2 = pneg %p4806_p12  ;;  %p4813_p10 = por %p4812_p5, %p4811_p0 }
  0xba   : > { %p4814_p9 = pnand %p4813_p10, %p4807_p2 }
  0xbc   : > { %4817 = shalt.err (!%p4814_p9)
}
  0xbd   : > { %s4818_s4 = scalar_lea.vmem %s839_s26, 16  ;;  %s5355_s25 = smov [#allocation10]  }
  0xbe   : > { %p4819_p6 = scmp.ne.s32.totalorder %s839_s26, %s4818_s4  ;;  %s4822_s1 = sshll.u32 %s5355_s25, 4  ;;  %s4823_s1 = int_to_ptr.vmem [resolvable:$false] %s4822_s1 }
  0xbf   : > { %s4824_s14 = scalar_lea.vmem %s4823_s1, 32  ;;  %p4825_p8 = scmp.lt.s32.totalorder %s839_s26, %s4823_s1 }
  0xc0   : > { %p4820_p7 = pnand %p4819_p6, %p6756_p4  ;;  %p4826_p3 = scmp.lt.s32.totalorder %s4824_s14, %s4818_s4 }
  0xc2   : > { %p4821_p13 = pneg %p4820_p7  ;;  %p4827_p12 = por %p4826_p3, %p4825_p8 }
  0xc4   : > { %p4828_p1 = pnand %p4827_p12, %p4821_p13 }
  0xc6   : > { %4831 = shalt.err (!%p4828_p1)
}
  0xc7   : > { %s6759_s22 = scalar_lea.sflag [#allocation11], %s5714_s28  ;;  %s6760_s10 = sld [smem:[#allocation70_spill]] }
  0xc8   : > { %4468 = dma.hbm_to_vmem [thread:$0]  (%p6756_p4), %s5753_s18, 16, %s839_s26, %s6759_s22  }
  0xc9   : > { %s873_s1 = scalar_lea.vmem [#allocation13], %s5717_s21 }
  0xca   : > { %s880_s27 = sshll.u32 %s873_s1, 4  ;;  %s881_s27 = int_to_ptr.vmem [resolvable:$true] %s880_s27 }
  0xcd   : > { %s5780_s23 = scalar_lea.hbm %s6760_s10, %s5720_s5  ;;  %s4836_s26 = scalar_lea.hbm %s6760_s10, 32 }
  0xce   : > { %s4832_s25 = scalar_lea.hbm %s5780_s23, 16  ;;  %p4837_p5 = scmp.lt.u32.totalorder %s5780_s23, %s6760_s10 }
  0xcf   : > { %p4833_p2 = scmp.ne.s32.totalorder %s5780_s23, %s4832_s25  ;;  %p4838_p10 = scmp.lt.u32.totalorder %s4836_s26, %s4832_s25 }
  0xd0   : > { %p4840_p6 = scmp.lt.u32.totalorder %s4832_s25, %s5780_s23 }
  0xd1   : > { %p4834_p11 = pnand %p4833_p2, %p6756_p4  ;;  %p4839_p9 = por %p4838_p10, %p4837_p5 }
  0xd3   : > { %p4835_p0 = pneg %p4834_p11  ;;  %p4841_p7 = por %p4840_p6, %p4839_p9 }
  0xd5   : > { %p4842_p13 = pnand %p4841_p7, %p4835_p0 }
  0xd7   : > { %4845 = shalt.err (!%p4842_p13)
}
  0xd8   : > { %s4846_s29 = scalar_lea.vmem %s881_s27, 16  ;;  %s5356_s1 = smov [#allocation13]  }
  0xd9   : > { %p4847_p8 = scmp.ne.s32.totalorder %s881_s27, %s4846_s29  ;;  %s4850_s4 = sshll.u32 %s5356_s1, 4  ;;  %s4851_s4 = int_to_ptr.vmem [resolvable:$false] %s4850_s4 }
  0xda   : > { %s4852_s14 = scalar_lea.vmem %s4851_s4, 32  ;;  %p4853_p1 = scmp.lt.s32.totalorder %s881_s27, %s4851_s4 }
  0xdb   : > { %p4848_p3 = pnand %p4847_p8, %p6756_p4  ;;  %p4854_p2 = scmp.lt.s32.totalorder %s4852_s14, %s4846_s29 }
  0xdd   : > { %p4849_p12 = pneg %p4848_p3  ;;  %p4855_p11 = por %p4854_p2, %p4853_p1 }
  0xdf   : > { %p4856_p5 = pnand %p4855_p11, %p4849_p12 }
  0xe1   : > { %4859 = shalt.err (!%p4856_p5)
}
  0xe2   : > { %s6761_s25 = scalar_lea.sflag [#allocation14], %s5714_s28  ;;  %s6762_s13 = sld [smem:[#allocation73_spill]] }
  0xe3   : > { %4470 = dma.hbm_to_vmem [thread:$0]  (%p6756_p4), %s5780_s23, 16, %s881_s27, %s6761_s25  }
  0xe4   : > { %s915_s4 = scalar_lea.vmem [#allocation16], %s5717_s21 }
  0xe5   : > { %s922_s8 = sshll.u32 %s915_s4, 4  ;;  %s923_s8 = int_to_ptr.vmem [resolvable:$true] %s922_s8 }
  0xe8   : > { %s5807_s22 = scalar_lea.hbm %s6762_s13, %s5720_s5  ;;  %s4864_s27 = scalar_lea.hbm %s6762_s13, 32 }
  0xe9   : > { %s4860_s1 = scalar_lea.hbm %s5807_s22, 16  ;;  %p4865_p6 = scmp.lt.u32.totalorder %s5807_s22, %s6762_s13 }
  0xea   : > { %p4861_p0 = scmp.ne.s32.totalorder %s5807_s22, %s4860_s1  ;;  %p4866_p7 = scmp.lt.u32.totalorder %s4864_s27, %s4860_s1 }
  0xeb   : > { %p4868_p8 = scmp.lt.u32.totalorder %s4860_s1, %s5807_s22 }
  0xec   : > { %p4862_p10 = pnand %p4861_p0, %p6756_p4  ;;  %p4867_p13 = por %p4866_p7, %p4865_p6 }
  0xee   : > { %p4863_p9 = pneg %p4862_p10  ;;  %p4869_p3 = por %p4868_p8, %p4867_p13 }
  0xf0   : > { %p4870_p12 = pnand %p4869_p3, %p4863_p9 }
  0xf2   : > { %4873 = shalt.err (!%p4870_p12)
}
  0xf3   : > { %s4874_s26 = scalar_lea.vmem %s923_s8, 16  ;;  %s5357_s4 = smov [#allocation16]  }
  0xf4   : > { %p4875_p1 = scmp.ne.s32.totalorder %s923_s8, %s4874_s26  ;;  %s4878_s29 = sshll.u32 %s5357_s4, 4  ;;  %s4879_s29 = int_to_ptr.vmem [resolvable:$false] %s4878_s29 }
  0xf5   : > { %s4880_s14 = scalar_lea.vmem %s4879_s29, 32  ;;  %p4881_p5 = scmp.lt.s32.totalorder %s923_s8, %s4879_s29 }
  0xf6   : > { %p4876_p2 = pnand %p4875_p1, %p6756_p4  ;;  %p4882_p0 = scmp.lt.s32.totalorder %s4880_s14, %s4874_s26 }
  0xf8   : > { %p4877_p11 = pneg %p4876_p2  ;;  %p4883_p10 = por %p4882_p0, %p4881_p5 }
  0xfa   : > { %p4884_p6 = pnand %p4883_p10, %p4877_p11 }
  0xfc   : > { %4887 = shalt.err (!%p4884_p6)
}
  0xfd   : > { %s6763_s1 = scalar_lea.sflag [#allocation17], %s5714_s28  ;;  %s6764_s15 = sld [smem:[#allocation75_spill]] }
  0xfe   : > { %4472 = dma.hbm_to_vmem [thread:$0]  (%p6756_p4), %s5807_s22, 16, %s923_s8, %s6763_s1  }
  0xff   : > { %s953_s29 = scalar_lea.vmem [#allocation19], %s5717_s21 }
 0x100   : > { %s960_s18 = sshll.u32 %s953_s29, 4  ;;  %s961_s18 = int_to_ptr.vmem [resolvable:$true] %s960_s18 }
 0x103   : > { %s5834_s25 = scalar_lea.hbm %s6764_s15, %s5720_s5  ;;  %s4892_s8 = scalar_lea.hbm %s6764_s15, 32 }
 0x104   : > { %s4888_s4 = scalar_lea.hbm %s5834_s25, 16  ;;  %p4893_p8 = scmp.lt.u32.totalorder %s5834_s25, %s6764_s15 }
 0x105   : > { %p4889_p9 = scmp.ne.s32.totalorder %s5834_s25, %s4888_s4  ;;  %p4894_p3 = scmp.lt.u32.totalorder %s4892_s8, %s4888_s4 }
 0x106   : > { %p4896_p1 = scmp.lt.u32.totalorder %s4888_s4, %s5834_s25 }
 0x107   : > { %p4890_p7 = pnand %p4889_p9, %p6756_p4  ;;  %p4895_p12 = por %p4894_p3, %p4893_p8 }
 0x109   : > { %p4891_p13 = pneg %p4890_p7  ;;  %p4897_p2 = por %p4896_p1, %p4895_p12 }
 0x10b   : > { %p4898_p11 = pnand %p4897_p2, %p4891_p13 }
 0x10d   : > { %4901 = shalt.err (!%p4898_p11)
}
 0x10e   : > { %s4902_s27 = scalar_lea.vmem %s961_s18, 16  ;;  %s5358_s29 = smov [#allocation19]  }
 0x10f   : > { %p4903_p5 = scmp.ne.s32.totalorder %s961_s18, %s4902_s27  ;;  %s4906_s26 = sshll.u32 %s5358_s29, 4  ;;  %s4907_s26 = int_to_ptr.vmem [resolvable:$false] %s4906_s26 }
 0x110   : > { %s4908_s14 = scalar_lea.vmem %s4907_s26, 32  ;;  %p4909_p6 = scmp.lt.s32.totalorder %s961_s18, %s4907_s26 }
 0x111   : > { %p4904_p0 = pnand %p4903_p5, %p6756_p4  ;;  %p4910_p9 = scmp.lt.s32.totalorder %s4908_s14, %s4902_s27 }
 0x113   : > { %p4905_p10 = pneg %p4904_p0  ;;  %p4911_p7 = por %p4910_p9, %p4909_p6 }
 0x115   : > { %p4912_p3 = pnand %p4911_p7, %p4905_p10 }
 0x117   : > { %4915 = shalt.err (!%p4912_p3)
}
 0x118   : > { %s6765_s4 = scalar_lea.sflag [#allocation20], %s5714_s28  ;;  %s6766_s17 = sld [smem:[#allocation77_spill]] }
 0x119   : > { %4474 = dma.hbm_to_vmem [thread:$0]  (%p6756_p4), %s5834_s25, 16, %s961_s18, %s6765_s4  }
 0x11a   : > { %s987_s26 = scalar_lea.vmem [#allocation22], %s5717_s21 }
 0x11b   : > { %s994_s23 = sshll.u32 %s987_s26, 4  ;;  %s995_s23 = int_to_ptr.vmem [resolvable:$true] %s994_s23 }
 0x11e   : > { %s5861_s1 = scalar_lea.hbm %s6766_s17, %s5720_s5  ;;  %s4920_s18 = scalar_lea.hbm %s6766_s17, 32 }
 0x11f   : > { %s4916_s29 = scalar_lea.hbm %s5861_s1, 16  ;;  %p4921_p1 = scmp.lt.u32.totalorder %s5861_s1, %s6766_s17 }
 0x120   : > { %p4917_p13 = scmp.ne.s32.totalorder %s5861_s1, %s4916_s29  ;;  %p4922_p2 = scmp.lt.u32.totalorder %s4920_s18, %s4916_s29 }
 0x121   : > { %p4924_p5 = scmp.lt.u32.totalorder %s4916_s29, %s5861_s1 }
 0x122   : > { %p4918_p8 = pnand %p4917_p13, %p6756_p4  ;;  %p4923_p11 = por %p4922_p2, %p4921_p1 }
 0x124   : > { %p4919_p12 = pneg %p4918_p8  ;;  %p4925_p0 = por %p4924_p5, %p4923_p11 }
 0x126   : > { %p4926_p10 = pnand %p4925_p0, %p4919_p12 }
 0x128   : > { %4929 = shalt.err (!%p4926_p10)
}
 0x129   : > { %s4930_s8 = scalar_lea.vmem %s995_s23, 16  ;;  %s5359_s26 = smov [#allocation22]  }
 0x12a   : > { %p4931_p6 = scmp.ne.s32.totalorder %s995_s23, %s4930_s8  ;;  %s4934_s27 = sshll.u32 %s5359_s26, 4  ;;  %s4935_s27 = int_to_ptr.vmem [resolvable:$false] %s4934_s27 }
 0x12b   : > { %s4936_s14 = scalar_lea.vmem %s4935_s27, 32  ;;  %p4937_p3 = scmp.lt.s32.totalorder %s995_s23, %s4935_s27 }
 0x12c   : > { %p4932_p9 = pnand %p4931_p6, %p6756_p4  ;;  %p4938_p13 = scmp.lt.s32.totalorder %s4936_s14, %s4930_s8 }
 0x12e   : > { %p4933_p7 = pneg %p4932_p9  ;;  %p4939_p8 = por %p4938_p13, %p4937_p3 }
 0x130   : > { %p4940_p1 = pnand %p4939_p8, %p4933_p7 }
 0x132   : > { %4943 = shalt.err (!%p4940_p1)
}
 0x133   : > { %s6767_s29 = scalar_lea.sflag [#allocation23], %s5714_s28  ;;  %s6768_s19 = sld [smem:[#allocation79_spill]] }
 0x134   : > { %4476 = dma.hbm_to_vmem [thread:$0]  (%p6756_p4), %s5861_s1, 16, %s995_s23, %s6767_s29  }
 0x135   : > { %s1025_s27 = scalar_lea.vmem [#allocation25], %s5717_s21 }
 0x136   : > { %s1032_s22 = sshll.u32 %s1025_s27, 4  ;;  %s1033_s22 = int_to_ptr.vmem [resolvable:$true] %s1032_s22 }
 0x139   : > { %s5888_s4 = scalar_lea.hbm %s6768_s19, %s5720_s5  ;;  %s4948_s29 = scalar_lea.hbm %s6768_s19, 32 }
 0x13a   : > { %s4944_s14 = scalar_lea.hbm %s5888_s4, 16  ;;  %p4949_p5 = scmp.lt.u32.totalorder %s5888_s4, %s6768_s19 }
 0x13b   : > { %p4945_p12 = scmp.ne.s32.totalorder %s5888_s4, %s4944_s14  ;;  %p4950_p0 = scmp.lt.u32.totalorder %s4948_s29, %s4944_s14 }
 0x13c   : > { %p4952_p6 = scmp.lt.u32.totalorder %s4944_s14, %s5888_s4 }
 0x13d   : > { %p4946_p2 = pnand %p4945_p12, %p6756_p4  ;;  %p4951_p10 = por %p4950_p0, %p4949_p5 }
 0x13f   : > { %p4947_p11 = pneg %p4946_p2  ;;  %p4953_p9 = por %p4952_p6, %p4951_p10 }
 0x141   : > { %p4954_p7 = pnand %p4953_p9, %p4947_p11 }
 0x143   : > { %4957 = shalt.err (!%p4954_p7)
}
 0x144   : > { %s4958_s27 = scalar_lea.vmem %s1033_s22, 16  ;;  %s5360_s8 = smov [#allocation25]  }
 0x145   : > { %p4959_p3 = scmp.ne.s32.totalorder %s1033_s22, %s4958_s27  ;;  %s4962_s26 = sshll.u32 %s5360_s8, 4  ;;  %s4963_s26 = int_to_ptr.vmem [resolvable:$false] %s4962_s26 }
 0x146   : > { %s4964_s1 = scalar_lea.vmem %s4963_s26, 32  ;;  %p4965_p1 = scmp.lt.s32.totalorder %s1033_s22, %s4963_s26 }
 0x147   : > { %p4960_p13 = pnand %p4959_p3, %p6756_p4  ;;  %p4966_p12 = scmp.lt.s32.totalorder %s4964_s1, %s4958_s27 }
 0x149   : > { %p4961_p8 = pneg %p4960_p13  ;;  %p4967_p2 = por %p4966_p12, %p4965_p1 }
 0x14b   : > { %p4968_p0 = pnand %p4967_p2, %p4961_p8 }
 0x14d   : > { %4971 = shalt.err (!%p4968_p0)
}
 0x14e   : > { %s6769_s14 = scalar_lea.sflag [#allocation26], %s5714_s28  ;;  %s6770_s23 = sand.u32 1, %s5330_s2  }
 0x14f   : > { %4478 = dma.hbm_to_vmem [thread:$0]  (%p6756_p4), %s5888_s4, 16, %s1033_s22, %s6769_s14  }
 0x150   : > { %s4022_s29 = sshll.u32 %s6770_s23, 4  ;;  %s4115_s8 = sshll.u32 %s5346_s30, 8 }
 0x151   : > { %s6771_s26 = sld [smem:[#allocation61_spill]]  ;;  %s763_s1 = scalar_lea.vmem [#allocation4], %s4022_s29 }
 0x152   : > { %s770_s12 = sshll.u32 %s763_s1, 4  ;;  %s6773_s13 = smov %s6770_s23  ;;  %s5920_s12 = int_to_ptr.vmem [resolvable:$true] %s770_s12 }
 0x153   : > { %s5924_s15 = scalar_lea.sflag [#allocation5], %s6773_s13  ;;  %p6774_p5 = scmp.ne.s32.totalorder %s6737_s20, 0 }
 0x157   : > { %s6772_s10 = smov %s6771_s26  ;;  %s5918_s27 = scalar_lea.hbm %s6771_s26, %s4115_s8 }
 0x158   : > { %s4972_s4 = scalar_lea.hbm %s5918_s27, 256  ;;  %s4976_s23 = scalar_lea.hbm %s6772_s10, 512 }
 0x159   : > { %p4973_p11 = scmp.ne.s32.totalorder %s5918_s27, %s4972_s4  ;;  %p4977_p9 = scmp.lt.u32.totalorder %s5918_s27, %s6772_s10 }
 0x15a   : > { %p4978_p7 = scmp.lt.u32.totalorder %s4976_s23, %s4972_s4  ;;  %p4980_p13 = scmp.lt.u32.totalorder %s4972_s4, %s5918_s27 }
 0x15b   : > { %p4974_p10 = pnand %p4973_p11, %p6774_p5 }
 0x15c   : > { %p4979_p3 = por %p4978_p7, %p4977_p9 }
 0x15d   : > { %p4975_p6 = pneg %p4974_p10 }
 0x15e   : > { %p4981_p8 = por %p4980_p13, %p4979_p3 }
 0x160   : > { %p4982_p1 = pnand %p4981_p8, %p4975_p6 }
 0x162   : > { %4985 = shalt.err (!%p4982_p1)
}
 0x163   : > { %s4986_s13 = scalar_lea.vmem %s5920_s12, 256  ;;  %s5361_s29 = smov [#allocation4]  }
 0x164   : > { %p4987_p12 = scmp.ne.s32.totalorder %s5920_s12, %s4986_s13  ;;  %s4990_s18 = sshll.u32 %s5361_s29, 4  ;;  %s4991_s18 = int_to_ptr.vmem [resolvable:$false] %s4990_s18 }
 0x165   : > { %s4992_s26 = scalar_lea.vmem %s4991_s18, 512  ;;  %p4993_p11 = scmp.lt.s32.totalorder %s5920_s12, %s4991_s18 }
 0x166   : > { %p4988_p2 = pnand %p4987_p12, %p6774_p5  ;;  %p4994_p10 = scmp.lt.s32.totalorder %s4992_s26, %s4986_s13 }
 0x168   : > { %p4989_p0 = pneg %p4988_p2  ;;  %p4995_p9 = por %p4994_p10, %p4993_p11 }
 0x16a   : > { %p4996_p7 = pnand %p4995_p9, %p4989_p0 }
 0x16c   : > { %4999 = shalt.err (!%p4996_p7)
}
 0x16d   : > { %s6683_s1 = smov 128   ;;  %s6685_s4 = smov 8  }
 0x16e   : > { %4465 = dma.hbm_to_vmem [thread:$0]  (%p6774_p5), %s5918_s27, 256, %s5920_s12, %s5924_s15, %s6683_s1, %s6683_s1, %s6685_s4  }
 0x16f   : > { %s6775_s23 = sld [smem:[#allocation65_spill]]  ;;  %s806_s25 = scalar_lea.vmem [#allocation9], %s5717_s21 }
 0x170   : > { %s813_s13 = sshll.u32 %s806_s25, 4  ;;  %s6776_s9 = sld [smem:[#allocation69_spill]]  ;;  %s814_s13 = int_to_ptr.vmem [resolvable:$true] %s813_s13 }
 0x175   : > { %s5955_s8 = scalar_lea.hbm %s6775_s23, %s5720_s5  ;;  %s5004_s27 = scalar_lea.hbm %s6775_s23, 32 }
 0x176   : > { %s5962_s20 = scalar_lea.hbm %s6776_s9, %s5720_s5  ;;  %s5000_s26 = scalar_lea.hbm %s5955_s8, 16 }
 0x177   : > { %p5001_p6 = scmp.ne.s32.totalorder %s5955_s8, %s5000_s26  ;;  %p5005_p13 = scmp.lt.u32.totalorder %s5955_s8, %s6775_s23 }
 0x178   : > { %p5006_p8 = scmp.lt.u32.totalorder %s5004_s27, %s5000_s26  ;;  %p5008_p12 = scmp.lt.u32.totalorder %s5000_s26, %s5955_s8 }
 0x179   : > { %p5002_p5 = pnand %p5001_p6, %p6756_p4 }
 0x17a   : > { %p5007_p1 = por %p5006_p8, %p5005_p13 }
 0x17b   : > { %p5003_p3 = pneg %p5002_p5 }
 0x17c   : > { %p5009_p2 = por %p5008_p12, %p5007_p1 }
 0x17e   : > { %p5010_p0 = pnand %p5009_p2, %p5003_p3 }
 0x180   : > { %5013 = shalt.err (!%p5010_p0)
}
 0x181   : > { %s5014_s25 = scalar_lea.vmem %s814_s13, 16  ;;  %s5364_s29 = smov [#allocation9]  }
 0x182   : > { %p5015_p11 = scmp.ne.s32.totalorder %s814_s13, %s5014_s25  ;;  %s5018_s18 = sshll.u32 %s5364_s29, 4  ;;  %s5019_s18 = int_to_ptr.vmem [resolvable:$false] %s5018_s18 }
 0x183   : > { %s5020_s15 = scalar_lea.vmem %s5019_s18, 32  ;;  %p5021_p7 = scmp.lt.s32.totalorder %s814_s13, %s5019_s18 }
 0x184   : > { %p5016_p10 = pnand %p5015_p11, %p6756_p4  ;;  %p5022_p6 = scmp.lt.s32.totalorder %s5020_s15, %s5014_s25 }
 0x186   : > { %p5017_p9 = pneg %p5016_p10  ;;  %p5023_p5 = por %p5022_p6, %p5021_p7 }
 0x188   : > { %p5024_p8 = pnand %p5023_p5, %p5017_p9 }
 0x18a   : > { %5027 = shalt.err (!%p5024_p8)
}
 0x18b   : > { %s6777_s26 = scalar_lea.sflag [#allocation8], %s5714_s28  ;;  %s856_s12 = scalar_lea.vmem [#allocation12], %s5717_s21 }
 0x18c   : > { %4467 = dma.hbm_to_vmem [thread:$0]  (%p6756_p4), %s5955_s8, 16, %s814_s13, %s6777_s26  }
 0x18d   : > { %s863_s27 = sshll.u32 %s856_s12, 4  ;;  %s6778_s11 = sld [smem:[#allocation71_spill]]  ;;  %s864_s27 = int_to_ptr.vmem [resolvable:$true] %s863_s27 }
 0x18e   : > { %s5028_s29 = scalar_lea.hbm %s5962_s20, 16  ;;  %s5032_s1 = scalar_lea.hbm %s6776_s9, 32 }
 0x18f   : > { %p5029_p3 = scmp.ne.s32.totalorder %s5962_s20, %s5028_s29  ;;  %p5033_p12 = scmp.lt.u32.totalorder %s5962_s20, %s6776_s9 }
 0x190   : > { %p5034_p2 = scmp.lt.u32.totalorder %s5032_s1, %s5028_s29  ;;  %p5036_p11 = scmp.lt.u32.totalorder %s5028_s29, %s5962_s20 }
 0x191   : > { %p5030_p13 = pnand %p5029_p3, %p6756_p4 }
 0x192   : > { %p5035_p0 = por %p5034_p2, %p5033_p12 }
 0x193   : > { %s5988_s25 = scalar_lea.hbm %s6778_s11, %s5720_s5  ;;  %p5031_p1 = pneg %p5030_p13 }
 0x194   : > { %p5037_p10 = por %p5036_p11, %p5035_p0 }
 0x196   : > { %p5038_p9 = pnand %p5037_p10, %p5031_p1 }
 0x198   : > { %5041 = shalt.err (!%p5038_p9)
}
 0x199   : > { %s5042_s8 = scalar_lea.vmem %s864_s27, 16  ;;  %s5365_s13 = smov [#allocation12]  }
 0x19a   : > { %p5043_p7 = scmp.ne.s32.totalorder %s864_s27, %s5042_s8  ;;  %s5046_s26 = sshll.u32 %s5365_s13, 4  ;;  %s5047_s26 = int_to_ptr.vmem [resolvable:$false] %s5046_s26 }
 0x19b   : > { %s5048_s12 = scalar_lea.vmem %s5047_s26, 32  ;;  %p5049_p8 = scmp.lt.s32.totalorder %s864_s27, %s5047_s26 }
 0x19c   : > { %p5044_p6 = pnand %p5043_p7, %p6756_p4  ;;  %p5050_p3 = scmp.lt.s32.totalorder %s5048_s12, %s5042_s8 }
 0x19e   : > { %p5045_p5 = pneg %p5044_p6  ;;  %p5051_p13 = por %p5050_p3, %p5049_p8 }
 0x1a0   : > { %p5052_p2 = pnand %p5051_p13, %p5045_p5 }
 0x1a2   : > { %5055 = shalt.err (!%p5052_p2)
}
 0x1a3   : > { %s6779_s10 = scalar_lea.sflag [#allocation11], %s5714_s28  ;;  %s890_s1 = scalar_lea.vmem [#allocation15], %s5717_s21 }
 0x1a4   : > { %4469 = dma.hbm_to_vmem [thread:$0]  (%p6756_p4), %s5962_s20, 16, %s864_s27, %s6779_s10  }
 0x1a5   : > { %s897_s4 = sshll.u32 %s890_s1, 4  ;;  %s6688_s22 = sshll.u32 %s5717_s21, 5  ;;  %s898_s4 = int_to_ptr.vmem [resolvable:$true] %s897_s4 }
 0x1a6   : > { %s5056_s14 = scalar_lea.hbm %s5988_s25, 16  ;;  %s5060_s15 = scalar_lea.hbm %s6778_s11, 32 }
 0x1a7   : > { %p5057_p1 = scmp.ne.s32.totalorder %s5988_s25, %s5056_s14  ;;  %p5061_p11 = scmp.lt.u32.totalorder %s5988_s25, %s6778_s11 }
 0x1a8   : > { %p5062_p10 = scmp.lt.u32.totalorder %s5060_s15, %s5056_s14  ;;  %p5064_p7 = scmp.lt.u32.totalorder %s5056_s14, %s5988_s25 }
 0x1a9   : > { %p5058_p12 = pnand %p5057_p1, %p6756_p4 }
 0x1aa   : > { %p5063_p9 = por %p5062_p10, %p5061_p11 }
 0x1ab   : > { %p5059_p0 = pneg %p5058_p12 }
 0x1ac   : > { %p5065_p6 = por %p5064_p7, %p5063_p9 }
 0x1ae   : > { %p5066_p5 = pnand %p5065_p6, %p5059_p0 }
 0x1b0   : > { %5069 = shalt.err (!%p5066_p5)
}
 0x1b1   : > { %s5070_s20 = scalar_lea.vmem %s898_s4, 16  ;;  %s5366_s27 = smov [#allocation15]  }
 0x1b2   : > { %p5071_p8 = scmp.ne.s32.totalorder %s898_s4, %s5070_s20  ;;  %s5074_s26 = sshll.u32 %s5366_s27, 4  ;;  %s5075_s26 = int_to_ptr.vmem [resolvable:$false] %s5074_s26 }
 0x1b3   : > { %s5076_s12 = scalar_lea.vmem %s5075_s26, 32  ;;  %p5077_p2 = scmp.lt.s32.totalorder %s898_s4, %s5075_s26 }
 0x1b4   : > { %p5072_p3 = pnand %p5071_p8, %p6756_p4  ;;  %p5078_p1 = scmp.lt.s32.totalorder %s5076_s12, %s5070_s20 }
 0x1b6   : > { %p5073_p13 = pneg %p5072_p3  ;;  %p5079_p12 = por %p5078_p1, %p5077_p2 }
 0x1b8   : > { %p5080_p10 = pnand %p5079_p12, %p5073_p13 }
 0x1ba   : > { %5083 = shalt.err (!%p5080_p10)
}
 0x1bb   : > { %s6780_s10 = scalar_lea.sflag [#allocation14], %s5714_s28  ;;  %s4116_s1 = sshll.u32 %s5342_s7, 9 }
 0x1bc   : > { %4471 = dma.hbm_to_vmem [thread:$0]  (%p6756_p4), %s5988_s25, 16, %s898_s4, %s6780_s10  }
 0x1bd   : > { %s933_s14 = scalar_lea.vmem [#allocation18], %s6688_s22  ;;  %s6781_s8 = sld [smem:[#allocation74_spill]] }
 0x1be   : > { %s940_s29 = sshll.u32 %s933_s14, 4  ;;  %s6040_s29 = int_to_ptr.vmem [resolvable:$true] %s940_s29 }
 0x1c3   : > { %s6038_s13 = scalar_lea.hbm %s6781_s8, %s4116_s1  ;;  %s5088_s27 = scalar_lea.hbm %s6781_s8, 1024 }
 0x1c4   : > { %s5084_s20 = scalar_lea.hbm %s6038_s13, 512  ;;  %p5089_p7 = scmp.lt.u32.totalorder %s6038_s13, %s6781_s8 }
 0x1c5   : > { %p5085_p0 = scmp.ne.s32.totalorder %s6038_s13, %s5084_s20  ;;  %p5090_p6 = scmp.lt.u32.totalorder %s5088_s27, %s5084_s20 }
 0x1c6   : > { %p5092_p8 = scmp.lt.u32.totalorder %s5084_s20, %s6038_s13 }
 0x1c7   : > { %p5086_p11 = pnand %p5085_p0, %p6756_p4  ;;  %p5091_p5 = por %p5090_p6, %p5089_p7 }
 0x1c9   : > { %p5087_p9 = pneg %p5086_p11  ;;  %p5093_p3 = por %p5092_p8, %p5091_p5 }
 0x1cb   : > { %p5094_p13 = pnand %p5093_p3, %p5087_p9 }
 0x1cd   : > { %5097 = shalt.err (!%p5094_p13)
}
 0x1ce   : > { %s5098_s10 = scalar_lea.vmem %s6040_s29, 512  ;;  %s5367_s14 = smov [#allocation18]  }
 0x1cf   : > { %p5099_p2 = scmp.ne.s32.totalorder %s6040_s29, %s5098_s10  ;;  %s5102_s18 = sshll.u32 %s5367_s14, 4  ;;  %s5103_s18 = int_to_ptr.vmem [resolvable:$false] %s5102_s18 }
 0x1d0   : > { %s5104_s15 = scalar_lea.vmem %s5103_s18, 1024  ;;  %p5105_p10 = scmp.lt.s32.totalorder %s6040_s29, %s5103_s18 }
 0x1d1   : > { %p5100_p1 = pnand %p5099_p2, %p6756_p4  ;;  %p5106_p0 = scmp.lt.s32.totalorder %s5104_s15, %s5098_s10 }
 0x1d3   : > { %p5101_p12 = pneg %p5100_p1  ;;  %p5107_p11 = por %p5106_p0, %p5105_p10 }
 0x1d5   : > { %p5108_p7 = pnand %p5107_p11, %p5101_p12 }
 0x1d7   : > { %5111 = shalt.err (!%p5108_p7)
}
 0x1d8   : > { %s6782_s20 = smov 8   ;;  %s6783_s25 = smov 128  }
 0x1d9   : > { %s6784_s4 = scalar_lea.sflag [#allocation17], %s5714_s28  ;;  %s6785_s12 = sld [smem:[#allocation76_spill]] }
 0x1da   : > { %4473 = dma.hbm_to_vmem [thread:$0]  (%p6756_p4), %s6038_s13, 512, %s6040_s29, %s6784_s4, %s6783_s25, %s6783_s25, %s6782_s20  }
 0x1db   : > { %s970_s14 = scalar_lea.vmem [#allocation21], %s5717_s21  ;;  %s6786_s8 = sld [smem:[#allocation78_spill]] }
 0x1dc   : > { %s977_s18 = sshll.u32 %s970_s14, 4  ;;  %s978_s18 = int_to_ptr.vmem [resolvable:$true] %s977_s18 }
 0x1df   : > { %s6072_s10 = scalar_lea.hbm %s6785_s12, %s5720_s5  ;;  %s5116_s4 = scalar_lea.hbm %s6785_s12, 32 }
 0x1e0   : > { %s5112_s11 = scalar_lea.hbm %s6072_s10, 16  ;;  %p5117_p8 = scmp.lt.u32.totalorder %s6072_s10, %s6785_s12 }
 0x1e1   : > { %s6080_s9 = scalar_lea.hbm %s6786_s8, %s4116_s1  ;;  %p5113_p9 = scmp.ne.s32.totalorder %s6072_s10, %s5112_s11 }
 0x1e2   : > { %p5118_p3 = scmp.lt.u32.totalorder %s5116_s4, %s5112_s11  ;;  %p5120_p2 = scmp.lt.u32.totalorder %s5112_s11, %s6072_s10 }
 0x1e3   : > { %p5114_p6 = pnand %p5113_p9, %p6756_p4 }
 0x1e4   : > { %p5119_p13 = por %p5118_p3, %p5117_p8 }
 0x1e5   : > { %p5115_p5 = pneg %p5114_p6 }
 0x1e6   : > { %p5121_p1 = por %p5120_p2, %p5119_p13 }
 0x1e8   : > { %p5122_p12 = pnand %p5121_p1, %p5115_p5 }
 0x1ea   : > { %5125 = shalt.err (!%p5122_p12)
}
 0x1eb   : > { %s5126_s22 = scalar_lea.vmem %s978_s18, 16  ;;  %s5368_s1 = smov [#allocation21]  }
 0x1ec   : > { %p5127_p10 = scmp.ne.s32.totalorder %s978_s18, %s5126_s22  ;;  %s5130_s14 = sshll.u32 %s5368_s1, 4  ;;  %s5131_s14 = int_to_ptr.vmem [resolvable:$false] %s5130_s14 }
 0x1ed   : > { %s5132_s15 = scalar_lea.vmem %s5131_s14, 32  ;;  %p5133_p7 = scmp.lt.s32.totalorder %s978_s18, %s5131_s14 }
 0x1ee   : > { %p5128_p0 = pnand %p5127_p10, %p6756_p4  ;;  %p5134_p9 = scmp.lt.s32.totalorder %s5132_s15, %s5126_s22 }
 0x1f0   : > { %p5129_p11 = pneg %p5128_p0  ;;  %p5135_p6 = por %p5134_p9, %p5133_p7 }
 0x1f2   : > { %p5136_p3 = pnand %p5135_p6, %p5129_p11 }
 0x1f4   : > { %5139 = shalt.err (!%p5136_p3)
}
 0x1f5   : > { %s6787_s11 = scalar_lea.sflag [#allocation20], %s5714_s28  ;;  %s6788_s29 = sshll.u32 %s5717_s21, 5 }
 0x1f6   : > { %4475 = dma.hbm_to_vmem [thread:$0]  (%p6756_p4), %s6072_s10, 16, %s978_s18, %s6787_s11  }
 0x1f7   : > { %s1005_s13 = scalar_lea.vmem [#allocation24], %s6788_s29  ;;  %s6789_s22 = sld [smem:[#allocation81_spill]] }
 0x1f8   : > { %s1012_s4 = sshll.u32 %s1005_s13, 4  ;;  %s5140_s14 = scalar_lea.hbm %s6080_s9, 512  ;;  %s6103_s4 = int_to_ptr.vmem [resolvable:$true] %s1012_s4 }
 0x1f9   : > { %p5141_p5 = scmp.ne.s32.totalorder %s6080_s9, %s5140_s14  ;;  %s5144_s17 = scalar_lea.hbm %s6786_s8, 1024 }
 0x1fa   : > { %p5145_p2 = scmp.lt.u32.totalorder %s6080_s9, %s6786_s8  ;;  %p5146_p1 = scmp.lt.u32.totalorder %s5144_s17, %s5140_s14 }
 0x1fb   : > { %p5142_p8 = pnand %p5141_p5, %p6756_p4  ;;  %p5148_p10 = scmp.lt.u32.totalorder %s5140_s14, %s6080_s9 }
 0x1fc   : > { %p5147_p12 = por %p5146_p1, %p5145_p2 }
 0x1fd   : > { %s6109_s1 = scalar_lea.hbm %s6789_s22, %s5720_s5  ;;  %p5143_p13 = pneg %p5142_p8 }
 0x1fe   : > { %p5149_p0 = por %p5148_p10, %p5147_p12 }
 0x200   : > { %p5150_p11 = pnand %p5149_p0, %p5143_p13 }
 0x202   : > { %5153 = shalt.err (!%p5150_p11)
}
 0x203   : > { %s5154_s5 = scalar_lea.vmem %s6103_s4, 512  ;;  %s5369_s12 = smov [#allocation24]  }
 0x204   : > { %p5155_p7 = scmp.ne.s32.totalorder %s6103_s4, %s5154_s5  ;;  %s5158_s11 = sshll.u32 %s5369_s12, 4  ;;  %s5159_s11 = int_to_ptr.vmem [resolvable:$false] %s5158_s11 }
 0x205   : > { %s5160_s29 = scalar_lea.vmem %s5159_s11, 1024  ;;  %p5161_p3 = scmp.lt.s32.totalorder %s6103_s4, %s5159_s11 }
 0x206   : > { %p5156_p9 = pnand %p5155_p7, %p6756_p4  ;;  %p5162_p5 = scmp.lt.s32.totalorder %s5160_s29, %s5154_s5 }
 0x208   : > { %p5157_p6 = pneg %p5156_p9  ;;  %p5163_p8 = por %p5162_p5, %p5161_p3 }
 0x20a   : > { %p5164_p2 = pnand %p5163_p8, %p5157_p6 }
 0x20c   : > { %5167 = shalt.err (!%p5164_p2)
}
 0x20d   : > { %s6790_s17 = scalar_lea.sflag [#allocation23], %s5714_s28  ;;  %s1050_s13 = scalar_lea.vmem [#allocation27], %s5717_s21 }
 0x20e   : > { %4477 = dma.hbm_to_vmem [thread:$0]  (%p6756_p4), %s6080_s9, 512, %s6103_s4, %s6790_s17, %s6783_s25, %s6783_s25, %s6782_s20  }
 0x20f   : > { %s1057_s27 = sshll.u32 %s1050_s13, 4  ;;  %s5168_s26 = scalar_lea.hbm %s6109_s1, 16  ;;  %s1058_s27 = int_to_ptr.vmem [resolvable:$true] %s1057_s27 }
 0x210   : > { %p5169_p13 = scmp.ne.s32.totalorder %s6109_s1, %s5168_s26  ;;  %s5172_s10 = scalar_lea.hbm %s6789_s22, 32 }
 0x211   : > { %p5173_p10 = scmp.lt.u32.totalorder %s6109_s1, %s6789_s22  ;;  %p5174_p0 = scmp.lt.u32.totalorder %s5172_s10, %s5168_s26 }
 0x212   : > { %p5170_p1 = pnand %p5169_p13, %p6756_p4  ;;  %p5176_p7 = scmp.lt.u32.totalorder %s5168_s26, %s6109_s1 }
 0x213   : > { %p5175_p11 = por %p5174_p0, %p5173_p10 }
 0x214   : > { %p5171_p12 = pneg %p5170_p1 }
 0x215   : > { %p5177_p9 = por %p5176_p7, %p5175_p11 }
 0x217   : > { %p5178_p6 = pnand %p5177_p9, %p5171_p12 }
 0x219   : > { %5181 = shalt.err (!%p5178_p6)
}
 0x21a   : > { %s5182_s9 = scalar_lea.vmem %s1058_s27, 16  ;;  %s5370_s21 = smov [#allocation27]  }
 0x21b   : > { %p5183_p3 = scmp.ne.s32.totalorder %s1058_s27, %s5182_s9  ;;  %s5186_s20 = sshll.u32 %s5370_s21, 4  ;;  %s5187_s20 = int_to_ptr.vmem [resolvable:$false] %s5186_s20 }
 0x21c   : > { %s5188_s25 = scalar_lea.vmem %s5187_s20, 32  ;;  %p5189_p2 = scmp.lt.s32.totalorder %s1058_s27, %s5187_s20 }
 0x21d   : > { %p5184_p5 = pnand %p5183_p3, %p6756_p4  ;;  %p5190_p13 = scmp.lt.s32.totalorder %s5188_s25, %s5182_s9 }
 0x21f   : > { %p5185_p8 = pneg %p5184_p5  ;;  %p5191_p1 = por %p5190_p13, %p5189_p2 }
 0x221   : > { %p5192_p0 = pnand %p5191_p1, %p5185_p8 }
 0x223   : > { %5195 = shalt.err (!%p5192_p0)
}
 0x224   : > { %s6791_s4 = scalar_lea.sflag [#allocation26], %s5714_s28 }
 0x225   : > { %4479 = dma.hbm_to_vmem [thread:$0]  (%p6756_p4), %s6109_s1, 16, %s1058_s27, %s6791_s4  }
 0x226 PF: > { %p6792_p12 = scmp.ne.s32.totalorder %s6751_s24, 0 }
 0x227   : > { %s6160_s12 = sand.u32 (!%p6792_p12), 1, %s5326_s6   ;;  %p6793_p10 = scmp.ne.s32.totalorder (!%p6792_p12), %s6739_s0, 0 }
 0x228   : > { %1066 = sbr.rel (%p6792_p12) target bundleno = 6296 (0x1898), region = 116  ;;  %s4044_s11 = sshll.u32 (!%p6792_p12), %s6160_s12, 4 }
 0x229   : > { %s1069_s29 = scalar_lea.sflag (!%p6792_p12), [#allocation5], %s6160_s12  ;;  %s6164_s17 = scalar_lea.vmem (!%p6792_p12), [#allocation4], %s4044_s11 }
 0x22f   : > { %5269 = dma.done.wait (%p6793_p10), %s1069_s29, 256  }
 0x230   : > { %5271 = vsyncadd (%p6793_p10), %s1069_s29, 4294967040  ;;  %s6794_s16 = sld [smem:[#allocation52_spill]]  ;;  %s6795_s28 = sld [smem:[#allocation42_spill]] }
 0x231   : > { %s6796_s1 = sld [smem:[#allocation57_spill]] }
 0x236   : > { %s6171_s24 = sand.u32 1, %s6794_s16   ;;  %s6174_s13 = sand.u32 1, %s6795_s28  }
 0x237   : > { %s1078_s27 = scalar_lea.sflag [#allocation8], %s6171_s24  ;;  %p6797_p4 = scmp.ne.s32.totalorder %s6796_s1, 0 }
 0x239   : > { %5273 = dma.done.wait (%p6797_p4), %s1078_s27, 32  }
 0x23a   : > { %5275 = vsyncadd (%p6797_p4), %s1078_s27, 4294967264  ;;  %s1094_s14 = scalar_lea.sflag [#allocation11], %s6171_s24 }
 0x23b   : > { %5277 = dma.done.wait (%p6797_p4), %s1094_s14, 32  }
 0x23c   : > { %5279 = vsyncadd (%p6797_p4), %s1094_s14, 4294967264  ;;  %s1110_s18 = scalar_lea.sflag [#allocation14], %s6171_s24 }
 0x23d   : > { %5281 = dma.done.wait (%p6797_p4), %s1110_s18, 32  }
 0x23e   : > { %5283 = vsyncadd (%p6797_p4), %s1110_s18, 4294967264  ;;  %s1126_s21 = scalar_lea.sflag [#allocation17], %s6171_s24 }
 0x23f   : > { %5285 = dma.done.wait (%p6797_p4), %s1126_s21, 528  }
 0x240   : > { %5287 = vsyncadd (%p6797_p4), %s1126_s21, 4294966768  ;;  %s4045_s25 = sshll.u32 %s6174_s13, 5  ;;  %s1143_s11 = scalar_lea.sflag [#allocation20], %s6171_s24 }
 0x241   : > { %s6204_s4 = scalar_lea.vmem [#allocation18], %s4045_s25 }
 0x242   : > { %5289 = dma.done.wait (%p6797_p4), %s1143_s11, 32  }
 0x243   : > { %5291 = vsyncadd (%p6797_p4), %s1143_s11, 4294967264  ;;  %s1159_s27 = scalar_lea.sflag [#allocation23], %s6171_s24 }
 0x244   : > { %5293 = dma.done.wait (%p6797_p4), %s1159_s27, 528  }
 0x245   : > { %5295 = vsyncadd (%p6797_p4), %s1159_s27, 4294966768  ;;  %s6219_s18 = scalar_lea.vmem [#allocation24], %s4045_s25  ;;  %s1176_s21 = scalar_lea.sflag [#allocation26], %s6171_s24 }
 0x246   : > { %5297 = dma.done.wait (%p6797_p4), %s1176_s21, 32  }
 0x247   : > { %5299 = vsyncadd (%p6797_p4), %s1176_s21, 4294967264  ;;  %p6798_p11 = scmp.eq.s32.totalorder %s6794_s16, 0 }
 0x249   : > { %5301 = dma.done.wait (%p6798_p11), [#allocation29], 32   ;;  %p6799_p7 = pmov %p6798_p11 }
 0x24a   : > { %s6800_s27 = sld [smem:[#allocation48_spill]]  ;;  %s6801_s14 = sld [smem:[#allocation47_spill]] }
 0x24b   : > { %5303 = vsyncadd (%p6799_p7), [#allocation29], 4294967264  ;;  %s4049_s24 = sshll.u32 %s6160_s12, 3  ;;  %s6802_s29 = sld [smem:[#allocation63_spill]] }
 0x24c   : > { %s6803_s5 = sld [smem:[#allocation60_spill]]  ;;  %s6804_s26 = sld [smem:[#allocation66_spill]] }
 0x24d   : > { %s6805_s23 = sld [smem:[#allocation68_spill]]  ;;  %s6806_s6 = sld [smem:[#allocation72_spill]] }
 0x24e   : > { %s6807_s9 = sld [smem:[#allocation80_spill]] }
 0x250   : > { %p1344_p9 = scmp.lt.s32.totalorder %s6800_s27, 1  ;;  %p1351_p6 = scmp.lt.s32.totalorder %s6801_s14, 1 }
 0x251   : > { %p4059_p3 = scmp.ne.s32.totalorder %s6801_s14, 0 }
 0x252   : > { %s6850_s27 = smov (!%p1344_p9, %s6800_s27), 1  ;;  %vm1376_vm0 = vcmask (!%p4059_p3), 261120  }
 0x253   : > { %s1352_s1 = scalar_select %p1351_p6, %s6801_s14, 1 }
 0x254   : > { %s4050_s25 = sshll.u32 %s6850_s27, 3  ;;  %s1350_s28 = scalar_lea.vmem %s6802_s29, %s6850_s27 }
 0x255   : > { %s1347_s20 = scalar_lea.vmem %s6803_s5, %s4050_s25  ;;  %s4118_s10 = sshll.u32 %s1352_s1, 5 }
 0x256   : > { %s1355_s8 = scalar_lea.vmem %s6804_s26, %s4118_s10  ;;  %s6253_s30 = scalar_lea.vmem %s6805_s23, %s4118_s10  ;;  %v1375_v0 = vld [vmem:[%s1347_s20] sm:$0xff] (!%p4059_p3) }
 0x257   : > { %s6258_s3 = scalar_lea.vmem %s6806_s6, %s4118_s10  ;;  %s4121_s29 = sshll.u32 %s1352_s1, 6  ;;  %1377 = vst.msk [vmem:[#allocation2] sm:$0xff] (!%p4059_p3), %vm1376_vm0, %v1375_v0 }
 0x258   : > { %s6263_s5 = scalar_lea.vmem %s6807_s9, %s4121_s29  ;;  %s6265_s25 = scalar_lea.vmem [#allocation31], %s4049_s24 }
 0x259   : > { %1374 = sbr.rel (%p4059_p3) target bundleno = 608 (0x260), region = 188 }
 0x260 PF: > { %v6268_v1 = vld [vmem:[#allocation2] sm:$0xff]  ;;  %vm1385_vm1 = vcmask 261120   ;;  %v1423_v9 = vld [vmem:[%s1355_s8 + $0x8] sm:$0xff]  ;;  %v1424_v10 = vld [vmem:[%s1355_s8 + $0x10] sm:$0xff]  ;;  %v5371_v11 = vmov 0.0|0.0   ;;  %vm5372_vm2 = vmmov 0  }
 0x261   : > { %v1386_v2 = vsel %vm1385_vm1, %v6268_v1, 0.0  ;;  %v1422_v8 = vld [vmem:[%s1355_s8] sm:$0xff]  ;;  %4383 = vmatprep.subr.bf16.mxu1 %v5371_v11  ;;  %v1425_v13 = vld [vmem:[%s1355_s8 + $0x18] sm:$0xff]  ;;  %v5373_v14 = vmov 0.0   ;;  %s6808_s19 = scalar_lea.vmem [#allocation7], %s6174_s13  ;;  %s6809_s6 = scalar_lea.vmem [#allocation9], %s6174_s13 }
 0x262   : > { %1387 = vadd.xlane.f32.xlu0 %v1386_v2  ;;  %v4384_v12 = vpack.c.bf16 %v1423_v9, %v1422_v8  ;;  %4210 = vmatprep.mubr.msk.f32.mxu1 %vm5372_vm2, %v5373_v14  ;;  %v4387_v15 = vpack.c.bf16 %v1425_v13, %v1424_v10  ;;  %v4060_v25 = vld [vmem:[%s6808_s19] ss:$0 sm:$0xff]  ;;  %s6810_s2 = scalar_lea.vmem [#allocation10], %s6174_s13  ;;  %s5374_s7 = smov 120   ;;  %vm1509_vm5 = vcmask 64512   ;;  %vm1847_vm7 = vcmask 130112  }
 0x263   : > { %4223 = vmatprep.subr.mxu0 %v5373_v14  ;;  %4225 = vmatprep.mubr.msk.f32.mxu0 %vm5372_vm2, %v5373_v14  ;;  %v4061_v27 = vld [vmem:[%s6809_s6] ss:$0 sm:$0xff]  ;;  %s5375_s23 = smov 96   ;;  %s5376_s8 = smov 88   ;;  %vm2021_vm8 = vcmask 195712   ;;  %vm2195_vm9 = vcmask 261312   ;;  %vm6412_vm12 = vmpackc.low %vm1509_vm5, %vm1509_vm5 }
 0x264   : > { %4385 = vmatpush3.bf16.msra.mxu1 %v4384_v12  ;;  %v4062_v30 = vld [vmem:[%s6810_s2] ss:$0 sm:$0xff]  ;;  %s5377_s22 = smov 80   ;;  %s5378_s26 = smov 112   ;;  %vm2593_vm15 = vcmask 130048  }
 0x265   : > { %4386 = vmatprep.subr.bf16.mxu1 %v5371_v11  ;;  %s5379_s0 = smov 72   ;;  %s5380_s15 = smov 104  }
 0x266   : > { %s6811_s14 = sld [smem:[#allocation62_spill]]  ;;  %s5381_s24 = smov 64  }
 0x267   : > { %s5382_s1 = smov 48   ;;  %s5383_s16 = smov 40  }
 0x268   : > { %4388 = vmatpush3.bf16.msra.mxu1 %v4387_v15  ;;  %s5384_s29 = smov 56   ;;  %s5385_s11 = smov 8  }
 0x269   : > { %4213 = vmatprep.subr.mxu1 %v5373_v14  ;;  %s5386_s21 = smov 16   ;;  %s5387_s9 = smov 24  }
 0x26a   : > { %s6814_s19 = scalar_lea.vmem [#allocation13], %s6174_s13  ;;  %s6815_s6 = scalar_lea.vmem [#allocation15], %s6174_s13 }
 0x26b   : > { %s6822_s27 = scalar_lea.vmem [#allocation25], %s6174_s13 }
 0x26c   : > { %v1379_v41 = vld [vmem:[%s6811_s14] sm:$0xff] }
 0x26d   : > { %vm1380_vm6 = vcmp.eq.f32.partialorder %v1379_v41, 0.0 }
 0x2ef   : > { %v1388_v3 = vpop.xlane.xlu0 %1387 }
 0x2f0   : > { %v1390_v4 = vmul.f32 0.03125, %v1388_v3 }
 0x2f2   : > { %v1391_v5 = vsub.f32 %v6268_v1, %v1390_v4 }
 0x2f4   : > { %v1392_v6 = vmul.f32 %v1391_v5, %v1391_v5 }
 0x2f6   : > { %v1393_v7 = vsel %vm1385_vm1, %v1392_v6, 0.0 }
 0x2f7   : > { %1394 = vadd.xlane.f32.xlu0 %v1393_v7 }
 0x384   : > { %v1395_v16 = vpop.xlane.xlu0 %1394 }
 0x385   : > { %v1396_v17 = vmul.f32 0.032258064, %v1395_v16 }
 0x387   : > { %4672 = vrsqrt.f32 %v1396_v17  ;;  %vm1399_vm3 = vcmp.eq.f32.partialorder %v1396_v17, inf  ;;  %v1402_v20 = vand.u32 2147483648, %v1396_v17  ;;  %vm1401_vm4 = vcmp.eq.f32.partialorder %v1396_v17, 0.0 }
 0x391   : > { %v4673_v18 = vpop.eup %4672 }
 0x392   : > { %v1398_v19 = vmul.f32 %v4673_v18, %v1396_v17 }
 0x394   : > { %v1400_v21 = vsel %vm1399_vm3, %v1396_v17, %v1398_v19  ;;  %vm3442_vm3 = vcmask 523264  }
 0x395   : > { %v1403_v22 = vsel %vm1401_vm4, %v1402_v20, %v1400_v21 }
 0x396   : > { %v1404_v23 = vadd.f32 1e-06, %v1403_v22 }
 0x398   : > { %4674 = vrcp.f32 %v1404_v23 }
 0x3a2   : > { %v4675_v24 = vpop.eup %4674 }
 0x3a3   : > { %v1407_v26 = vmul.f32 %v4675_v24, %v1391_v5 }
 0x3a5   : > { %v1414_v28 = vmul.f32 %v4060_v25, %v1407_v26 }
 0x3a7   : > { %v1421_v29 = vadd.f32 %v4061_v27, %v1414_v28 }
 0x3a9   : > { %4211 = vmatmul.mubr.msk.f32.vlgmr.msra.gmra.mrb[0].mxu1 %vm1385_vm1, %v1421_v29 }
 0x3aa   : > { %4215 = vmatprep.mubr.msk.f32.mxu1 %vm5372_vm2, %v5373_v14 }
 0x47c   : > { %v1502_v31 = vpop.f32.mrb[0].mxu1 }
 0x47d   : > { %v6291_v32 = vadd.f32 %v4062_v30, %v1502_v31  ;;  %v4212_v33 = vpop.f32.mrb[1].mxu1 }
 0x47f   : > { %1675 = vrot.lane.b32.xlu0 %v6291_v32, %s5374_s7  ;;  %1507 = vrot.lane.b32.xlu1 %v6291_v32, %s5375_s23 }
 0x483   : > { %1677 = vrot.lane.b32.xlu1 %v6291_v32, %s5376_s8 }
 0x487   : > { %1851 = vrot.lane.b32.xlu1 %v6291_v32, %s5377_s22 }
 0x48b   : > { %1849 = vrot.lane.b32.xlu1 %v6291_v32, %s5378_s26 }
 0x48f   : > { %2025 = vrot.lane.b32.xlu1 %v6291_v32, %s5379_s0 }
 0x493   : > { %2023 = vrot.lane.b32.xlu1 %v6291_v32, %s5380_s15 }
 0x4f1   : > { %v1508_v34 = vpop.permute.xlu1 %1507  ;;  %v1676_v36 = vpop.permute.xlu0 %1675 }
 0x4f2   : > { %4214 = vmatpush3.xpose.msk.msra.mxu1 %vm1509_vm5, %v1508_v34 }
 0x4f3   : > { %4218 = vmatprep.subr.mxu1 %v5373_v14 }
 0x4f5   : > { %4216 = vmatmul.mubr.msk.f32.vlgmr.msra.gmra.mrb[2].mxu1 %vm1509_vm5, %v6291_v32  ;;  %v1678_v35 = vpop.permute.xlu1 %1677 }
 0x4f6   : > { %4224 = vmatpush3.xpose.msk.msra.mxu0 %vm1509_vm5, %v1678_v35  ;;  %4220 = vmatprep.mubr.msk.f32.mxu1 %vm5372_vm2, %v5373_v14 }
 0x4f7   : > { %4233 = vmatprep.subr.mxu0 %v5373_v14 }
 0x4f9   : > { %4226 = vmatmul.mubr.msk.f32.vlgmr.msra.gmra.mrb[0].mxu0 %vm1509_vm5, %v1676_v36  ;;  %v1852_v37 = vpop.permute.xlu1 %1851 }
 0x4fa   : > { %4234 = vmatpush3.xpose.msk.msra.mxu0 %vm1509_vm5, %v1852_v37  ;;  %4235 = vmatprep.mubr.msk.f32.mxu0 %vm5372_vm2, %v5373_v14 }
 0x4fb   : > { %4243 = vmatprep.subr.mxu0 %v5373_v14 }
 0x4fd   : > { %v1850_v38 = vpop.permute.xlu1 %1849 }
 0x4fe   : > { %4236 = vmatmul.mubr.msk.f32.vlgmr.msra.gmra.mrb[2].mxu0 %vm1509_vm5, %v1850_v38 }
 0x4ff   : > { %4245 = vmatprep.mubr.msk.f32.mxu0 %vm5372_vm2, %v5373_v14 }
 0x501   : > { %v2026_v39 = vpop.permute.xlu1 %2025 }
 0x502   : > { %4244 = vmatpush3.xpose.msk.msra.mxu0 %vm1509_vm5, %v2026_v39  ;;  %v2198_v39 = vld [vmem:[%s6253_s30] sm:$0xff] }
 0x503   : > { %4389 = vmatprep.subr.bf16.mxu0 %v5371_v11 }
 0x505   : > { %v2024_v40 = vpop.permute.xlu1 %2023 }
 0x506   : > { %4246 = vmatmul.mubr.msk.f32.vlgmr.msra.gmra.mrb[4].mxu0 %vm1509_vm5, %v2024_v40  ;;  %v2199_v40 = vld [vmem:[%s6253_s30 + $0x8] sm:$0xff] }
 0x507   : > { %4261 = vmatprep.mubr.msk.f32.mxu0 %vm5372_vm2, %v5373_v14  ;;  %v4390_v41 = vpack.c.bf16 %v2199_v40, %v2198_v39 }
 0x509   : > { %4391 = vmatpush3.bf16.msra.mxu0 %v4390_v41 }
 0x50a   : > { %4392 = vmatprep.subr.bf16.mxu0 %v5371_v11 }
 0x5c8   : > { %v1580_v42 = vpop.f32.mrb[2].mxu1 }
 0x5c9   : > { %v1584_v43 = vmul.f32 0.35355338, %v1580_v42  ;;  %v4217_v44 = vpop.f32.mrb[3].mxu1  ;;  %v2200_v42 = vld [vmem:[%s6253_s30 + $0x10] sm:$0xff] }
 0x5cb   : > { %v1585_v45 = vsel %vm1380_vm6, -1e+09, %v1584_v43  ;;  %v2201_v43 = vld [vmem:[%s6253_s30 + $0x18] sm:$0xff]  ;;  %s6812_s30 = scalar_lea.vmem [#allocation12], %s6174_s13 }
 0x5cc   : > { %v1749_v46 = vpop.f32.mrb[0].mxu0  ;;  %v1586_v47 = vsel %vm1509_vm5, %v1585_v45, -inf  ;;  %v4393_v44 = vpack.c.bf16 %v2201_v43, %v2200_v42 }
 0x5cd   : > { %v1753_v48 = vmul.f32 0.35355338, %v1749_v46  ;;  %v4227_v49 = vpop.f32.mrb[1].mxu0  ;;  %1587 = vmax.xlane.f32.xlu1 %v1586_v47 }
 0x5ce   : > { %4394 = vmatpush3.bf16.msra.mxu0 %v4393_v44 }
 0x5cf   : > { %v1754_v50 = vsel %vm1380_vm6, -1e+09, %v1753_v48 }
 0x5d0   : > { %v1755_v51 = vsel %vm1509_vm5, %v1754_v50, -inf }
 0x5d1   : > { %1756 = vmax.xlane.f32.xlu0 %v1755_v51  ;;  %v1923_v52 = vpop.f32.mrb[2].mxu0 }
 0x5d2   : > { %v1927_v53 = vmul.f32 0.35355338, %v1923_v52  ;;  %v4237_v54 = vpop.f32.mrb[3].mxu0 }
 0x5d4   : > { %v1928_v55 = vsel %vm1380_vm6, -1e+09, %v1927_v53 }
 0x5d5   : > { %v1929_v56 = vsel %vm1509_vm5, %v1928_v55, -inf }
 0x5d6   : > { %1930 = vmax.xlane.f32.xlu1 %v1929_v56 }
 0x5d9   : > { %v2097_v57 = vpop.f32.mrb[4].mxu0 }
 0x5da   : > { %v2101_v58 = vmul.f32 0.35355338, %v2097_v57  ;;  %v4247_v59 = vpop.f32.mrb[5].mxu0 }
 0x5dc   : > { %v2102_v60 = vsel %vm1380_vm6, -1e+09, %v2101_v58 }
 0x5dd   : > { %v2103_v61 = vsel %vm1509_vm5, %v2102_v60, -inf }
 0x5de   : > { %2104 = vmax.xlane.f32.xlu0 %v2103_v61  ;;  %v2322_v61 = vld [vmem:[%s6258_s3] sm:$0xff] }
 0x5e7   : > { %1598 = vrot.lane.b32.xlu1 %v6291_v32, %s5381_s24 }
 0x65a   : > { %v1588_v62 = vpop.xlane.xlu1 %1587 }
 0x65b   : > { %v1589_v63 = vsub.f32 %v1585_v45, %v1588_v62  ;;  %v2323_v62 = vld [vmem:[%s6258_s3 + $0x8] sm:$0xff] }
 0x65d   : > { %v1590_v0 = vmul.f32 1.442695, %v1589_v63  ;;  %v4627_v63 = vpack.i.bf16 %v2323_v62, %v2322_v61 }
 0x65e   : > { %v1757_v2 = vpop.xlane.xlu0 %1756 }
 0x65f   : > { %4676 = vpow2.f32 %v1590_v0  ;;  %v1758_v3 = vsub.f32 %v1754_v50, %v1757_v2  ;;  %v4396_v0 = vpack.c.bf16 %v2323_v62, %v2322_v61  ;;  %v2324_v2 = vld [vmem:[%s6258_s3 + $0x10] sm:$0xff] }
 0x661   : > { %v1759_v4 = vmul.f32 1.442695, %v1758_v3  ;;  %v2325_v3 = vld [vmem:[%s6258_s3 + $0x18] sm:$0xff]  ;;  %s6813_s3 = scalar_lea.vmem [#allocation16], %s6174_s13 }
 0x663   : > { %4678 = vpow2.f32 %v1759_v4  ;;  %v1931_v5 = vpop.xlane.xlu1 %1930  ;;  %v4632_v4 = vpack.i.bf16 %v2325_v3, %v2324_v2 }
 0x664   : > { %v1932_v6 = vsub.f32 %v1928_v55, %v1931_v5  ;;  %v4076_v55 = vld [vmem:[%s6812_s30] ss:$0 sm:$0xff]  ;;  %v4399_v5 = vpack.c.bf16 %v2325_v3, %v2324_v2 }
 0x666   : > { %v1933_v7 = vmul.f32 1.442695, %v1932_v6 }
 0x667   : > { %v1599_v8 = vpop.permute.xlu1 %1598 }
 0x668   : > { %4680 = vpow2.f32 %v1933_v7  ;;  %4219 = vmatpush3.msra.mxu1 %v1599_v8 }
 0x669   : > { %v4677_v9 = vpop.eup %4676  ;;  %4228 = vmatprep.subr.mxu1 %v5373_v14 }
 0x66a   : > { %v1592_v10 = vsel %vm1509_vm5, %v4677_v9, 0.0 }
 0x66b   : > { %v2105_v12 = vpop.xlane.xlu0 %2104  ;;  %1593 = vadd.xlane.f32.xlu1 %v1592_v10  ;;  %v2320_v10 = vld [vmem:[%s6164_s17] sm:$0xff] }
 0x66c   : > { %v2106_v13 = vsub.f32 %v2102_v60, %v2105_v12  ;;  %v4080_v12 = vld [vmem:[%s6813_s3] ss:$0 sm:$0xff] }
 0x66d   : > { %v4679_v15 = vpop.eup %4678 }
 0x66e   : > { %v2107_v16 = vmul.f32 1.442695, %v2106_v13  ;;  %v1761_v17 = vsel %vm1509_vm5, %v4679_v15, 0.0 }
 0x66f   : > { %1762 = vadd.xlane.f32.xlu0 %v1761_v17 }
 0x670   : > { %4682 = vpow2.f32 %v2107_v16 }
 0x672   : > { %v4681_v18 = vpop.eup %4680 }
 0x673   : > { %v1935_v19 = vsel %vm1509_vm5, %v4681_v18, 0.0 }
 0x674   : > { %1936 = vadd.xlane.f32.xlu1 %v1935_v19 }
 0x67a   : > { %v4683_v20 = vpop.eup %4682 }
 0x67b   : > { %v2109_v21 = vsel %vm1509_vm5, %v4683_v20, 0.0 }
 0x67c   : > { %2110 = vadd.xlane.f32.xlu0 %v2109_v21 }
 0x685   : > { %1941 = vrot.lane.b32.xlu1 %v6291_v32, %s5382_s1 }
 0x689   : > { %2115 = vrot.lane.b32.xlu1 %v6291_v32, %s5383_s16 }
 0x692   : > { %1767 = vrot.lane.b32.xlu0 %v6291_v32, %s5384_s29 }
 0x6f8   : > { %v1594_v22 = vpop.xlane.xlu1 %1593 }
 0x6f9   : > { %4684 = vrcp.f32 %v1594_v22 }
 0x6fc   : > { %v1763_v23 = vpop.xlane.xlu0 %1762 }
 0x6fd   : > { %4686 = vrcp.f32 %v1763_v23 }
 0x701   : > { %v1937_v24 = vpop.xlane.xlu1 %1936 }
 0x702   : > { %4688 = vrcp.f32 %v1937_v24 }
 0x703   : > { %v4685_v25 = vpop.eup %4684 }
 0x704   : > { %v1597_v26 = vmul.f32 %v4685_v25, %v4677_v9 }
 0x705   : > { %v1942_v30 = vpop.permute.xlu1 %1941 }
 0x706   : > { %4221 = vmatmul.mubr.msk.f32.vlgmr.msra.gmra.mrb[4].mxu1 %vm1509_vm5, %v1597_v26  ;;  %v2321_v26 = vld [vmem:[%s6164_s17 + $0x8] sm:$0xff] }
 0x707   : > { %4230 = vmatprep.mubr.msk.f32.mxu1 %vm5372_vm2, %v5373_v14  ;;  %v4687_v28 = vpop.eup %4686 }
 0x708   : > { %v1766_v29 = vmul.f32 %v4687_v28, %v4679_v15 }
 0x709   : > { %v2111_v27 = vpop.xlane.xlu0 %2110  ;;  %v2116_v34 = vpop.permute.xlu1 %2115 }
 0x70a   : > { %4690 = vrcp.f32 %v2111_v27 }
 0x70c   : > { %v4689_v32 = vpop.eup %4688 }
 0x70d   : > { %v1768_v31 = vpop.permute.xlu0 %1767  ;;  %v1940_v33 = vmul.f32 %v4689_v32, %v4681_v18  ;;  %v4078_v32 = vld [vmem:[%s6814_s19] ss:$0 sm:$0xff] }
 0x70e   : > { %4229 = vmatpush3.msra.mxu1 %v1768_v31 }
 0x70f   : > { %4231 = vmatmul.mubr.msk.f32.vlgmr.msra.gmra.mrb[6].mxu1 %vm1509_vm5, %v1766_v29  ;;  %4238 = vmatprep.subr.mxu1 %v5373_v14 }
 0x710   : > { %4239 = vmatpush3.msra.mxu1 %v1942_v30  ;;  %4240 = vmatprep.mubr.msk.f32.mxu1 %vm5372_vm2, %v5373_v14 }
 0x711   : > { %4248 = vmatprep.subr.mxu1 %v5373_v14 }
 0x713   : > { %4241 = vmatmul.mubr.msk.f32.vlgmr.msra.gmra.mrb[8].mxu1 %vm1509_vm5, %v1940_v33 }
 0x714   : > { %v4691_v35 = vpop.eup %4690  ;;  %4249 = vmatpush3.msra.mxu1 %v2116_v34  ;;  %4250 = vmatprep.mubr.msk.f32.mxu1 %vm5372_vm2, %v5373_v14  ;;  %v4079_v34 = vld [vmem:[%s6815_s6] ss:$0 sm:$0xff] }
 0x715   : > { %v2114_v36 = vmul.f32 %v4691_v35, %v4683_v20  ;;  %4395 = vmatprep.subr.bf16.mxu1 %v5371_v11 }
 0x717   : > { %4251 = vmatmul.mubr.msk.f32.vlgmr.msra.gmra.mrb[10].mxu1 %vm1509_vm5, %v2114_v36 }
 0x718   : > { %4272 = vmatprep.mubr.msk.f32.mxu1 %vm5372_vm2, %v5373_v14  ;;  %4397 = vmatpush3.bf16.msra.mxu1 %v4396_v0 }
 0x719   : > { %4398 = vmatprep.subr.bf16.mxu1 %v5371_v11 }
 0x71c   : > { %4400 = vmatpush3.bf16.msra.mxu1 %v4399_v5 }
 0x71d   : > { %4409 = vmatprep.subr.bf16.mxu1 %v5371_v11 }
 0x7d9   : > { %v1670_v37 = vpop.f32.mrb[4].mxu1 }
 0x7da   : > { %1674 = vst.msk [vmem:[#allocation3] sm:$0xff] %vm1509_vm5, %v1670_v37  ;;  %v4222_v38 = vpop.f32.mrb[5].mxu1 }
 0x7e2   : > { %v1839_v45 = vpop.f32.mrb[6].mxu1 }
 0x7e3   : > { %1844 = vrot.lane.b32.xlu0 %v1839_v45, %s5385_s11  ;;  %v4232_v46 = vpop.f32.mrb[7].mxu1 }
 0x7e6   : > { %v2013_v47 = vpop.f32.mrb[8].mxu1 }
 0x7e7   : > { %2018 = vrot.lane.b32.xlu1 %v2013_v47, %s5386_s21  ;;  %v4242_v48 = vpop.f32.mrb[9].mxu1 }
 0x7ea   : > { %v2187_v49 = vpop.f32.mrb[10].mxu1 }
 0x7eb   : > { %2192 = vrot.lane.b32.xlu0 %v2187_v49, %s5387_s9  ;;  %v4252_v50 = vpop.f32.mrb[11].mxu1 }
 0x855   : > { %v1845_v51 = vpop.permute.xlu0 %1844 }
 0x856   : > { %1848 = vst.msk [vmem:[#allocation3] sm:$0xff] %vm1847_vm7, %v1845_v51 }
 0x859   : > { %v2019_v52 = vpop.permute.xlu1 %2018 }
 0x85a   : > { %2022 = vst.msk [vmem:[#allocation3] sm:$0xff] %vm2021_vm8, %v2019_v52 }
 0x85d   : > { %v2193_v53 = vpop.permute.xlu0 %2192 }
 0x85e   : > { %2196 = vst.msk [vmem:[#allocation3] sm:$0xff] %vm2195_vm9, %v2193_v53  ;;  %v2587_v53 = vlaneseq }
 0x865   : > { %v2197_v54 = vld [vmem:[#allocation3] sm:$0xff] }
 0x866   : > { %4262 = vmatmul.mubr.msk.f32.vlgmr.msra.gmra.mrb[6].mxu0 %vm1385_vm1, %v2197_v54  ;;  %v1381_v54 = vld [vmem:[%s1350_s28] sm:$0x1]  ;;  %s6820_s28 = scalar_lea.vmem [#allocation21], %s6174_s13 }
 0x867   : > { %4283 = vmatprep.mubr.msk.f32.mxu0 %vm1385_vm1, %v2320_v10  ;;  %vm1382_vm13 = vcmp.eq.f32.partialorder %v1381_v54, 0.0 }
 0x939   : > { %v2278_v56 = vpop.f32.mrb[6].mxu0 }
 0x93a   : > { %v2279_v57 = vadd.f32 %v4076_v55, %v2278_v56  ;;  %v4263_v58 = vpop.f32.mrb[7].mxu0  ;;  %v2588_v55 = vshrl.u32 %v2587_v53, 7 }
 0x93c   : > { %v6379_v59 = vadd.f32 %v2279_v57, %v6268_v1  ;;  %v2589_v56 = vsub.s32 0, %v2588_v55  ;;  %v5388_v57 = vmov 0  }
 0x93d   : > { %v2586_v58 = vsel %vm1382_vm13, 1, %v5388_v57 }
 0x93e   : > { %v2285_v60 = vsel %vm1385_vm1, %v6379_v59, 0.0 }
 0x93f   : > { %2286 = vadd.xlane.f32.xlu1 %v2285_v60  ;;  %v6442_v60 = vrot.slane %v2586_v58, %v2589_v56 }
 0x941   : > { %vm2591_vm14 = vcmp.eq.s32.totalorder %v6442_v60, 1 }
 0x950   : > { %4633 = vrot.lane.b32.xlu1 %v4632_v4, %s5375_s23 }
 0x954   : > { %2422 = vrot.lane.b32.xlu1 %v4080_v12, %s5375_s23 }
 0x9cc   : > { %v2287_v1 = vpop.xlane.xlu1 %2286 }
 0x9cd   : > { %v2288_v6 = vmul.f32 0.03125, %v2287_v1 }
 0x9cf   : > { %v2289_v7 = vsub.f32 %v6379_v59, %v2288_v6 }
 0x9d0   : > { %v4634_v15 = vpop.permute.xlu1 %4633 }
 0x9d1   : > { %v2290_v8 = vmul.f32 %v2289_v7, %v2289_v7  ;;  %v4636_v17 = vunpack.i.h.bf16 %v4634_v15  ;;  %v4635_v18 = vunpack.i.l.bf16 %v4634_v15 }
 0x9d3   : > { %v2291_v9 = vsel %vm1385_vm1, %v2290_v8, 0.0  ;;  %v4405_v23 = vpack.c.bf16 %v4636_v17, %v4635_v18 }
 0x9d4   : > { %2292 = vadd.xlane.f32.xlu0 %v2291_v9  ;;  %v2423_v37 = vpop.permute.xlu1 %2422 }
 0x9ea   : > { %4628 = vrot.lane.b32.xlu0 %v4627_v63, %s5375_s23 }
 0xa61   : > { %v2293_v13 = vpop.xlane.xlu0 %2292 }
 0xa62   : > { %v2294_v16 = vmul.f32 0.032258064, %v2293_v13 }
 0xa64   : > { %4692 = vrsqrt.f32 %v2294_v16  ;;  %vm2297_vm10 = vcmp.eq.f32.partialorder %v2294_v16, inf  ;;  %v2300_v27 = vand.u32 2147483648, %v2294_v16  ;;  %vm2299_vm11 = vcmp.eq.f32.partialorder %v2294_v16, 0.0 }
 0xa65   : > { %v4629_v19 = vpop.permute.xlu0 %4628 }
 0xa66   : > { %v4631_v20 = vunpack.i.h.bf16 %v4629_v19  ;;  %v4630_v21 = vunpack.i.l.bf16 %v4629_v19 }
 0xa68   : > { %v4401_v22 = vpack.c.bf16 %v4631_v20, %v4630_v21 }
 0xa6a   : > { %4402 = vmatprep.subr.bf16.mxu0 %v4401_v22 }
 0xa6b   : > { %4404 = vmatpush3.bf16.msra.mxu0 %v4401_v22 }
 0xa6c   : > { %4406 = vmatprep.subr.bf16.mxu0 %v4405_v23 }
 0xa6e   : > { %v4693_v24 = vpop.eup %4692 }
 0xa6f   : > { %v2296_v25 = vmul.f32 %v4693_v24, %v2294_v16  ;;  %4408 = vmatpush3.bf16.msra.mxu0 %v4405_v23 }
 0xa70   : > { %4413 = vmatprep.subr.bf16.mxu0 %v5371_v11 }
 0xa71   : > { %v2298_v28 = vsel %vm2297_vm10, %v2294_v16, %v2296_v25 }
 0xa72   : > { %v2301_v29 = vsel %vm2299_vm11, %v2300_v27, %v2298_v28  ;;  %4284 = vmatmul.mubr.msk.f32.vlgmr.msra.gmra.mrb[8].mxu0 %vm1385_vm1, %v2321_v26 }
 0xa73   : > { %v2302_v30 = vadd.f32 1e-06, %v2301_v29  ;;  %4297 = vmatprep.mubr.msk.f32.mxu0 %vm5372_vm2, %v5373_v14 }
 0xa75   : > { %4694 = vrcp.f32 %v2302_v30 }
 0xa7f   : > { %v4695_v31 = vpop.eup %4694 }
 0xa80   : > { %v2305_v33 = vmul.f32 %v4695_v31, %v2289_v7 }
 0xa82   : > { %v2312_v35 = vmul.f32 %v4078_v32, %v2305_v33 }
 0xa84   : > { %v2319_v36 = vadd.f32 %v4079_v34, %v2312_v35 }
 0xa86   : > { %4273 = vmatmul.mubr.msk.f32.vlgmr.msra.gmra.mrb[12].mxu1 %vm1385_vm1, %v2319_v36 }
 0xa87   : > { %4290 = vmatprep.mubr.msk.f32.mxu1 %vm5372_vm2, %v5373_v14 }
 0xb45   : > { %v4285_v38 = vpop.f32.mrb[8].mxu0 }
 0xb46   : > { %v2503_v39 = vadd.f32 %v4285_v38, %v2423_v37  ;;  %v2497_v40 = vpop.f32.mrb[9].mxu0 }
 0xb47   : > { %v2498_v41 = vadd.f32 %v2497_v40, %v2423_v37 }
 0xb49   : > { %v6416_v43 = vpack.i.bf16 %v2503_v39, %v2498_v41  ;;  %v4410_v44 = vpack.c.bf16 %v2503_v39, %v2498_v41 }
 0xb4b   : > { %4638 = vrot.lane.b32.xlu0 %v6416_v43, %s5374_s7  ;;  %4412 = vmatpush3.bf16.xpose.msk.msra.mxu1 %vm6412_vm12, %v4410_v44 }
 0xb4c   : > { %4416 = vmatprep.subr.bf16.mxu1 %v5371_v11 }
 0xb59   : > { %v2402_v45 = vpop.f32.mrb[12].mxu1 }
 0xb5a   : > { %v6423_v46 = vadd.f32 %v4080_v12, %v2402_v45  ;;  %v4274_v47 = vpop.f32.mrb[13].mxu1 }
 0xb5c   : > { %2686 = vrot.lane.b32.xlu1 %v6423_v46, %s5374_s7  ;;  %4291 = vmatmul.mubr.msk.f32.vlgmr.msra.gmra.mrb[14].mxu1 %vm1509_vm5, %v6423_v46 }
 0xb5d   : > { %4304 = vmatprep.mubr.msk.f32.mxu1 %vm5372_vm2, %v5373_v14 }
 0xbbd   : > { %v4639_v48 = vpop.permute.xlu0 %4638 }
 0xbbe   : > { %v4641_v49 = vunpack.i.h.bf16 %v4639_v48  ;;  %v4640_v50 = vunpack.i.l.bf16 %v4639_v48 }
 0xbc0   : > { %v4417_v51 = vpack.c.bf16 %v4641_v49, %v4640_v50 }
 0xbc2   : > { %4419 = vmatpush3.bf16.xpose.msk.msra.mxu1 %vm6412_vm12, %v4417_v51 }
 0xbc3   : > { %4427 = vmatprep.subr.bf16.mxu1 %v5371_v11 }
 0xbce   : > { %v2687_v52 = vpop.permute.xlu1 %2686 }
 0xbcf   : > { %4305 = vmatmul.mubr.msk.f32.vlgmr.msra.gmra.mrb[16].mxu1 %vm1509_vm5, %v2687_v52 }
 0xbd0   : > { %4325 = vmatprep.mubr.msk.f32.mxu1 %vm5372_vm2, %v5373_v14 }
 0xc2f   : > { %v2581_v61 = vpop.f32.mrb[14].mxu1 }
 0xc30   : > { %v2585_v62 = vmul.f32 0.35355338, %v2581_v61  ;;  %v4292_v63 = vpop.f32.mrb[15].mxu1 }
 0xc32   : > { %v2592_v0 = vsel %vm2591_vm14, -1e+09, %v2585_v62 }
 0xc33   : > { %v2594_v2 = vsel %vm2593_vm15, %v2592_v0, -inf }
 0xc34   : > { %2595 = vmax.xlane.f32.xlu0 %v2594_v2 }
 0xca2   : > { %v2764_v3 = vpop.f32.mrb[16].mxu1 }
 0xca3   : > { %v2768_v4 = vmul.f32 0.35355338, %v2764_v3  ;;  %v4306_v5 = vpop.f32.mrb[17].mxu1 }
 0xca5   : > { %v2769_v1 = vsel %vm2591_vm14, -1e+09, %v2768_v4 }
 0xca6   : > { %v2770_v6 = vsel %vm2593_vm15, %v2769_v1, -inf }
 0xca7   : > { %2771 = vmax.xlane.f32.xlu1 %v2770_v6 }
 0xcb8   : > { %4643 = vrot.lane.b32.xlu1 %v6416_v43, %s5375_s23  ;;  %s6823_s23 = scalar_lea.vmem [#allocation27], %s6174_s13 }
 0xcbc   : > { %4653 = vrot.lane.b32.xlu1 %v6416_v43, %s5378_s26 }
 0xcc0   : > { %2866 = vrot.lane.b32.xlu1 %v6423_v46, %s5378_s26 }
 0xcc1   : > { %v2596_v7 = vpop.xlane.xlu0 %2595 }
 0xcc2   : > { %v2597_v8 = vsub.f32 %v2592_v0, %v2596_v7 }
 0xcc4   : > { %v2598_v9 = vmul.f32 1.442695, %v2597_v8 }
 0xcc6   : > { %4696 = vpow2.f32 %v2598_v9 }
 0xcd0   : > { %v4697_v10 = vpop.eup %4696 }
 0xcd1   : > { %v2600_v12 = vsel %vm2593_vm15, %v4697_v10, 0.0 }
 0xcd2   : > { %2601 = vadd.xlane.f32.xlu0 %v2600_v12 }
 0xd34   : > { %v2772_v13 = vpop.xlane.xlu1 %2771 }
 0xd35   : > { %v2773_v15 = vsub.f32 %v2769_v1, %v2772_v13 }
 0xd37   : > { %v2774_v16 = vmul.f32 1.442695, %v2773_v15 }
 0xd38   : > { %v4644_v17 = vpop.permute.xlu1 %4643 }
 0xd39   : > { %4698 = vpow2.f32 %v2774_v16  ;;  %v4646_v18 = vunpack.i.h.bf16 %v4644_v17  ;;  %v4645_v19 = vunpack.i.l.bf16 %v4644_v17 }
 0xd3b   : > { %v4414_v20 = vpack.c.bf16 %v4646_v18, %v4645_v19 }
 0xd3c   : > { %v4654_v31 = vpop.permute.xlu1 %4653 }
 0xd3d   : > { %4415 = vmatpush3.bf16.msra.mxu0 %v4414_v20  ;;  %v4656_v33 = vunpack.i.h.bf16 %v4654_v31  ;;  %v4655_v34 = vunpack.i.l.bf16 %v4654_v31 }
 0xd3e   : > { %4420 = vmatprep.subr.bf16.mxu0 %v5371_v11 }
 0xd3f   : > { %v4424_v36 = vpack.c.bf16 %v4656_v33, %v4655_v34 }
 0xd40   : > { %v2867_v37 = vpop.permute.xlu1 %2866 }
 0xd43   : > { %v4699_v21 = vpop.eup %4698 }
 0xd44   : > { %v2776_v22 = vsel %vm2593_vm15, %v4699_v21, 0.0 }
 0xd45   : > { %2777 = vadd.xlane.f32.xlu0 %v2776_v22 }
 0xd5b   : > { %4648 = vrot.lane.b32.xlu0 %v6416_v43, %s5376_s8 }
 0xd5f   : > { %v2602_v23 = vpop.xlane.xlu0 %2601 }
 0xd60   : > { %4700 = vrcp.f32 %v2602_v23 }
 0xd6a   : > { %v4701_v24 = vpop.eup %4700 }
 0xd6b   : > { %v2605_v25 = vmul.f32 %v4701_v24, %v4697_v10 }
 0xd6d   : > { %4298 = vmatmul.mubr.msk.f32.vlgmr.msra.gmra.mrb[10].mxu0 %vm2593_vm15, %v2605_v25  ;;  %v3227_v25 = vld [vmem:[%s6204_s4] sm:$0xff] }
 0xd6e   : > { %4311 = vmatprep.mubr.msk.f32.mxu0 %vm5372_vm2, %v5373_v14 }
 0xdd2   : > { %v2778_v26 = vpop.xlane.xlu0 %2777 }
 0xdd3   : > { %4702 = vrcp.f32 %v2778_v26 }
 0xdd6   : > { %v4649_v27 = vpop.permute.xlu0 %4648 }
 0xdd7   : > { %v4651_v28 = vunpack.i.h.bf16 %v4649_v27  ;;  %v4650_v29 = vunpack.i.l.bf16 %v4649_v27  ;;  %v3229_v27 = vld [vmem:[%s6204_s4 + $0x10] sm:$0xff] }
 0xdd9   : > { %v4421_v30 = vpack.c.bf16 %v4651_v28, %v4650_v29  ;;  %v3230_v28 = vld [vmem:[%s6204_s4 + $0x18] sm:$0xff] }
 0xdda   : > { %v4441_v29 = vpack.c.bf16 %v3230_v28, %v3229_v27 }
 0xddb   : > { %4422 = vmatpush3.bf16.msra.mxu0 %v4421_v30 }
 0xddc   : > { %4423 = vmatprep.subr.bf16.mxu0 %v5371_v11 }
 0xddd   : > { %v4703_v32 = vpop.eup %4702 }
 0xdde   : > { %v2781_v35 = vmul.f32 %v4703_v32, %v4699_v21 }
 0xde0   : > { %4312 = vmatmul.mubr.msk.f32.vlgmr.msra.gmra.mrb[12].mxu0 %vm2593_vm15, %v2781_v35 }
 0xde1   : > { %4318 = vmatprep.mubr.msk.f32.mxu0 %vm5372_vm2, %v5373_v14 }
 0xde4   : > { %4426 = vmatpush3.bf16.xpose.msk.msra.mxu0 %vm6412_vm12, %v4424_v36 }
 0xde5   : > { %4434 = vmatprep.subr.bf16.mxu0 %v5371_v11 }
 0xdeb   : > { %4319 = vmatmul.mubr.msk.f32.vlgmr.msra.gmra.mrb[14].mxu0 %vm1509_vm5, %v2867_v37 }
 0xdec   : > { %4339 = vmatprep.mubr.msk.f32.mxu0 %vm5372_vm2, %v5373_v14 }
 0xe40   : > { %v2681_v38 = vpop.f32.mrb[10].mxu0 }
 0xe41   : > { %2685 = vst.msk [vmem:[#allocation3] sm:$0xff] %vm1509_vm5, %v2681_v38  ;;  %v4299_v39 = vpop.f32.mrb[11].mxu0 }
 0xeb3   : > { %v2857_v40 = vpop.f32.mrb[12].mxu0 }
 0xeb4   : > { %v4313_v41 = vpop.f32.mrb[13].mxu0 }
 0xebe   : > { %v2944_v44 = vpop.f32.mrb[14].mxu0 }
 0xebf   : > { %v2948_v45 = vmul.f32 0.35355338, %v2944_v44  ;;  %v4320_v47 = vpop.f32.mrb[15].mxu0 }
 0xec0   : > { %v3349_v47 = vld [vmem:[%s6219_s18] sm:$0xff] }
 0xec1   : > { %v2949_v48 = vsel %vm2591_vm14, -1e+09, %v2948_v45 }
 0xec2   : > { %v2950_v49 = vsel %vm2593_vm15, %v2949_v48, -inf }
 0xec3   : > { %2951 = vmax.xlane.f32.xlu0 %v2950_v49 }
 0xed9   : > { %4658 = vrot.lane.b32.xlu0 %v6416_v43, %s5377_s22 }
 0xedd   : > { %3046 = vrot.lane.b32.xlu0 %v6423_v46, %s5380_s15 }
 0xf50   : > { %v2952_v50 = vpop.xlane.xlu0 %2951 }
 0xf51   : > { %v2953_v51 = vsub.f32 %v2949_v48, %v2952_v50  ;;  %v3350_v48 = vld [vmem:[%s6219_s18 + $0x8] sm:$0xff]  ;;  %v3352_v50 = vld [vmem:[%s6219_s18 + $0x18] sm:$0xff] }
 0xf52   : > { %v4444_v49 = vpack.c.bf16 %v3350_v48, %v3349_v47 }
 0xf53   : > { %v2954_v52 = vmul.f32 1.442695, %v2953_v51 }
 0xf54   : > { %v4659_v53 = vpop.permute.xlu0 %4658 }
 0xf55   : > { %4704 = vpow2.f32 %v2954_v52  ;;  %v4661_v54 = vunpack.i.h.bf16 %v4659_v53  ;;  %v4660_v55 = vunpack.i.l.bf16 %v4659_v53  ;;  %v3434_v52 = vld [vmem:[%s6263_s5] sm:$0xff]  ;;  %v3435_v53 = vld [vmem:[%s6263_s5 + $0x8] sm:$0xff] }
 0xf57   : > { %v4428_v56 = vpack.c.bf16 %v4661_v54, %v4660_v55  ;;  %v3436_v54 = vld [vmem:[%s6263_s5 + $0x10] sm:$0xff]  ;;  %v4450_v55 = vpack.c.bf16 %v3435_v53, %v3434_v52 }
 0xf58   : > { %v3047_v4 = vpop.permute.xlu0 %3046 }
 0xf59   : > { %4429 = vmatpush3.bf16.msra.mxu1 %v4428_v56  ;;  %v3437_v56 = vld [vmem:[%s6263_s5 + $0x18] sm:$0xff] }
 0xf5a   : > { %4430 = vmatprep.subr.bf16.mxu1 %v5371_v11 }
 0xf5f   : > { %v4705_v57 = vpop.eup %4704 }
 0xf60   : > { %v2956_v58 = vsel %vm2593_vm15, %v4705_v57, 0.0 }
 0xf61   : > { %2957 = vadd.xlane.f32.xlu1 %v2956_v58  ;;  %v3438_v58 = vld [vmem:[%s6263_s5 + $0x20] sm:$0xff] }
 0xf72   : > { %4663 = vrot.lane.b32.xlu1 %v6416_v43, %s5380_s15 }
 0xfee   : > { %v2958_v61 = vpop.xlane.xlu1 %2957 }
 0xfef   : > { %4706 = vrcp.f32 %v2958_v61  ;;  %v3439_v61 = vld [vmem:[%s6263_s5 + $0x28] sm:$0xff] }
 0xff2   : > { %v4664_v46 = vpop.permute.xlu1 %4663 }
 0xff3   : > { %v4666_v62 = vunpack.i.h.bf16 %v4664_v46  ;;  %v4665_v63 = vunpack.i.l.bf16 %v4664_v46  ;;  %v4456_v46 = vpack.c.bf16 %v3439_v61, %v3438_v58 }
 0xff5   : > { %v4431_v3 = vpack.c.bf16 %v4666_v62, %v4665_v63 }
 0xff9   : > { %v4707_v0 = vpop.eup %4706 }
 0xffa   : > { %v2961_v2 = vmul.f32 %v4707_v0, %v4705_v57  ;;  %v4453_v57 = vpack.c.bf16 %v3437_v56, %v3436_v54 }
 0xffc   : > { %4326 = vmatmul.mubr.msk.f32.vlgmr.msra.gmra.mrb[18].mxu1 %vm2593_vm15, %v2961_v2 }
 0xffd   : > { %4433 = vmatpush3.bf16.xpose.msk.msra.mxu1 %vm6412_vm12, %v4431_v3  ;;  %4332 = vmatprep.mubr.msk.f32.mxu1 %vm5372_vm2, %v5373_v14 }
 0xffe   : > { %4443 = vmatprep.subr.bf16.mxu1 %v5371_v11 }
0x1004   : > { %4333 = vmatmul.mubr.msk.f32.vlgmr.msra.gmra.mrb[20].mxu1 %vm1509_vm5, %v3047_v4 }
0x1005   : > { %4361 = vmatprep.mubr.msk.f32.mxu1 %vm5372_vm2, %v5373_v14  ;;  %4445 = vmatpush3.bf16.msra.mxu1 %v4444_v49 }
0x1006   : > { %4446 = vmatprep.subr.bf16.mxu1 %v5371_v11 }
0x10cf   : > { %v3037_v5 = vpop.f32.mrb[18].mxu1 }
0x10d0   : > { %v4327_v1 = vpop.f32.mrb[19].mxu1 }
0x10d7   : > { %v3124_v6 = vpop.f32.mrb[20].mxu1 }
0x10d8   : > { %v3128_v7 = vmul.f32 0.35355338, %v3124_v6  ;;  %v4334_v8 = vpop.f32.mrb[21].mxu1 }
0x10da   : > { %v3129_v42 = vsel %vm2591_vm14, -1e+09, %v3128_v7  ;;  %v4102_v7 = vld [vmem:[%s6820_s28] ss:$0 sm:$0xff] }
0x10db   : > { %v3130_v9 = vsel %vm2593_vm15, %v3129_v42, -inf }
0x10dc   : > { %3131 = vmax.xlane.f32.xlu1 %v3130_v9 }
0x10ed   : > { %2862 = vrot.lane.b32.xlu1 %v2857_v40, %s5385_s11 }
0x10f1   : > { %3042 = vrot.lane.b32.xlu1 %v3037_v5, %s5386_s21 }
0x1169   : > { %v3132_v10 = vpop.xlane.xlu1 %3131 }
0x116a   : > { %v3133_v12 = vsub.f32 %v3129_v42, %v3132_v10  ;;  %v3440_v10 = vld [vmem:[%s6263_s5 + $0x30] sm:$0xff] }
0x116c   : > { %v3134_v13 = vmul.f32 1.442695, %v3133_v12  ;;  %v3441_v12 = vld [vmem:[%s6263_s5 + $0x38] sm:$0xff]  ;;  %s6824_s5 = sld [smem:[#allocation47_spill]] }
0x116d   : > { %v2863_v15 = vpop.permute.xlu1 %2862 }
0x116e   : > { %4708 = vpow2.f32 %v3134_v13  ;;  %2865 = vst.msk [vmem:[#allocation3] sm:$0xff] %vm1847_vm7, %v2863_v15  ;;  %v4459_v13 = vpack.c.bf16 %v3441_v12, %v3440_v10  ;;  %v4104_v15 = vld [vmem:[%s6822_s27] ss:$0 sm:$0xff] }
0x1171   : > { %v3043_v16 = vpop.permute.xlu1 %3042 }
0x1172   : > { %3045 = vst.msk [vmem:[#allocation3] sm:$0xff] %vm2021_vm8, %v3043_v16  ;;  %p4108_p5 = scmp.ne.s32.totalorder %s6824_s5, 1 }
0x1178   : > { %v4709_v17 = vpop.eup %4708 }
0x1179   : > { %v3136_v60 = vsel %vm2593_vm15, %v4709_v17, 0.0 }
0x117a   : > { %3137 = vadd.xlane.f32.xlu0 %v3136_v60 }
0x1190   : > { %4668 = vrot.lane.b32.xlu0 %v6416_v43, %s5379_s0  ;;  %v3228_v43 = vld [vmem:[%s6204_s4 + $0x8] sm:$0xff]  ;;  %s6819_s4 = scalar_lea.vmem [#allocation19], %s6174_s13 }
0x1191   : > { %v4438_v26 = vpack.c.bf16 %v3228_v43, %v3227_v25  ;;  %v4100_v34 = vld [vmem:[%s6819_s4] ss:$0 sm:$0xff] }
0x1207   : > { %v3138_v18 = vpop.xlane.xlu0 %3137 }
0x1208   : > { %4710 = vrcp.f32 %v3138_v18 }
0x120b   : > { %v4669_v19 = vpop.permute.xlu0 %4668 }
0x120c   : > { %v4671_v20 = vunpack.i.h.bf16 %v4669_v19  ;;  %v4670_v21 = vunpack.i.l.bf16 %v4669_v19 }
0x120e   : > { %v4435_v22 = vpack.c.bf16 %v4671_v20, %v4670_v21  ;;  %v4107_v20 = vld [vmem:[%s6823_s23] ss:$0 sm:$0xff] }
0x1210   : > { %4436 = vmatpush3.bf16.msra.mxu0 %v4435_v22 }
0x1211   : > { %4437 = vmatprep.subr.bf16.mxu0 %v5371_v11 }
0x1212   : > { %v4711_v23 = vpop.eup %4710 }
0x1213   : > { %v3141_v24 = vmul.f32 %v4711_v23, %v4709_v17 }
0x1215   : > { %4340 = vmatmul.mubr.msk.f32.vlgmr.msra.gmra.mrb[16].mxu0 %vm2593_vm15, %v3141_v24 }
0x1216   : > { %4350 = vmatprep.mubr.msk.f32.mxu0 %vm5372_vm2, %v5373_v14  ;;  %4439 = vmatpush3.bf16.msra.mxu0 %v4438_v26 }
0x1217   : > { %4440 = vmatprep.subr.bf16.mxu0 %v5371_v11 }
0x121a   : > { %4442 = vmatpush3.bf16.msra.mxu0 %v4441_v29 }
0x121b   : > { %4449 = vmatprep.subr.bf16.mxu0 %v5371_v11 }
0x12e8   : > { %v3217_v30 = vpop.f32.mrb[16].mxu0 }
0x12e9   : > { %3222 = vrot.lane.b32.xlu0 %v3217_v30, %s5387_s9  ;;  %v4341_v31 = vpop.f32.mrb[17].mxu0 }
0x135b   : > { %v3223_v32 = vpop.permute.xlu0 %3222 }
0x135c   : > { %3225 = vst.msk [vmem:[#allocation3] sm:$0xff] %vm2195_vm9, %v3223_v32 }
0x1363   : > { %v3226_v33 = vld [vmem:[#allocation3] sm:$0xff] }
0x1364   : > { %4351 = vmatmul.mubr.msk.f32.vlgmr.msra.gmra.mrb[18].mxu0 %vm1385_vm1, %v3226_v33 }
0x1365   : > { %4380 = vmatprep.mubr.msk.f32.mxu0 %vm5372_vm2, %v5373_v14  ;;  %4451 = vmatpush3.bf16.msra.mxu0 %v4450_v55 }
0x1366   : > { %4452 = vmatprep.subr.bf16.mxu0 %v5371_v11 }
0x1369   : > { %4454 = vmatpush3.bf16.msra.mxu0 %v4453_v57 }
0x136a   : > { %4455 = vmatprep.subr.bf16.mxu0 %v5371_v11 }
0x136d   : > { %4457 = vmatpush3.bf16.msra.mxu0 %v4456_v46 }
0x136e   : > { %4458 = vmatprep.subr.bf16.mxu0 %v5371_v11 }
0x1371   : > { %4460 = vmatpush3.bf16.msra.mxu0 %v4459_v13 }
0x1437   : > { %v3307_v35 = vpop.f32.mrb[18].mxu0 }
0x1438   : > { %v3308_v36 = vadd.f32 %v4100_v34, %v3307_v35  ;;  %v4352_v37 = vpop.f32.mrb[19].mxu0 }
0x143a   : > { %v6524_v38 = vadd.f32 %v3308_v36, %v6379_v59  ;;  %v3351_v59 = vld [vmem:[%s6219_s18 + $0x10] sm:$0xff]  ;;  %s6821_s18 = scalar_lea.vmem [#allocation22], %s6174_s13 }
0x143b   : > { %v4447_v51 = vpack.c.bf16 %v3352_v50, %v3351_v59  ;;  %v4103_v8 = vld [vmem:[%s6821_s18] ss:$0 sm:$0xff] }
0x143c   : > { %v3314_v39 = vsel %vm1385_vm1, %v6524_v38, 0.0 }
0x143d   : > { %3315 = vadd.xlane.f32.xlu1 %v3314_v39  ;;  %4448 = vmatpush3.bf16.msra.mxu1 %v4447_v51 }
0x14ca   : > { %v3316_v40 = vpop.xlane.xlu1 %3315 }
0x14cb   : > { %v3317_v41 = vmul.f32 0.03125, %v3316_v40  ;;  %v4110_v40 = vld [vmem:[#allocation30] ss:$0 sm:$0xff] (!%p4108_p5) }
0x14cd   : > { %v3318_v14 = vsub.f32 %v6524_v38, %v3317_v41 }
0x14cf   : > { %v3319_v44 = vmul.f32 %v3318_v14, %v3318_v14 }
0x14d1   : > { %v3320_v45 = vsel %vm1385_vm1, %v3319_v44, 0.0 }
0x14d2   : > { %3321 = vadd.xlane.f32.xlu0 %v3320_v45 }
0x155f   : > { %v3322_v62 = vpop.xlane.xlu0 %3321 }
0x1560   : > { %v3323_v63 = vmul.f32 0.032258064, %v3322_v62 }
0x1562   : > { %4712 = vrsqrt.f32 %v3323_v63  ;;  %vm3326_vm0 = vcmp.eq.f32.partialorder %v3323_v63, inf  ;;  %v3329_v3 = vand.u32 2147483648, %v3323_v63  ;;  %vm3328_vm2 = vcmp.eq.f32.partialorder %v3323_v63, 0.0 }
0x156c   : > { %v4713_v0 = vpop.eup %4712 }
0x156d   : > { %v3325_v2 = vmul.f32 %v4713_v0, %v3323_v63 }
0x156f   : > { %v3327_v4 = vsel %vm3326_vm0, %v3323_v63, %v3325_v2 }
0x1570   : > { %v3330_v5 = vsel %vm3328_vm2, %v3329_v3, %v3327_v4 }
0x1571   : > { %v3331_v1 = vadd.f32 1e-06, %v3330_v5 }
0x1573   : > { %4714 = vrcp.f32 %v3331_v1 }
0x157d   : > { %v4715_v6 = vpop.eup %4714 }
0x157e   : > { %v3334_v11 = vmul.f32 %v4715_v6, %v3318_v14 }
0x1580   : > { %v3341_v42 = vmul.f32 %v4102_v7, %v3334_v11 }
0x1582   : > { %v3348_v9 = vadd.f32 %v4103_v8, %v3341_v42 }
0x1584   : > { %4362 = vmatmul.mubr.msk.f32.vlgmr.msra.gmra.mrb[22].mxu1 %vm1385_vm1, %v3348_v9 }
0x1657   : > { %v3429_v16 = vpop.f32.mrb[22].mxu1 }
0x1658   : > { %v3430_v17 = vadd.f32 %v4104_v15, %v3429_v16  ;;  %v4363_v60 = vpop.f32.mrb[23].mxu1 }
0x165a   : > { %v3433_v18 = vmax.f32 %v3430_v17, 0.0 }
0x165c   : > { %4381 = vmatmul.mubr.msk.f32.vlgmr.msra.gmra.mrb[20].mxu0 %vm3442_vm3, %v3433_v18 }
0x172e   : > { %3529 = sbr.rel (%p4108_p5) target bundleno = 6269 (0x187d), region = 192 }
0x172f   : > { %v3512_v19 = vpop.f32.mrb[20].mxu0 }
0x1730   : > { %v3516_v21 = vadd.f32 %v3512_v19, %v6524_v38  ;;  %v4382_v22 = vpop.f32.mrb[21].mxu0  ;;  %v4109_v38 = vld [vmem:[#allocation28] ss:$0 sm:$0xff] (!%p4108_p5) }
0x1732   : > { %v3524_v23 = vadd.f32 %v4107_v20, %v3516_v21 }
0x1734   : > { %3525 = vst.msk [vmem:[#allocation2] sm:$0xff] %vm1385_vm1, %v3524_v23  ;;  %v3532_v24 = vsel (!%p4108_p5), %vm1385_vm1, %v3524_v23, 0.0 }
0x1735   : > { %3533 = vadd.xlane.f32.xlu0 %v3532_v24 }
0x17c2   : > { %v3534_v25 = vpop.xlane.xlu0 %3533 }
0x17c3   : > { %v3535_v43 = vmul.f32 0.03125, %v3534_v25 }
0x17c5   : > { %v3536_v26 = vsub.f32 %v3524_v23, %v3535_v43 }
0x17c7   : > { %v3537_v27 = vmul.f32 %v3536_v26, %v3536_v26 }
0x17c9   : > { %v3538_v28 = vsel %vm1385_vm1, %v3537_v27, 0.0 }
0x17ca   : > { %3539 = vadd.xlane.f32.xlu0 %v3538_v28 }
0x1857   : > { %v3540_v29 = vpop.xlane.xlu0 %3539 }
0x1858   : > { %v3541_v30 = vmul.f32 0.032258064, %v3540_v29 }
0x185a   : > { %4716 = vrsqrt.f32 %v3541_v30  ;;  %vm3544_vm4 = vcmp.eq.f32.partialorder %v3541_v30, inf  ;;  %v3547_v33 = vand.u32 2147483648, %v3541_v30  ;;  %vm3546_vm5 = vcmp.eq.f32.partialorder %v3541_v30, 0.0 }
0x1864   : > { %v4717_v31 = vpop.eup %4716 }
0x1865   : > { %v3543_v32 = vmul.f32 %v4717_v31, %v3541_v30 }
0x1867   : > { %v3545_v34 = vsel %vm3544_vm4, %v3541_v30, %v3543_v32 }
0x1868   : > { %v3548_v35 = vsel %vm3546_vm5, %v3547_v33, %v3545_v34 }
0x1869   : > { %v3549_v36 = vadd.f32 1e-06, %v3548_v35 }
0x186b   : > { %4718 = vrcp.f32 %v3549_v36 }
0x1875   : > { %v4719_v37 = vpop.eup %4718 }
0x1876   : > { %v3552_v39 = vmul.f32 %v4719_v37, %v3536_v26 }
0x1878   : > { %v3559_v41 = vmul.f32 %v4109_v38, %v3552_v39 }
0x187a   : > { %v3566_v14 = vadd.f32 %v4110_v40, %v3559_v41 }
0x187c   : > { %3567 = vst.msk [vmem:[%s6265_s25] sm:$0xff] %vm1385_vm1, %v3566_v14 }
0x187d PF: > { %s6825_s13 = sld [smem:[#allocation48_spill]]  ;;  %s6826_s8 = sld [smem:[#allocation58_spill]] }
0x187e   : > { %s6827_s15 = sld [smem:[#allocation84_spill]]  ;;  %s3582_s20 = sshll.u32 %s6265_s25, 4  ;;  %s3583_s20 = int_to_ptr.vmem [resolvable:$true] %s3582_s20 }
0x187f   : > { %s3569_s14 = scalar_lea.sflag [#allocation6], %s6160_s12  ;;  %s5196_s24 = scalar_lea.vmem %s3583_s20, 128 }
0x1880   : > { %p5197_p8 = scmp.ne.s32.totalorder %s3583_s20, %s5196_s24  ;;  %s5389_s1 = smov [#allocation31]  }
0x1881   : > { %s5200_s16 = sshll.u32 %s5389_s1, 4  ;;  %s5201_s16 = int_to_ptr.vmem [resolvable:$false] %s5200_s16 }
0x1882   : > { %s5202_s29 = scalar_lea.vmem %s5201_s16, 256  ;;  %p5203_p0 = scmp.lt.s32.totalorder %s3583_s20, %s5201_s16 }
0x1883   : > { %s4112_s22 = sshll.u32 %s6825_s13, 7  ;;  %p6828_p2 = scmp.ne.s32.totalorder %s6826_s8, 0 }
0x1884   : > { %s6566_s10 = scalar_lea.hbm %s6827_s15, %s4112_s22  ;;  %p5204_p12 = scmp.lt.s32.totalorder %s5202_s29, %s5196_s24 }
0x1885   : > { %p5198_p13 = pnand %p5197_p8, %p6828_p2 }
0x1886   : > { %p5205_p10 = por %p5204_p12, %p5203_p0 }
0x1887   : > { %p5199_p1 = pneg %p5198_p13 }
0x1889   : > { %p5206_p4 = pnand %p5205_p10, %p5199_p1 }
0x188b   : > { %5209 = shalt.err (!%p5206_p4)
}
0x188c   : > { %s5210_s12 = scalar_lea.hbm %s6566_s10, 128  ;;  %s5214_s21 = scalar_lea.hbm %s6827_s15, 256 }
0x188d   : > { %p5211_p11 = scmp.ne.s32.totalorder %s6566_s10, %s5210_s12  ;;  %p5215_p6 = scmp.lt.u32.totalorder %s6566_s10, %s6827_s15 }
0x188e   : > { %p5216_p3 = scmp.lt.u32.totalorder %s5214_s21, %s5210_s12  ;;  %p5218_p8 = scmp.lt.u32.totalorder %s5210_s12, %s6566_s10 }
0x188f   : > { %p5212_p7 = pnand %p5211_p11, %p6828_p2 }
0x1890   : > { %p5217_p5 = por %p5216_p3, %p5215_p6 }
0x1891   : > { %p5213_p9 = pneg %p5212_p7 }
0x1892   : > { %p5219_p13 = por %p5218_p8, %p5217_p5 }
0x1894   : > { %p5220_p1 = pnand %p5219_p13, %p5213_p9 }
0x1896   : > { %5223 = shalt.err (!%p5220_p1)
}
0x1897   : > { %4499 = dma.vmem_to_hbm [thread:$0]  (%p6828_p2), %s3583_s20, 128, %s6566_s10, %s3569_s14  }
0x1898 PF: > { %s6829_s3 = sld [smem:[#allocation51_spill]]  ;;  %s6830_s19 = sld [smem:[#allocation44_spill]] }
0x1899   : > { %s6831_s6 = sld [smem:[#allocation59_spill]] }
0x189e   : > { %p4516_p0 = scmp.ge.s32.totalorder %s6829_s3, 2  ;;  %s3594_s17 = sand.u32 1, %s6830_s19  }
0x189f   : > { %p6832_p12 = scmp.ne.s32.totalorder %s6831_s6, 0  ;;  %s3595_s2 = scalar_lea.sflag [#allocation6], %s3594_s17 }
0x18a1   : > { %p4509_p10 = pnand %p4516_p0, %p6832_p12 }
0x18a3   : > { %5305 = dma.done.wait (!%p4509_p10), %s3595_s2, 128  }
0x18a4   : > { %5307 = vsyncadd (!%p4509_p10), %s3595_s2, 4294967168  ;;  %s62_s3 = sadd.s32 1, %s6829_s3   ;;  %s6833_s5 = sld [smem:[#allocation42_spill]] }
0x18a5   : > { %p59_p4 = scmp.ge.s32.totalorder %s62_s3, 6   ;;  %s6834_s26 = sld [smem:[#allocation43_spill]] }
0x18a6   : > { %s6835_s27 = sld [smem:[#allocation55_spill]]  ;;  %s6836_s28 = sld [smem:[#allocation45_spill]] }
0x18a7   : > { %s6837_s6 = sld [smem:[#allocation46_spill]]  ;;  %s6838_s2 = sld [smem:[#allocation56_spill]] }
0x18a8   : > { %s6839_s29 = sld [smem:[#allocation49_spill]]  ;;  %s6840_s0 = sld [smem:[#allocation50_spill]] }
0x18a9   : > { %s6841_s7 = sld [smem:[#allocation53_spill]]  ;;  %s6842_s30 = sld [smem:[#allocation54_spill]] }
0x18aa   :  { %61 = sbr.rel (!%p59_p4) target bundleno = 50 (0x32), region = 363 }
0x18b1   :  { %3600 = vsyncpa [#allocation5], 1 }
0x18b2   :  { %3602 = vsyncpa [#allocation5 + $0x1], 1 }
0x18b3   :  { %3603 = vsyncpa [#allocation8], 1 }
0x18b4   :  { %3605 = vsyncpa [#allocation8 + $0x1], 1 }
0x18b5   :  { %3606 = vsyncpa [#allocation11], 1 }
0x18b6   :  { %3608 = vsyncpa [#allocation11 + $0x1], 1 }
0x18b7   :  { %3609 = vsyncpa [#allocation14], 1 }
0x18b8   :  { %3611 = vsyncpa [#allocation14 + $0x1], 1 }
0x18b9   :  { %3612 = vsyncpa [#allocation17], 1 }
0x18ba   :  { %3614 = vsyncpa [#allocation17 + $0x1], 1 }
0x18bb   :  { %3615 = vsyncpa [#allocation20], 1 }
0x18bc   :  { %3617 = vsyncpa [#allocation20 + $0x1], 1 }
0x18bd   :  { %3618 = vsyncpa [#allocation23], 1 }
0x18be   :  { %3620 = vsyncpa [#allocation23 + $0x1], 1 }
0x18bf   :  { %3621 = vsyncpa [#allocation26], 1 }
0x18c0   :  { %3623 = vsyncpa [#allocation26 + $0x1], 1 }
0x18c1   :  { %3624 = vsyncpa [#allocation29], 1 }
0x18c2   :  { %3625 = vsyncpa [#allocation6], 1 }
0x18c3   :  { %3627 = vsyncpa [#allocation6 + $0x1], 1 }

</bundles_post_ra>
